<compile_context>
chip_gen: v5e
topology: v5e:2x2
jax: 0.10.0
libtpu: 0.0.40
codegen_flags: <defaults>
</compile_context>

<pallas_src>
import math

import jax
import jax.numpy as jnp
from jax import lax
from jax.experimental import pallas as pl
from jax.experimental.pallas import tpu as pltpu

# ----------------------------- config (small, forward-consistent) ------------
SEQ_LEN = 16
PRED_LEN = 8
ENC_IN = 4          # channels
D_MODEL = 32
FF_FACTOR = 2
N_HEADS = 4
E_LAYERS = 2
WIN_LEN = 8
WIN_STRIDE = 4
CHANNEL_ATTN = 1
BATCH = 2

T = (SEQ_LEN - WIN_LEN) // WIN_STRIDE + 1   # input_token_size = 3
DFF = D_MODEL * FF_FACTOR
DH = D_MODEL // N_HEADS

MAX_B_TILE = 8                              # max batch elements per grid step

REVIN_EPS = 1e-5
LN_EPS = 1e-5
BN_EPS = 1e-5
NEG = -1e30


# ----------------------------- in-kernel helpers -----------------------------
def _layer_norm(x, w, b):
    mu = jnp.mean(x, axis=-1, keepdims=True)
    var = jnp.mean((x - mu) ** 2, axis=-1, keepdims=True)
    return (x - mu) * lax.rsqrt(var + LN_EPS) * w + b


def _matmul_nt(a, b):
    # a @ b.T without an explicit transpose (contract last dims).
    return lax.dot_general(a, b, (((1,), (1,)), ((), ())),
                           preferred_element_type=jnp.float32)


def _softmax(s):
    m = jnp.max(s, axis=-1, keepdims=True)
    e = jnp.exp(s - m)
    return e / jnp.sum(e, axis=-1, keepdims=True)


# ----------------------------- the kernel (specialized per batch tile) -------
def make_kernel(b_tile):
    r_rows = b_tile * ENC_IN        # input rows per grid step (one per (b, c))
    n_rows = T * r_rows             # token rows per grid step

    def kernel(
        x_ref, seq_bias_ref, chan_bias_ref,
        w_map_ref, pos_ref,
        w_in_ref, b_in_ref, w_out_ref, b_out_ref,
        ln1w_ref, ln1b_ref, ln2w_ref, ln2b_ref,
        w_ff1_ref, b_ff1_ref, w_ff2_ref, b_ff2_ref,
        bn_scale_ref, bn_shift_ref,
        wc_in_ref, bc_in_ref, wc_out_ref, bc_out_ref,
        cbn_scale_ref, cbn_shift_ref,
        w_pred_ref, b_pred_ref,
        y_ref,
    ):
        D = D_MODEL

        # ---------------- RevIN 'norm' (subtract_last=True, affine=False) ----
        x = x_ref[...]                                   # (r_rows, seq_len)
        last = x[:, SEQ_LEN - 1:SEQ_LEN]                 # (r_rows, 1)
        mean = jnp.mean(x, axis=1, keepdims=True)
        var = jnp.mean((x - mean) ** 2, axis=1, keepdims=True)
        stdev = jnp.sqrt(var + REVIN_EPS)                # (r_rows, 1)
        xn = (x - last) / stdev

        # ---------------- unfold + mapping Linear + position embedding -------
        # windows stacked on the sublane axis -> token row = t*r_rows + r
        wins = [xn[:, t * WIN_STRIDE:t * WIN_STRIDE + WIN_LEN] for t in range(T)]
        tok_in = jnp.concatenate(wins, axis=0)           # (n_rows, win_len)
        X = jnp.dot(tok_in, w_map_ref[...],
                    preferred_element_type=jnp.float32) + pos_ref[...]   # (n_rows, D)

        seq_bias = seq_bias_ref[...]                     # 0 / -1e30, same (b, c)
        chan_bias = chan_bias_ref[...]                   # 0 / -1e30, same (b, t)

        # ---------------- TransformerEncoderLayer x E_LAYERS (+BN residual) --
        for i in range(E_LAYERS):
            resid = X
            qkv = jnp.dot(X, w_in_ref[i],
                          preferred_element_type=jnp.float32) + b_in_ref[i]
            q = qkv[:, :D]                               # head scale folded in
            k = qkv[:, D:2 * D]
            v = qkv[:, 2 * D:3 * D]
            heads = []
            for h in range(N_HEADS):
                sl = slice(h * DH, (h + 1) * DH)
                s = _matmul_nt(q[:, sl], k[:, sl]) + seq_bias     # (n_rows, n_rows)
                p = _softmax(s)
                heads.append(jnp.dot(p, v[:, sl],
                                     preferred_element_type=jnp.float32))
            attn = jnp.dot(jnp.concatenate(heads, axis=-1), w_out_ref[i],
                           preferred_element_type=jnp.float32) + b_out_ref[i]

            src = _layer_norm(X + attn, ln1w_ref[i], ln1b_ref[i])
            ff = jnp.maximum(
                jnp.dot(src, w_ff1_ref[i],
                        preferred_element_type=jnp.float32) + b_ff1_ref[i],
                0.0)
            ff = jnp.dot(ff, w_ff2_ref[i],
                         preferred_element_type=jnp.float32) + b_ff2_ref[i]
            src = _layer_norm(src + ff, ln2w_ref[i], ln2b_ref[i])

            # BatchNorm1d(input_token_size) (eval: per-row affine) + residual
            X = src * bn_scale_ref[i] + bn_shift_ref[i] + resid

        # ---------------- channel attention + channel BatchNorm + residual ---
        if CHANNEL_ATTN == 1:
            resid = X
            qkv = jnp.dot(X, wc_in_ref[...],
                          preferred_element_type=jnp.float32) + bc_in_ref[...]
            q = qkv[:, :D]                               # 1/sqrt(D) folded in
            k = qkv[:, D:2 * D]
            v = qkv[:, 2 * D:3 * D]
            s = _matmul_nt(q, k) + chan_bias             # single head
            p = _softmax(s)
            o = jnp.dot(p, v, preferred_element_type=jnp.float32)
            o = jnp.dot(o, wc_out_ref[...],
                        preferred_element_type=jnp.float32) + bc_out_ref[...]
            X = o * cbn_scale_ref[...] + cbn_shift_ref[...] + resid

        # ---------------- predict Linear(d_model*T -> pred_len) --------------
        y = jnp.zeros((r_rows, PRED_LEN), jnp.float32)
        for t in range(T):
            y = y + jnp.dot(X[t * r_rows:(t + 1) * r_rows, :], w_pred_ref[t],
                            preferred_element_type=jnp.float32)
        y = y + b_pred_ref[...]

        # ---------------- RevIN 'denorm' --------------------------------------
        y_ref[...] = y * stdev + last                    # (r_rows, pred_len)

    return kernel


# ----------------------------- parameter setup (deterministic) ---------------
def build_params(key):
    keys = iter(jax.random.split(key, 32))

    def nrm(shape, scale=0.1):
        return jax.random.normal(next(keys), shape, jnp.float32) * scale

    p = {}
    p["w_map"] = nrm((D_MODEL, WIN_LEN))
    p["b_map"] = nrm((D_MODEL,))
    p["pos"] = nrm((T, D_MODEL))
    p["w_in"] = nrm((E_LAYERS, 3 * D_MODEL, D_MODEL))
    p["b_in"] = nrm((E_LAYERS, 3 * D_MODEL))
    p["w_out"] = nrm((E_LAYERS, D_MODEL, D_MODEL))
    p["b_out"] = nrm((E_LAYERS, D_MODEL))
    p["ln1_w"] = 1.0 + nrm((E_LAYERS, D_MODEL))
    p["ln1_b"] = nrm((E_LAYERS, D_MODEL))
    p["ln2_w"] = 1.0 + nrm((E_LAYERS, D_MODEL))
    p["ln2_b"] = nrm((E_LAYERS, D_MODEL))
    p["w_ff1"] = nrm((E_LAYERS, DFF, D_MODEL))
    p["b_ff1"] = nrm((E_LAYERS, DFF))
    p["w_ff2"] = nrm((E_LAYERS, D_MODEL, DFF))
    p["b_ff2"] = nrm((E_LAYERS, D_MODEL))
    p["bn_w"] = 1.0 + nrm((E_LAYERS, T))
    p["bn_b"] = nrm((E_LAYERS, T))
    p["bn_rm"] = nrm((E_LAYERS, T))
    p["bn_rv"] = 1.0 + jnp.abs(nrm((E_LAYERS, T)))
    p["wc_in"] = nrm((3 * D_MODEL, D_MODEL))
    p["bc_in"] = nrm((3 * D_MODEL,))
    p["wc_out"] = nrm((D_MODEL, D_MODEL))
    p["bc_out"] = nrm((D_MODEL,))
    p["cbn_w"] = 1.0 + nrm((ENC_IN,))
    p["cbn_b"] = nrm((ENC_IN,))
    p["cbn_rm"] = nrm((ENC_IN,))
    p["cbn_rv"] = 1.0 + jnp.abs(nrm((ENC_IN,)))
    p["w_pred"] = nrm((PRED_LEN, D_MODEL * T))
    p["b_pred"] = nrm((PRED_LEN,))
    return p


def prepare_kernel_inputs(p, b_tile):
    """One-time glue: transpose weights, fold scales/BN stats, build additive biases."""
    r_rows = b_tile * ENC_IN
    n_rows = T * r_rows

    rows = jnp.arange(n_rows)
    t_idx = rows // r_rows                   # token index within each (b, c) sequence
    r_idx = rows % r_rows                    # (b_local, c) pair index
    b_idx = r_idx // ENC_IN                  # batch element within the tile
    c_idx = r_idx % ENC_IN                   # channel

    # sequence attention: attend iff same batch AND same channel (same r)
    seq_ok = r_idx[:, None] == r_idx[None, :]
    # channel attention: attend iff same batch AND same time step
    chan_ok = (t_idx[:, None] == t_idx[None, :]) & (b_idx[:, None] == b_idx[None, :])
    seq_bias = jnp.where(seq_ok, 0.0, NEG).astype(jnp.float32)
    chan_bias = jnp.where(chan_ok, 0.0, NEG).astype(jnp.float32)

    # position embedding + mapping bias, pre-broadcast per token row
    pos_rows = p["pos"][t_idx] + p["b_map"][None, :]                 # (n_rows, D)

    # fold attention scales into the Q projection weights/biases
    head_scale = 1.0 / math.sqrt(DH)
    scale_vec = jnp.concatenate([jnp.full((D_MODEL,), head_scale, jnp.float32),
                                 jnp.ones((2 * D_MODEL,), jnp.float32)])
    w_in_t = jnp.transpose(p["w_in"], (0, 2, 1)) * scale_vec[None, None, :]
    b_in_s = (p["b_in"] * scale_vec[None, :]).reshape(E_LAYERS, 1, 3 * D_MODEL)

    chan_scale = 1.0 / math.sqrt(D_MODEL)
    cscale_vec = jnp.concatenate([jnp.full((D_MODEL,), chan_scale, jnp.float32),
                                  jnp.ones((2 * D_MODEL,), jnp.float32)])
    wc_in_t = p["wc_in"].T * cscale_vec[None, :]
    bc_in_s = (p["bc_in"] * cscale_vec).reshape(1, 3 * D_MODEL)

    # BatchNorm1d(T) folded to per-token-row affine (eval mode)
    bn_s = p["bn_w"] / jnp.sqrt(p["bn_rv"] + BN_EPS)                 # (L, T)
    bn_sh = p["bn_b"] - p["bn_rm"] * bn_s
    bn_scale = bn_s[:, t_idx][..., None]                             # (L, n_rows, 1)
    bn_shift = bn_sh[:, t_idx][..., None]

    # BatchNorm1d(enc_in) folded to per-token-row affine (eval mode)
    cbn_s = p["cbn_w"] / jnp.sqrt(p["cbn_rv"] + BN_EPS)              # (C,)
    cbn_sh = p["cbn_b"] - p["cbn_rm"] * cbn_s
    cbn_scale = cbn_s[c_idx][:, None]                                # (n_rows, 1)
    cbn_shift = cbn_sh[c_idx][:, None]

    # predict weight: (P, T*D) -> (T, D, P)   (flatten order of (T, D) is t*D + d)
    w_pred_r = p["w_pred"].reshape(PRED_LEN, T, D_MODEL).transpose(1, 2, 0)

    return [
        seq_bias, chan_bias,
        p["w_map"].T, pos_rows,
        w_in_t, b_in_s,
        jnp.transpose(p["w_out"], (0, 2, 1)), p["b_out"].reshape(E_LAYERS, 1, D_MODEL),
        p["ln1_w"].reshape(E_LAYERS, 1, D_MODEL), p["ln1_b"].reshape(E_LAYERS, 1, D_MODEL),
        p["ln2_w"].reshape(E_LAYERS, 1, D_MODEL), p["ln2_b"].reshape(E_LAYERS, 1, D_MODEL),
        jnp.transpose(p["w_ff1"], (0, 2, 1)), p["b_ff1"].reshape(E_LAYERS, 1, DFF),
        jnp.transpose(p["w_ff2"], (0, 2, 1)), p["b_ff2"].reshape(E_LAYERS, 1, D_MODEL),
        bn_scale, bn_shift,
        wc_in_t, bc_in_s,
        p["wc_out"].T, p["bc_out"].reshape(1, D_MODEL),
        cbn_scale, cbn_shift,
        w_pred_r, p["b_pred"].reshape(1, PRED_LEN),
    ]


# ----------------------------- wrapper ---------------------------------------
def forward(x_enc, params, x_mark_enc=None, x_dec=None, x_mark_dec=None):
    """x_enc: (B, seq_len, enc_in) -> y: (B, pred_len, enc_in). x_mark_* unused."""
    B = x_enc.shape[0]
    b_tile = min(MAX_B_TILE, B)              # adapt tile to batch (no 4x padding waste)
    nblk = -(-B // b_tile)
    b_pad = nblk * b_tile
    r_rows = b_tile * ENC_IN

    weights = prepare_kernel_inputs(params, b_tile)
    kernel = make_kernel(b_tile)

    x_cf = jnp.transpose(x_enc, (0, 2, 1)).astype(jnp.float32)       # (B, C, S)
    if b_pad != B:
        x_cf = jnp.pad(x_cf, ((0, b_pad - B), (0, 0), (0, 0)))        # zero-pad is safe
    x2d = x_cf.reshape(b_pad * ENC_IN, SEQ_LEN)                       # row = b*C + c

    def const_spec(a):
        nd = a.ndim
        return pl.BlockSpec(a.shape, lambda b, _nd=nd: (0,) * _nd)

    in_specs = [pl.BlockSpec((r_rows, SEQ_LEN), lambda b: (b, 0))]
    in_specs += [const_spec(w) for w in weights]

    y2d = pl.pallas_call(
        kernel,
        out_shape=jax.ShapeDtypeStruct((b_pad * ENC_IN, PRED_LEN), jnp.float32),
        grid=(nblk,),
        in_specs=in_specs,
        out_specs=pl.BlockSpec((r_rows, PRED_LEN), lambda b: (b, 0)),
        compiler_params=pltpu.CompilerParams(dimension_semantics=("parallel",)),
    )(x2d, *weights)

    y = y2d.reshape(b_pad, ENC_IN, PRED_LEN)[:B]
    return jnp.transpose(y, (0, 2, 1))                                # (B, pred_len, enc_in)


forward_jit = jax.jit(forward)


if __name__ == "__main__":
    key = jax.random.PRNGKey(0)
    kp, kx = jax.random.split(key)
    params = build_params(kp)

    x_enc = jax.random.normal(kx, (BATCH, SEQ_LEN, ENC_IN), jnp.float32)
    y = forward_jit(x_enc, params)
    y = jax.block_until_ready(y)

    assert y.shape == (BATCH, PRED_LEN, ENC_IN), y.shape
    assert bool(jnp.all(jnp.isfinite(y)))
    print("KERNEL_OK")
</pallas_src>

<mosaic_0001>
module attributes {stable_mosaic.version = 11 : i64} {
  func.func @kernel(%arg0: i32, %arg1: memref<8x16xf32, #tpu.memory_space<vmem>>, %arg2: memref<24x24xf32, #tpu.memory_space<vmem>>, %arg3: memref<24x24xf32, #tpu.memory_space<vmem>>, %arg4: memref<8x32xf32, #tpu.memory_space<vmem>>, %arg5: memref<24x32xf32, #tpu.memory_space<vmem>>, %arg6: memref<2x32x96xf32, #tpu.memory_space<vmem>>, %arg7: memref<2x1x96xf32, #tpu.memory_space<vmem>>, %arg8: memref<2x32x32xf32, #tpu.memory_space<vmem>>, %arg9: memref<2x1x32xf32, #tpu.memory_space<vmem>>, %arg10: memref<2x1x32xf32, #tpu.memory_space<vmem>>, %arg11: memref<2x1x32xf32, #tpu.memory_space<vmem>>, %arg12: memref<2x1x32xf32, #tpu.memory_space<vmem>>, %arg13: memref<2x1x32xf32, #tpu.memory_space<vmem>>, %arg14: memref<2x32x64xf32, #tpu.memory_space<vmem>>, %arg15: memref<2x1x64xf32, #tpu.memory_space<vmem>>, %arg16: memref<2x64x32xf32, #tpu.memory_space<vmem>>, %arg17: memref<2x1x32xf32, #tpu.memory_space<vmem>>, %arg18: memref<2x24x1xf32, #tpu.memory_space<vmem>>, %arg19: memref<2x24x1xf32, #tpu.memory_space<vmem>>, %arg20: memref<32x96xf32, #tpu.memory_space<vmem>>, %arg21: memref<1x96xf32, #tpu.memory_space<vmem>>, %arg22: memref<32x32xf32, #tpu.memory_space<vmem>>, %arg23: memref<1x32xf32, #tpu.memory_space<vmem>>, %arg24: memref<24x1xf32, #tpu.memory_space<vmem>>, %arg25: memref<24x1xf32, #tpu.memory_space<vmem>>, %arg26: memref<3x32x8xf32, #tpu.memory_space<vmem>>, %arg27: memref<1x8xf32, #tpu.memory_space<vmem>>, %arg28: memref<8x8xf32, #tpu.memory_space<vmem>>) attributes {dimension_semantics = [#tpu.dimension_semantics<parallel>], iteration_bounds = array<i64: 1>, scalar_prefetch = 0 : i64, scratch_operands = 0 : i64, tpu.core_type = #tpu.core_type<tc>, window_params = [{transform_indices = @transform_0, window_bounds = array<i64: 8, 16>}, {pipeline_mode = #tpu.pipeline_mode<synchronous>, transform_indices = @transform_1, window_bounds = array<i64: 24, 24>}, {pipeline_mode = #tpu.pipeline_mode<synchronous>, transform_indices = @transform_2, window_bounds = array<i64: 24, 24>}, {pipeline_mode = #tpu.pipeline_mode<synchronous>, transform_indices = @transform_3, window_bounds = array<i64: 8, 32>}, {pipeline_mode = #tpu.pipeline_mode<synchronous>, transform_indices = @transform_4, window_bounds = array<i64: 24, 32>}, {pipeline_mode = #tpu.pipeline_mode<synchronous>, transform_indices = @transform_5, window_bounds = array<i64: 2, 32, 96>}, {pipeline_mode = #tpu.pipeline_mode<synchronous>, transform_indices = @transform_6, window_bounds = array<i64: 2, 1, 96>}, {pipeline_mode = #tpu.pipeline_mode<synchronous>, transform_indices = @transform_7, window_bounds = array<i64: 2, 32, 32>}, {pipeline_mode = #tpu.pipeline_mode<synchronous>, transform_indices = @transform_8, window_bounds = array<i64: 2, 1, 32>}, {pipeline_mode = #tpu.pipeline_mode<synchronous>, transform_indices = @transform_9, window_bounds = array<i64: 2, 1, 32>}, {pipeline_mode = #tpu.pipeline_mode<synchronous>, transform_indices = @transform_10, window_bounds = array<i64: 2, 1, 32>}, {pipeline_mode = #tpu.pipeline_mode<synchronous>, transform_indices = @transform_11, window_bounds = array<i64: 2, 1, 32>}, {pipeline_mode = #tpu.pipeline_mode<synchronous>, transform_indices = @transform_12, window_bounds = array<i64: 2, 1, 32>}, {pipeline_mode = #tpu.pipeline_mode<synchronous>, transform_indices = @transform_13, window_bounds = array<i64: 2, 32, 64>}, {pipeline_mode = #tpu.pipeline_mode<synchronous>, transform_indices = @transform_14, window_bounds = array<i64: 2, 1, 64>}, {pipeline_mode = #tpu.pipeline_mode<synchronous>, transform_indices = @transform_15, window_bounds = array<i64: 2, 64, 32>}, {pipeline_mode = #tpu.pipeline_mode<synchronous>, transform_indices = @transform_16, window_bounds = array<i64: 2, 1, 32>}, {pipeline_mode = #tpu.pipeline_mode<synchronous>, transform_indices = @transform_17, window_bounds = array<i64: 2, 24, 1>}, {pipeline_mode = #tpu.pipeline_mode<synchronous>, transform_indices = @transform_18, window_bounds = array<i64: 2, 24, 1>}, {pipeline_mode = #tpu.pipeline_mode<synchronous>, transform_indices = @transform_19, window_bounds = array<i64: 32, 96>}, {pipeline_mode = #tpu.pipeline_mode<synchronous>, transform_indices = @transform_20, window_bounds = array<i64: 1, 96>}, {pipeline_mode = #tpu.pipeline_mode<synchronous>, transform_indices = @transform_21, window_bounds = array<i64: 32, 32>}, {pipeline_mode = #tpu.pipeline_mode<synchronous>, transform_indices = @transform_22, window_bounds = array<i64: 1, 32>}, {pipeline_mode = #tpu.pipeline_mode<synchronous>, transform_indices = @transform_23, window_bounds = array<i64: 24, 1>}, {pipeline_mode = #tpu.pipeline_mode<synchronous>, transform_indices = @transform_24, window_bounds = array<i64: 24, 1>}, {pipeline_mode = #tpu.pipeline_mode<synchronous>, transform_indices = @transform_25, window_bounds = array<i64: 3, 32, 8>}, {pipeline_mode = #tpu.pipeline_mode<synchronous>, transform_indices = @transform_26, window_bounds = array<i64: 1, 8>}, {transform_indices = @transform_27, window_bounds = array<i64: 8, 8>}]} {
    %c0 = arith.constant 0 : index
    %c0_0 = arith.constant 0 : index
    %0 = vector.load %arg1[%c0, %c0_0] : memref<8x16xf32, #tpu.memory_space<vmem>>, vector<8x16xf32>
    %1 = vector.extract_strided_slice %0 {offsets = [0, 15], sizes = [8, 1], strides = [1, 1]} : vector<8x16xf32> to vector<8x1xf32>
    %cst = arith.constant dense<0.000000e+00> : vector<8xf32>
    %2 = vector.multi_reduction <add>, %0, %cst [1] : vector<8x16xf32> to vector<8xf32>
    %3 = vector.shape_cast %2 : vector<8xf32> to vector<8x1xf32>
    %cst_1 = arith.constant 1.600000e+01 : f32
    %4 = vector.broadcast %cst_1 : f32 to vector<8x1xf32>
    %5 = arith.divf %3, %4 : vector<8x1xf32>
    %6 = vector.broadcast %5 : vector<8x1xf32> to vector<8x16xf32>
    %7 = arith.subf %0, %6 : vector<8x16xf32>
    %8 = arith.mulf %7, %7 : vector<8x16xf32>
    %cst_2 = arith.constant dense<0.000000e+00> : vector<8xf32>
    %9 = vector.multi_reduction <add>, %8, %cst_2 [1] : vector<8x16xf32> to vector<8xf32>
    %10 = vector.shape_cast %9 : vector<8xf32> to vector<8x1xf32>
    %cst_3 = arith.constant 1.600000e+01 : f32
    %11 = vector.broadcast %cst_3 : f32 to vector<8x1xf32>
    %12 = arith.divf %10, %11 : vector<8x1xf32>
    %cst_4 = arith.constant 9.99999974E-6 : f32
    %13 = vector.broadcast %cst_4 : f32 to vector<8x1xf32>
    %14 = arith.addf %12, %13 : vector<8x1xf32>
    %15 = math.sqrt %14 : vector<8x1xf32>
    %16 = vector.broadcast %1 : vector<8x1xf32> to vector<8x16xf32>
    %17 = arith.subf %0, %16 : vector<8x16xf32>
    %18 = vector.broadcast %15 : vector<8x1xf32> to vector<8x16xf32>
    %19 = arith.divf %17, %18 : vector<8x16xf32>
    %20 = vector.extract_strided_slice %19 {offsets = [0, 0], sizes = [8, 8], strides = [1, 1]} : vector<8x16xf32> to vector<8x8xf32>
    %21 = vector.extract_strided_slice %19 {offsets = [0, 4], sizes = [8, 8], strides = [1, 1]} : vector<8x16xf32> to vector<8x8xf32>
    %22 = vector.extract_strided_slice %19 {offsets = [0, 8], sizes = [8, 8], strides = [1, 1]} : vector<8x16xf32> to vector<8x8xf32>
    %23 = tpu.concatenate %20, %21, %22 in 0 : vector<8x8xf32>, vector<8x8xf32>, vector<8x8xf32> -> vector<24x8xf32>
    %c0_5 = arith.constant 0 : index
    %c0_6 = arith.constant 0 : index
    %24 = vector.load %arg4[%c0_5, %c0_6] : memref<8x32xf32, #tpu.memory_space<vmem>>, vector<8x32xf32>
    %cst_7 = arith.constant dense<0.000000e+00> : vector<24x32xf32>
    %25 = tpu.matmul %23, %24, %cst_7 {dimension_numbers = #tpu.dot_dimension_numbers<[1], [0], [0], [1], [0, 0, 1, 1], [], []>} : vector<24x8xf32>, vector<8x32xf32>, vector<24x32xf32> -> vector<24x32xf32>
    %c0_8 = arith.constant 0 : index
    %c0_9 = arith.constant 0 : index
    %26 = vector.load %arg5[%c0_8, %c0_9] : memref<24x32xf32, #tpu.memory_space<vmem>>, vector<24x32xf32>
    %27 = arith.addf %25, %26 : vector<24x32xf32>
    %c0_10 = arith.constant 0 : index
    %c0_11 = arith.constant 0 : index
    %28 = vector.load %arg2[%c0_10, %c0_11] : memref<24x24xf32, #tpu.memory_space<vmem>>, vector<24x24xf32>
    %c0_12 = arith.constant 0 : index
    %c0_13 = arith.constant 0 : index
    %29 = vector.load %arg3[%c0_12, %c0_13] : memref<24x24xf32, #tpu.memory_space<vmem>>, vector<24x24xf32>
    %c0_14 = arith.constant 0 : index
    %c0_15 = arith.constant 0 : index
    %c0_16 = arith.constant 0 : index
    %30 = vector.load %arg6[%c0_14, %c0_15, %c0_16] : memref<2x32x96xf32, #tpu.memory_space<vmem>>, vector<1x32x96xf32>
    %31 = vector.shape_cast %30 : vector<1x32x96xf32> to vector<32x96xf32>
    %cst_17 = arith.constant dense<0.000000e+00> : vector<24x96xf32>
    %32 = tpu.matmul %27, %31, %cst_17 {dimension_numbers = #tpu.dot_dimension_numbers<[1], [0], [0], [1], [0, 0, 1, 1], [], []>} : vector<24x32xf32>, vector<32x96xf32>, vector<24x96xf32> -> vector<24x96xf32>
    %c0_18 = arith.constant 0 : index
    %c0_19 = arith.constant 0 : index
    %c0_20 = arith.constant 0 : index
    %33 = vector.load %arg7[%c0_18, %c0_19, %c0_20] : memref<2x1x96xf32, #tpu.memory_space<vmem>>, vector<1x1x96xf32>
    %34 = vector.shape_cast %33 : vector<1x1x96xf32> to vector<1x96xf32>
    %35 = vector.broadcast %34 : vector<1x96xf32> to vector<24x96xf32>
    %36 = arith.addf %32, %35 : vector<24x96xf32>
    %37 = vector.extract_strided_slice %36 {offsets = [0, 0], sizes = [24, 32], strides = [1, 1]} : vector<24x96xf32> to vector<24x32xf32>
    %38 = vector.extract_strided_slice %36 {offsets = [0, 32], sizes = [24, 32], strides = [1, 1]} : vector<24x96xf32> to vector<24x32xf32>
    %39 = vector.extract_strided_slice %36 {offsets = [0, 64], sizes = [24, 32], strides = [1, 1]} : vector<24x96xf32> to vector<24x32xf32>
    %40 = vector.extract_strided_slice %37 {offsets = [0, 0], sizes = [24, 8], strides = [1, 1]} : vector<24x32xf32> to vector<24x8xf32>
    %41 = vector.extract_strided_slice %38 {offsets = [0, 0], sizes = [24, 8], strides = [1, 1]} : vector<24x32xf32> to vector<24x8xf32>
    %cst_21 = arith.constant dense<0.000000e+00> : vector<24x24xf32>
    %42 = tpu.matmul %40, %41, %cst_21 {dimension_numbers = #tpu.dot_dimension_numbers<[1], [1], [0], [0], [0, 0, 1, 0], [], []>} : vector<24x8xf32>, vector<24x8xf32>, vector<24x24xf32> -> vector<24x24xf32>
    %43 = arith.addf %42, %28 : vector<24x24xf32>
    %cst_22 = arith.constant dense<0xFF800000> : vector<24xf32>
    %44 = vector.multi_reduction <maximumf>, %43, %cst_22 [1] : vector<24x24xf32> to vector<24xf32>
    %45 = vector.shape_cast %44 : vector<24xf32> to vector<24x1xf32>
    %46 = vector.broadcast %45 : vector<24x1xf32> to vector<24x24xf32>
    %47 = arith.subf %43, %46 : vector<24x24xf32>
    %48 = math.exp %47 : vector<24x24xf32>
    %cst_23 = arith.constant dense<0.000000e+00> : vector<24xf32>
    %49 = vector.multi_reduction <add>, %48, %cst_23 [1] : vector<24x24xf32> to vector<24xf32>
    %50 = vector.shape_cast %49 : vector<24xf32> to vector<24x1xf32>
    %51 = vector.broadcast %50 : vector<24x1xf32> to vector<24x24xf32>
    %52 = arith.divf %48, %51 : vector<24x24xf32>
    %53 = vector.extract_strided_slice %39 {offsets = [0, 0], sizes = [24, 8], strides = [1, 1]} : vector<24x32xf32> to vector<24x8xf32>
    %cst_24 = arith.constant dense<0.000000e+00> : vector<24x8xf32>
    %54 = tpu.matmul %52, %53, %cst_24 {dimension_numbers = #tpu.dot_dimension_numbers<[1], [0], [0], [1], [0, 0, 1, 1], [], []>} : vector<24x24xf32>, vector<24x8xf32>, vector<24x8xf32> -> vector<24x8xf32>
    %55 = vector.extract_strided_slice %37 {offsets = [0, 8], sizes = [24, 8], strides = [1, 1]} : vector<24x32xf32> to vector<24x8xf32>
    %56 = vector.extract_strided_slice %38 {offsets = [0, 8], sizes = [24, 8], strides = [1, 1]} : vector<24x32xf32> to vector<24x8xf32>
    %cst_25 = arith.constant dense<0.000000e+00> : vector<24x24xf32>
    %57 = tpu.matmul %55, %56, %cst_25 {dimension_numbers = #tpu.dot_dimension_numbers<[1], [1], [0], [0], [0, 0, 1, 0], [], []>} : vector<24x8xf32>, vector<24x8xf32>, vector<24x24xf32> -> vector<24x24xf32>
    %58 = arith.addf %57, %28 : vector<24x24xf32>
    %cst_26 = arith.constant dense<0xFF800000> : vector<24xf32>
    %59 = vector.multi_reduction <maximumf>, %58, %cst_26 [1] : vector<24x24xf32> to vector<24xf32>
    %60 = vector.shape_cast %59 : vector<24xf32> to vector<24x1xf32>
    %61 = vector.broadcast %60 : vector<24x1xf32> to vector<24x24xf32>
    %62 = arith.subf %58, %61 : vector<24x24xf32>
    %63 = math.exp %62 : vector<24x24xf32>
    %cst_27 = arith.constant dense<0.000000e+00> : vector<24xf32>
    %64 = vector.multi_reduction <add>, %63, %cst_27 [1] : vector<24x24xf32> to vector<24xf32>
    %65 = vector.shape_cast %64 : vector<24xf32> to vector<24x1xf32>
    %66 = vector.broadcast %65 : vector<24x1xf32> to vector<24x24xf32>
    %67 = arith.divf %63, %66 : vector<24x24xf32>
    %68 = vector.extract_strided_slice %39 {offsets = [0, 8], sizes = [24, 8], strides = [1, 1]} : vector<24x32xf32> to vector<24x8xf32>
    %cst_28 = arith.constant dense<0.000000e+00> : vector<24x8xf32>
    %69 = tpu.matmul %67, %68, %cst_28 {dimension_numbers = #tpu.dot_dimension_numbers<[1], [0], [0], [1], [0, 0, 1, 1], [], []>} : vector<24x24xf32>, vector<24x8xf32>, vector<24x8xf32> -> vector<24x8xf32>
    %70 = vector.extract_strided_slice %37 {offsets = [0, 16], sizes = [24, 8], strides = [1, 1]} : vector<24x32xf32> to vector<24x8xf32>
    %71 = vector.extract_strided_slice %38 {offsets = [0, 16], sizes = [24, 8], strides = [1, 1]} : vector<24x32xf32> to vector<24x8xf32>
    %cst_29 = arith.constant dense<0.000000e+00> : vector<24x24xf32>
    %72 = tpu.matmul %70, %71, %cst_29 {dimension_numbers = #tpu.dot_dimension_numbers<[1], [1], [0], [0], [0, 0, 1, 0], [], []>} : vector<24x8xf32>, vector<24x8xf32>, vector<24x24xf32> -> vector<24x24xf32>
    %73 = arith.addf %72, %28 : vector<24x24xf32>
    %cst_30 = arith.constant dense<0xFF800000> : vector<24xf32>
    %74 = vector.multi_reduction <maximumf>, %73, %cst_30 [1] : vector<24x24xf32> to vector<24xf32>
    %75 = vector.shape_cast %74 : vector<24xf32> to vector<24x1xf32>
    %76 = vector.broadcast %75 : vector<24x1xf32> to vector<24x24xf32>
    %77 = arith.subf %73, %76 : vector<24x24xf32>
    %78 = math.exp %77 : vector<24x24xf32>
    %cst_31 = arith.constant dense<0.000000e+00> : vector<24xf32>
    %79 = vector.multi_reduction <add>, %78, %cst_31 [1] : vector<24x24xf32> to vector<24xf32>
    %80 = vector.shape_cast %79 : vector<24xf32> to vector<24x1xf32>
    %81 = vector.broadcast %80 : vector<24x1xf32> to vector<24x24xf32>
    %82 = arith.divf %78, %81 : vector<24x24xf32>
    %83 = vector.extract_strided_slice %39 {offsets = [0, 16], sizes = [24, 8], strides = [1, 1]} : vector<24x32xf32> to vector<24x8xf32>
    %cst_32 = arith.constant dense<0.000000e+00> : vector<24x8xf32>
    %84 = tpu.matmul %82, %83, %cst_32 {dimension_numbers = #tpu.dot_dimension_numbers<[1], [0], [0], [1], [0, 0, 1, 1], [], []>} : vector<24x24xf32>, vector<24x8xf32>, vector<24x8xf32> -> vector<24x8xf32>
    %85 = vector.extract_strided_slice %37 {offsets = [0, 24], sizes = [24, 8], strides = [1, 1]} : vector<24x32xf32> to vector<24x8xf32>
    %86 = vector.extract_strided_slice %38 {offsets = [0, 24], sizes = [24, 8], strides = [1, 1]} : vector<24x32xf32> to vector<24x8xf32>
    %cst_33 = arith.constant dense<0.000000e+00> : vector<24x24xf32>
    %87 = tpu.matmul %85, %86, %cst_33 {dimension_numbers = #tpu.dot_dimension_numbers<[1], [1], [0], [0], [0, 0, 1, 0], [], []>} : vector<24x8xf32>, vector<24x8xf32>, vector<24x24xf32> -> vector<24x24xf32>
    %88 = arith.addf %87, %28 : vector<24x24xf32>
    %cst_34 = arith.constant dense<0xFF800000> : vector<24xf32>
    %89 = vector.multi_reduction <maximumf>, %88, %cst_34 [1] : vector<24x24xf32> to vector<24xf32>
    %90 = vector.shape_cast %89 : vector<24xf32> to vector<24x1xf32>
    %91 = vector.broadcast %90 : vector<24x1xf32> to vector<24x24xf32>
    %92 = arith.subf %88, %91 : vector<24x24xf32>
    %93 = math.exp %92 : vector<24x24xf32>
    %cst_35 = arith.constant dense<0.000000e+00> : vector<24xf32>
    %94 = vector.multi_reduction <add>, %93, %cst_35 [1] : vector<24x24xf32> to vector<24xf32>
    %95 = vector.shape_cast %94 : vector<24xf32> to vector<24x1xf32>
    %96 = vector.broadcast %95 : vector<24x1xf32> to vector<24x24xf32>
    %97 = arith.divf %93, %96 : vector<24x24xf32>
    %98 = vector.extract_strided_slice %39 {offsets = [0, 24], sizes = [24, 8], strides = [1, 1]} : vector<24x32xf32> to vector<24x8xf32>
    %cst_36 = arith.constant dense<0.000000e+00> : vector<24x8xf32>
    %99 = tpu.matmul %97, %98, %cst_36 {dimension_numbers = #tpu.dot_dimension_numbers<[1], [0], [0], [1], [0, 0, 1, 1], [], []>} : vector<24x24xf32>, vector<24x8xf32>, vector<24x8xf32> -> vector<24x8xf32>
    %100 = tpu.concatenate %54, %69, %84, %99 in 1 : vector<24x8xf32>, vector<24x8xf32>, vector<24x8xf32>, vector<24x8xf32> -> vector<24x32xf32>
    %c0_37 = arith.constant 0 : index
    %c0_38 = arith.constant 0 : index
    %c0_39 = arith.constant 0 : index
    %101 = vector.load %arg8[%c0_37, %c0_38, %c0_39] : memref<2x32x32xf32, #tpu.memory_space<vmem>>, vector<1x32x32xf32>
    %102 = vector.shape_cast %101 : vector<1x32x32xf32> to vector<32x32xf32>
    %cst_40 = arith.constant dense<0.000000e+00> : vector<24x32xf32>
    %103 = tpu.matmul %100, %102, %cst_40 {dimension_numbers = #tpu.dot_dimension_numbers<[1], [0], [0], [1], [0, 0, 1, 1], [], []>} : vector<24x32xf32>, vector<32x32xf32>, vector<24x32xf32> -> vector<24x32xf32>
    %c0_41 = arith.constant 0 : index
    %c0_42 = arith.constant 0 : index
    %c0_43 = arith.constant 0 : index
    %104 = vector.load %arg9[%c0_41, %c0_42, %c0_43] : memref<2x1x32xf32, #tpu.memory_space<vmem>>, vector<1x1x32xf32>
    %105 = vector.shape_cast %104 : vector<1x1x32xf32> to vector<1x32xf32>
    %106 = vector.broadcast %105 : vector<1x32xf32> to vector<24x32xf32>
    %107 = arith.addf %103, %106 : vector<24x32xf32>
    %108 = arith.addf %27, %107 : vector<24x32xf32>
    %c0_44 = arith.constant 0 : index
    %c0_45 = arith.constant 0 : index
    %c0_46 = arith.constant 0 : index
    %109 = vector.load %arg10[%c0_44, %c0_45, %c0_46] : memref<2x1x32xf32, #tpu.memory_space<vmem>>, vector<1x1x32xf32>
    %110 = vector.shape_cast %109 : vector<1x1x32xf32> to vector<1x32xf32>
    %c0_47 = arith.constant 0 : index
    %c0_48 = arith.constant 0 : index
    %c0_49 = arith.constant 0 : index
    %111 = vector.load %arg11[%c0_47, %c0_48, %c0_49] : memref<2x1x32xf32, #tpu.memory_space<vmem>>, vector<1x1x32xf32>
    %112 = vector.shape_cast %111 : vector<1x1x32xf32> to vector<1x32xf32>
    %cst_50 = arith.constant dense<0.000000e+00> : vector<24xf32>
    %113 = vector.multi_reduction <add>, %108, %cst_50 [1] : vector<24x32xf32> to vector<24xf32>
    %114 = vector.shape_cast %113 : vector<24xf32> to vector<24x1xf32>
    %cst_51 = arith.constant 3.200000e+01 : f32
    %115 = vector.broadcast %cst_51 : f32 to vector<24x1xf32>
    %116 = arith.divf %114, %115 : vector<24x1xf32>
    %117 = vector.broadcast %116 : vector<24x1xf32> to vector<24x32xf32>
    %118 = arith.subf %108, %117 : vector<24x32xf32>
    %119 = arith.mulf %118, %118 : vector<24x32xf32>
    %cst_52 = arith.constant dense<0.000000e+00> : vector<24xf32>
    %120 = vector.multi_reduction <add>, %119, %cst_52 [1] : vector<24x32xf32> to vector<24xf32>
    %121 = vector.shape_cast %120 : vector<24xf32> to vector<24x1xf32>
    %cst_53 = arith.constant 3.200000e+01 : f32
    %122 = vector.broadcast %cst_53 : f32 to vector<24x1xf32>
    %123 = arith.divf %121, %122 : vector<24x1xf32>
    %124 = vector.broadcast %116 : vector<24x1xf32> to vector<24x32xf32>
    %125 = arith.subf %108, %124 : vector<24x32xf32>
    %cst_54 = arith.constant 9.99999974E-6 : f32
    %126 = vector.broadcast %cst_54 : f32 to vector<24x1xf32>
    %127 = arith.addf %123, %126 : vector<24x1xf32>
    %128 = math.rsqrt %127 : vector<24x1xf32>
    %129 = vector.broadcast %128 : vector<24x1xf32> to vector<24x32xf32>
    %130 = arith.mulf %125, %129 : vector<24x32xf32>
    %131 = vector.broadcast %110 : vector<1x32xf32> to vector<24x32xf32>
    %132 = arith.mulf %130, %131 : vector<24x32xf32>
    %133 = vector.broadcast %112 : vector<1x32xf32> to vector<24x32xf32>
    %134 = arith.addf %132, %133 : vector<24x32xf32>
    %c0_55 = arith.constant 0 : index
    %c0_56 = arith.constant 0 : index
    %c0_57 = arith.constant 0 : index
    %135 = vector.load %arg14[%c0_55, %c0_56, %c0_57] : memref<2x32x64xf32, #tpu.memory_space<vmem>>, vector<1x32x64xf32>
    %136 = vector.shape_cast %135 : vector<1x32x64xf32> to vector<32x64xf32>
    %cst_58 = arith.constant dense<0.000000e+00> : vector<24x64xf32>
    %137 = tpu.matmul %134, %136, %cst_58 {dimension_numbers = #tpu.dot_dimension_numbers<[1], [0], [0], [1], [0, 0, 1, 1], [], []>} : vector<24x32xf32>, vector<32x64xf32>, vector<24x64xf32> -> vector<24x64xf32>
    %c0_59 = arith.constant 0 : index
    %c0_60 = arith.constant 0 : index
    %c0_61 = arith.constant 0 : index
    %138 = vector.load %arg15[%c0_59, %c0_60, %c0_61] : memref<2x1x64xf32, #tpu.memory_space<vmem>>, vector<1x1x64xf32>
    %139 = vector.shape_cast %138 : vector<1x1x64xf32> to vector<1x64xf32>
    %140 = vector.broadcast %139 : vector<1x64xf32> to vector<24x64xf32>
    %141 = arith.addf %137, %140 : vector<24x64xf32>
    %cst_62 = arith.constant 0.000000e+00 : f32
    %142 = vector.broadcast %cst_62 : f32 to vector<24x64xf32>
    %143 = arith.maximumf %141, %142 : vector<24x64xf32>
    %c0_63 = arith.constant 0 : index
    %c0_64 = arith.constant 0 : index
    %c0_65 = arith.constant 0 : index
    %144 = vector.load %arg16[%c0_63, %c0_64, %c0_65] : memref<2x64x32xf32, #tpu.memory_space<vmem>>, vector<1x64x32xf32>
    %145 = vector.shape_cast %144 : vector<1x64x32xf32> to vector<64x32xf32>
    %cst_66 = arith.constant dense<0.000000e+00> : vector<24x32xf32>
    %146 = tpu.matmul %143, %145, %cst_66 {dimension_numbers = #tpu.dot_dimension_numbers<[1], [0], [0], [1], [0, 0, 1, 1], [], []>} : vector<24x64xf32>, vector<64x32xf32>, vector<24x32xf32> -> vector<24x32xf32>
    %c0_67 = arith.constant 0 : index
    %c0_68 = arith.constant 0 : index
    %c0_69 = arith.constant 0 : index
    %147 = vector.load %arg17[%c0_67, %c0_68, %c0_69] : memref<2x1x32xf32, #tpu.memory_space<vmem>>, vector<1x1x32xf32>
    %148 = vector.shape_cast %147 : vector<1x1x32xf32> to vector<1x32xf32>
    %149 = vector.broadcast %148 : vector<1x32xf32> to vector<24x32xf32>
    %150 = arith.addf %146, %149 : vector<24x32xf32>
    %151 = arith.addf %134, %150 : vector<24x32xf32>
    %c0_70 = arith.constant 0 : index
    %c0_71 = arith.constant 0 : index
    %c0_72 = arith.constant 0 : index
    %152 = vector.load %arg12[%c0_70, %c0_71, %c0_72] : memref<2x1x32xf32, #tpu.memory_space<vmem>>, vector<1x1x32xf32>
    %153 = vector.shape_cast %152 : vector<1x1x32xf32> to vector<1x32xf32>
    %c0_73 = arith.constant 0 : index
    %c0_74 = arith.constant 0 : index
    %c0_75 = arith.constant 0 : index
    %154 = vector.load %arg13[%c0_73, %c0_74, %c0_75] : memref<2x1x32xf32, #tpu.memory_space<vmem>>, vector<1x1x32xf32>
    %155 = vector.shape_cast %154 : vector<1x1x32xf32> to vector<1x32xf32>
    %cst_76 = arith.constant dense<0.000000e+00> : vector<24xf32>
    %156 = vector.multi_reduction <add>, %151, %cst_76 [1] : vector<24x32xf32> to vector<24xf32>
    %157 = vector.shape_cast %156 : vector<24xf32> to vector<24x1xf32>
    %cst_77 = arith.constant 3.200000e+01 : f32
    %158 = vector.broadcast %cst_77 : f32 to vector<24x1xf32>
    %159 = arith.divf %157, %158 : vector<24x1xf32>
    %160 = vector.broadcast %159 : vector<24x1xf32> to vector<24x32xf32>
    %161 = arith.subf %151, %160 : vector<24x32xf32>
    %162 = arith.mulf %161, %161 : vector<24x32xf32>
    %cst_78 = arith.constant dense<0.000000e+00> : vector<24xf32>
    %163 = vector.multi_reduction <add>, %162, %cst_78 [1] : vector<24x32xf32> to vector<24xf32>
    %164 = vector.shape_cast %163 : vector<24xf32> to vector<24x1xf32>
    %cst_79 = arith.constant 3.200000e+01 : f32
    %165 = vector.broadcast %cst_79 : f32 to vector<24x1xf32>
    %166 = arith.divf %164, %165 : vector<24x1xf32>
    %167 = vector.broadcast %159 : vector<24x1xf32> to vector<24x32xf32>
    %168 = arith.subf %151, %167 : vector<24x32xf32>
    %cst_80 = arith.constant 9.99999974E-6 : f32
    %169 = vector.broadcast %cst_80 : f32 to vector<24x1xf32>
    %170 = arith.addf %166, %169 : vector<24x1xf32>
    %171 = math.rsqrt %170 : vector<24x1xf32>
    %172 = vector.broadcast %171 : vector<24x1xf32> to vector<24x32xf32>
    %173 = arith.mulf %168, %172 : vector<24x32xf32>
    %174 = vector.broadcast %153 : vector<1x32xf32> to vector<24x32xf32>
    %175 = arith.mulf %173, %174 : vector<24x32xf32>
    %176 = vector.broadcast %155 : vector<1x32xf32> to vector<24x32xf32>
    %177 = arith.addf %175, %176 : vector<24x32xf32>
    %c0_81 = arith.constant 0 : index
    %c0_82 = arith.constant 0 : index
    %c0_83 = arith.constant 0 : index
    %178 = vector.load %arg18[%c0_81, %c0_82, %c0_83] : memref<2x24x1xf32, #tpu.memory_space<vmem>>, vector<1x24x1xf32>
    %179 = vector.shape_cast %178 : vector<1x24x1xf32> to vector<24x1xf32>
    %180 = vector.broadcast %179 : vector<24x1xf32> to vector<24x32xf32>
    %181 = arith.mulf %177, %180 : vector<24x32xf32>
    %c0_84 = arith.constant 0 : index
    %c0_85 = arith.constant 0 : index
    %c0_86 = arith.constant 0 : index
    %182 = vector.load %arg19[%c0_84, %c0_85, %c0_86] : memref<2x24x1xf32, #tpu.memory_space<vmem>>, vector<1x24x1xf32>
    %183 = vector.shape_cast %182 : vector<1x24x1xf32> to vector<24x1xf32>
    %184 = vector.broadcast %183 : vector<24x1xf32> to vector<24x32xf32>
    %185 = arith.addf %181, %184 : vector<24x32xf32>
    %186 = arith.addf %185, %27 : vector<24x32xf32>
    %c1 = arith.constant 1 : index
    %c0_87 = arith.constant 0 : index
    %c0_88 = arith.constant 0 : index
    %187 = vector.load %arg6[%c1, %c0_87, %c0_88] : memref<2x32x96xf32, #tpu.memory_space<vmem>>, vector<1x32x96xf32>
    %188 = vector.shape_cast %187 : vector<1x32x96xf32> to vector<32x96xf32>
    %cst_89 = arith.constant dense<0.000000e+00> : vector<24x96xf32>
    %189 = tpu.matmul %186, %188, %cst_89 {dimension_numbers = #tpu.dot_dimension_numbers<[1], [0], [0], [1], [0, 0, 1, 1], [], []>} : vector<24x32xf32>, vector<32x96xf32>, vector<24x96xf32> -> vector<24x96xf32>
    %c1_90 = arith.constant 1 : index
    %c0_91 = arith.constant 0 : index
    %c0_92 = arith.constant 0 : index
    %190 = vector.load %arg7[%c1_90, %c0_91, %c0_92] : memref<2x1x96xf32, #tpu.memory_space<vmem>>, vector<1x1x96xf32>
    %191 = vector.shape_cast %190 : vector<1x1x96xf32> to vector<1x96xf32>
    %192 = vector.broadcast %191 : vector<1x96xf32> to vector<24x96xf32>
    %193 = arith.addf %189, %192 : vector<24x96xf32>
    %194 = vector.extract_strided_slice %193 {offsets = [0, 0], sizes = [24, 32], strides = [1, 1]} : vector<24x96xf32> to vector<24x32xf32>
    %195 = vector.extract_strided_slice %193 {offsets = [0, 32], sizes = [24, 32], strides = [1, 1]} : vector<24x96xf32> to vector<24x32xf32>
    %196 = vector.extract_strided_slice %193 {offsets = [0, 64], sizes = [24, 32], strides = [1, 1]} : vector<24x96xf32> to vector<24x32xf32>
    %197 = vector.extract_strided_slice %194 {offsets = [0, 0], sizes = [24, 8], strides = [1, 1]} : vector<24x32xf32> to vector<24x8xf32>
    %198 = vector.extract_strided_slice %195 {offsets = [0, 0], sizes = [24, 8], strides = [1, 1]} : vector<24x32xf32> to vector<24x8xf32>
    %cst_93 = arith.constant dense<0.000000e+00> : vector<24x24xf32>
    %199 = tpu.matmul %197, %198, %cst_93 {dimension_numbers = #tpu.dot_dimension_numbers<[1], [1], [0], [0], [0, 0, 1, 0], [], []>} : vector<24x8xf32>, vector<24x8xf32>, vector<24x24xf32> -> vector<24x24xf32>
    %200 = arith.addf %199, %28 : vector<24x24xf32>
    %cst_94 = arith.constant dense<0xFF800000> : vector<24xf32>
    %201 = vector.multi_reduction <maximumf>, %200, %cst_94 [1] : vector<24x24xf32> to vector<24xf32>
    %202 = vector.shape_cast %201 : vector<24xf32> to vector<24x1xf32>
    %203 = vector.broadcast %202 : vector<24x1xf32> to vector<24x24xf32>
    %204 = arith.subf %200, %203 : vector<24x24xf32>
    %205 = math.exp %204 : vector<24x24xf32>
    %cst_95 = arith.constant dense<0.000000e+00> : vector<24xf32>
    %206 = vector.multi_reduction <add>, %205, %cst_95 [1] : vector<24x24xf32> to vector<24xf32>
    %207 = vector.shape_cast %206 : vector<24xf32> to vector<24x1xf32>
    %208 = vector.broadcast %207 : vector<24x1xf32> to vector<24x24xf32>
    %209 = arith.divf %205, %208 : vector<24x24xf32>
    %210 = vector.extract_strided_slice %196 {offsets = [0, 0], sizes = [24, 8], strides = [1, 1]} : vector<24x32xf32> to vector<24x8xf32>
    %cst_96 = arith.constant dense<0.000000e+00> : vector<24x8xf32>
    %211 = tpu.matmul %209, %210, %cst_96 {dimension_numbers = #tpu.dot_dimension_numbers<[1], [0], [0], [1], [0, 0, 1, 1], [], []>} : vector<24x24xf32>, vector<24x8xf32>, vector<24x8xf32> -> vector<24x8xf32>
    %212 = vector.extract_strided_slice %194 {offsets = [0, 8], sizes = [24, 8], strides = [1, 1]} : vector<24x32xf32> to vector<24x8xf32>
    %213 = vector.extract_strided_slice %195 {offsets = [0, 8], sizes = [24, 8], strides = [1, 1]} : vector<24x32xf32> to vector<24x8xf32>
    %cst_97 = arith.constant dense<0.000000e+00> : vector<24x24xf32>
    %214 = tpu.matmul %212, %213, %cst_97 {dimension_numbers = #tpu.dot_dimension_numbers<[1], [1], [0], [0], [0, 0, 1, 0], [], []>} : vector<24x8xf32>, vector<24x8xf32>, vector<24x24xf32> -> vector<24x24xf32>
    %215 = arith.addf %214, %28 : vector<24x24xf32>
    %cst_98 = arith.constant dense<0xFF800000> : vector<24xf32>
    %216 = vector.multi_reduction <maximumf>, %215, %cst_98 [1] : vector<24x24xf32> to vector<24xf32>
    %217 = vector.shape_cast %216 : vector<24xf32> to vector<24x1xf32>
    %218 = vector.broadcast %217 : vector<24x1xf32> to vector<24x24xf32>
    %219 = arith.subf %215, %218 : vector<24x24xf32>
    %220 = math.exp %219 : vector<24x24xf32>
    %cst_99 = arith.constant dense<0.000000e+00> : vector<24xf32>
    %221 = vector.multi_reduction <add>, %220, %cst_99 [1] : vector<24x24xf32> to vector<24xf32>
    %222 = vector.shape_cast %221 : vector<24xf32> to vector<24x1xf32>
    %223 = vector.broadcast %222 : vector<24x1xf32> to vector<24x24xf32>
    %224 = arith.divf %220, %223 : vector<24x24xf32>
    %225 = vector.extract_strided_slice %196 {offsets = [0, 8], sizes = [24, 8], strides = [1, 1]} : vector<24x32xf32> to vector<24x8xf32>
    %cst_100 = arith.constant dense<0.000000e+00> : vector<24x8xf32>
    %226 = tpu.matmul %224, %225, %cst_100 {dimension_numbers = #tpu.dot_dimension_numbers<[1], [0], [0], [1], [0, 0, 1, 1], [], []>} : vector<24x24xf32>, vector<24x8xf32>, vector<24x8xf32> -> vector<24x8xf32>
    %227 = vector.extract_strided_slice %194 {offsets = [0, 16], sizes = [24, 8], strides = [1, 1]} : vector<24x32xf32> to vector<24x8xf32>
    %228 = vector.extract_strided_slice %195 {offsets = [0, 16], sizes = [24, 8], strides = [1, 1]} : vector<24x32xf32> to vector<24x8xf32>
    %cst_101 = arith.constant dense<0.000000e+00> : vector<24x24xf32>
    %229 = tpu.matmul %227, %228, %cst_101 {dimension_numbers = #tpu.dot_dimension_numbers<[1], [1], [0], [0], [0, 0, 1, 0], [], []>} : vector<24x8xf32>, vector<24x8xf32>, vector<24x24xf32> -> vector<24x24xf32>
    %230 = arith.addf %229, %28 : vector<24x24xf32>
    %cst_102 = arith.constant dense<0xFF800000> : vector<24xf32>
    %231 = vector.multi_reduction <maximumf>, %230, %cst_102 [1] : vector<24x24xf32> to vector<24xf32>
    %232 = vector.shape_cast %231 : vector<24xf32> to vector<24x1xf32>
    %233 = vector.broadcast %232 : vector<24x1xf32> to vector<24x24xf32>
    %234 = arith.subf %230, %233 : vector<24x24xf32>
    %235 = math.exp %234 : vector<24x24xf32>
    %cst_103 = arith.constant dense<0.000000e+00> : vector<24xf32>
    %236 = vector.multi_reduction <add>, %235, %cst_103 [1] : vector<24x24xf32> to vector<24xf32>
    %237 = vector.shape_cast %236 : vector<24xf32> to vector<24x1xf32>
    %238 = vector.broadcast %237 : vector<24x1xf32> to vector<24x24xf32>
    %239 = arith.divf %235, %238 : vector<24x24xf32>
    %240 = vector.extract_strided_slice %196 {offsets = [0, 16], sizes = [24, 8], strides = [1, 1]} : vector<24x32xf32> to vector<24x8xf32>
    %cst_104 = arith.constant dense<0.000000e+00> : vector<24x8xf32>
    %241 = tpu.matmul %239, %240, %cst_104 {dimension_numbers = #tpu.dot_dimension_numbers<[1], [0], [0], [1], [0, 0, 1, 1], [], []>} : vector<24x24xf32>, vector<24x8xf32>, vector<24x8xf32> -> vector<24x8xf32>
    %242 = vector.extract_strided_slice %194 {offsets = [0, 24], sizes = [24, 8], strides = [1, 1]} : vector<24x32xf32> to vector<24x8xf32>
    %243 = vector.extract_strided_slice %195 {offsets = [0, 24], sizes = [24, 8], strides = [1, 1]} : vector<24x32xf32> to vector<24x8xf32>
    %cst_105 = arith.constant dense<0.000000e+00> : vector<24x24xf32>
    %244 = tpu.matmul %242, %243, %cst_105 {dimension_numbers = #tpu.dot_dimension_numbers<[1], [1], [0], [0], [0, 0, 1, 0], [], []>} : vector<24x8xf32>, vector<24x8xf32>, vector<24x24xf32> -> vector<24x24xf32>
    %245 = arith.addf %244, %28 : vector<24x24xf32>
    %cst_106 = arith.constant dense<0xFF800000> : vector<24xf32>
    %246 = vector.multi_reduction <maximumf>, %245, %cst_106 [1] : vector<24x24xf32> to vector<24xf32>
    %247 = vector.shape_cast %246 : vector<24xf32> to vector<24x1xf32>
    %248 = vector.broadcast %247 : vector<24x1xf32> to vector<24x24xf32>
    %249 = arith.subf %245, %248 : vector<24x24xf32>
    %250 = math.exp %249 : vector<24x24xf32>
    %cst_107 = arith.constant dense<0.000000e+00> : vector<24xf32>
    %251 = vector.multi_reduction <add>, %250, %cst_107 [1] : vector<24x24xf32> to vector<24xf32>
    %252 = vector.shape_cast %251 : vector<24xf32> to vector<24x1xf32>
    %253 = vector.broadcast %252 : vector<24x1xf32> to vector<24x24xf32>
    %254 = arith.divf %250, %253 : vector<24x24xf32>
    %255 = vector.extract_strided_slice %196 {offsets = [0, 24], sizes = [24, 8], strides = [1, 1]} : vector<24x32xf32> to vector<24x8xf32>
    %cst_108 = arith.constant dense<0.000000e+00> : vector<24x8xf32>
    %256 = tpu.matmul %254, %255, %cst_108 {dimension_numbers = #tpu.dot_dimension_numbers<[1], [0], [0], [1], [0, 0, 1, 1], [], []>} : vector<24x24xf32>, vector<24x8xf32>, vector<24x8xf32> -> vector<24x8xf32>
    %257 = tpu.concatenate %211, %226, %241, %256 in 1 : vector<24x8xf32>, vector<24x8xf32>, vector<24x8xf32>, vector<24x8xf32> -> vector<24x32xf32>
    %c1_109 = arith.constant 1 : index
    %c0_110 = arith.constant 0 : index
    %c0_111 = arith.constant 0 : index
    %258 = vector.load %arg8[%c1_109, %c0_110, %c0_111] : memref<2x32x32xf32, #tpu.memory_space<vmem>>, vector<1x32x32xf32>
    %259 = vector.shape_cast %258 : vector<1x32x32xf32> to vector<32x32xf32>
    %cst_112 = arith.constant dense<0.000000e+00> : vector<24x32xf32>
    %260 = tpu.matmul %257, %259, %cst_112 {dimension_numbers = #tpu.dot_dimension_numbers<[1], [0], [0], [1], [0, 0, 1, 1], [], []>} : vector<24x32xf32>, vector<32x32xf32>, vector<24x32xf32> -> vector<24x32xf32>
    %c1_113 = arith.constant 1 : index
    %c0_114 = arith.constant 0 : index
    %c0_115 = arith.constant 0 : index
    %261 = vector.load %arg9[%c1_113, %c0_114, %c0_115] : memref<2x1x32xf32, #tpu.memory_space<vmem>>, vector<1x1x32xf32>
    %262 = vector.shape_cast %261 : vector<1x1x32xf32> to vector<1x32xf32>
    %263 = vector.broadcast %262 : vector<1x32xf32> to vector<24x32xf32>
    %264 = arith.addf %260, %263 : vector<24x32xf32>
    %265 = arith.addf %186, %264 : vector<24x32xf32>
    %c1_116 = arith.constant 1 : index
    %c0_117 = arith.constant 0 : index
    %c0_118 = arith.constant 0 : index
    %266 = vector.load %arg10[%c1_116, %c0_117, %c0_118] : memref<2x1x32xf32, #tpu.memory_space<vmem>>, vector<1x1x32xf32>
    %267 = vector.shape_cast %266 : vector<1x1x32xf32> to vector<1x32xf32>
    %c1_119 = arith.constant 1 : index
    %c0_120 = arith.constant 0 : index
    %c0_121 = arith.constant 0 : index
    %268 = vector.load %arg11[%c1_119, %c0_120, %c0_121] : memref<2x1x32xf32, #tpu.memory_space<vmem>>, vector<1x1x32xf32>
    %269 = vector.shape_cast %268 : vector<1x1x32xf32> to vector<1x32xf32>
    %cst_122 = arith.constant dense<0.000000e+00> : vector<24xf32>
    %270 = vector.multi_reduction <add>, %265, %cst_122 [1] : vector<24x32xf32> to vector<24xf32>
    %271 = vector.shape_cast %270 : vector<24xf32> to vector<24x1xf32>
    %cst_123 = arith.constant 3.200000e+01 : f32
    %272 = vector.broadcast %cst_123 : f32 to vector<24x1xf32>
    %273 = arith.divf %271, %272 : vector<24x1xf32>
    %274 = vector.broadcast %273 : vector<24x1xf32> to vector<24x32xf32>
    %275 = arith.subf %265, %274 : vector<24x32xf32>
    %276 = arith.mulf %275, %275 : vector<24x32xf32>
    %cst_124 = arith.constant dense<0.000000e+00> : vector<24xf32>
    %277 = vector.multi_reduction <add>, %276, %cst_124 [1] : vector<24x32xf32> to vector<24xf32>
    %278 = vector.shape_cast %277 : vector<24xf32> to vector<24x1xf32>
    %cst_125 = arith.constant 3.200000e+01 : f32
    %279 = vector.broadcast %cst_125 : f32 to vector<24x1xf32>
    %280 = arith.divf %278, %279 : vector<24x1xf32>
    %281 = vector.broadcast %273 : vector<24x1xf32> to vector<24x32xf32>
    %282 = arith.subf %265, %281 : vector<24x32xf32>
    %cst_126 = arith.constant 9.99999974E-6 : f32
    %283 = vector.broadcast %cst_126 : f32 to vector<24x1xf32>
    %284 = arith.addf %280, %283 : vector<24x1xf32>
    %285 = math.rsqrt %284 : vector<24x1xf32>
    %286 = vector.broadcast %285 : vector<24x1xf32> to vector<24x32xf32>
    %287 = arith.mulf %282, %286 : vector<24x32xf32>
    %288 = vector.broadcast %267 : vector<1x32xf32> to vector<24x32xf32>
    %289 = arith.mulf %287, %288 : vector<24x32xf32>
    %290 = vector.broadcast %269 : vector<1x32xf32> to vector<24x32xf32>
    %291 = arith.addf %289, %290 : vector<24x32xf32>
    %c1_127 = arith.constant 1 : index
    %c0_128 = arith.constant 0 : index
    %c0_129 = arith.constant 0 : index
    %292 = vector.load %arg14[%c1_127, %c0_128, %c0_129] : memref<2x32x64xf32, #tpu.memory_space<vmem>>, vector<1x32x64xf32>
    %293 = vector.shape_cast %292 : vector<1x32x64xf32> to vector<32x64xf32>
    %cst_130 = arith.constant dense<0.000000e+00> : vector<24x64xf32>
    %294 = tpu.matmul %291, %293, %cst_130 {dimension_numbers = #tpu.dot_dimension_numbers<[1], [0], [0], [1], [0, 0, 1, 1], [], []>} : vector<24x32xf32>, vector<32x64xf32>, vector<24x64xf32> -> vector<24x64xf32>
    %c1_131 = arith.constant 1 : index
    %c0_132 = arith.constant 0 : index
    %c0_133 = arith.constant 0 : index
    %295 = vector.load %arg15[%c1_131, %c0_132, %c0_133] : memref<2x1x64xf32, #tpu.memory_space<vmem>>, vector<1x1x64xf32>
    %296 = vector.shape_cast %295 : vector<1x1x64xf32> to vector<1x64xf32>
    %297 = vector.broadcast %296 : vector<1x64xf32> to vector<24x64xf32>
    %298 = arith.addf %294, %297 : vector<24x64xf32>
    %cst_134 = arith.constant 0.000000e+00 : f32
    %299 = vector.broadcast %cst_134 : f32 to vector<24x64xf32>
    %300 = arith.maximumf %298, %299 : vector<24x64xf32>
    %c1_135 = arith.constant 1 : index
    %c0_136 = arith.constant 0 : index
    %c0_137 = arith.constant 0 : index
    %301 = vector.load %arg16[%c1_135, %c0_136, %c0_137] : memref<2x64x32xf32, #tpu.memory_space<vmem>>, vector<1x64x32xf32>
    %302 = vector.shape_cast %301 : vector<1x64x32xf32> to vector<64x32xf32>
    %cst_138 = arith.constant dense<0.000000e+00> : vector<24x32xf32>
    %303 = tpu.matmul %300, %302, %cst_138 {dimension_numbers = #tpu.dot_dimension_numbers<[1], [0], [0], [1], [0, 0, 1, 1], [], []>} : vector<24x64xf32>, vector<64x32xf32>, vector<24x32xf32> -> vector<24x32xf32>
    %c1_139 = arith.constant 1 : index
    %c0_140 = arith.constant 0 : index
    %c0_141 = arith.constant 0 : index
    %304 = vector.load %arg17[%c1_139, %c0_140, %c0_141] : memref<2x1x32xf32, #tpu.memory_space<vmem>>, vector<1x1x32xf32>
    %305 = vector.shape_cast %304 : vector<1x1x32xf32> to vector<1x32xf32>
    %306 = vector.broadcast %305 : vector<1x32xf32> to vector<24x32xf32>
    %307 = arith.addf %303, %306 : vector<24x32xf32>
    %308 = arith.addf %291, %307 : vector<24x32xf32>
    %c1_142 = arith.constant 1 : index
    %c0_143 = arith.constant 0 : index
    %c0_144 = arith.constant 0 : index
    %309 = vector.load %arg12[%c1_142, %c0_143, %c0_144] : memref<2x1x32xf32, #tpu.memory_space<vmem>>, vector<1x1x32xf32>
    %310 = vector.shape_cast %309 : vector<1x1x32xf32> to vector<1x32xf32>
    %c1_145 = arith.constant 1 : index
    %c0_146 = arith.constant 0 : index
    %c0_147 = arith.constant 0 : index
    %311 = vector.load %arg13[%c1_145, %c0_146, %c0_147] : memref<2x1x32xf32, #tpu.memory_space<vmem>>, vector<1x1x32xf32>
    %312 = vector.shape_cast %311 : vector<1x1x32xf32> to vector<1x32xf32>
    %cst_148 = arith.constant dense<0.000000e+00> : vector<24xf32>
    %313 = vector.multi_reduction <add>, %308, %cst_148 [1] : vector<24x32xf32> to vector<24xf32>
    %314 = vector.shape_cast %313 : vector<24xf32> to vector<24x1xf32>
    %cst_149 = arith.constant 3.200000e+01 : f32
    %315 = vector.broadcast %cst_149 : f32 to vector<24x1xf32>
    %316 = arith.divf %314, %315 : vector<24x1xf32>
    %317 = vector.broadcast %316 : vector<24x1xf32> to vector<24x32xf32>
    %318 = arith.subf %308, %317 : vector<24x32xf32>
    %319 = arith.mulf %318, %318 : vector<24x32xf32>
    %cst_150 = arith.constant dense<0.000000e+00> : vector<24xf32>
    %320 = vector.multi_reduction <add>, %319, %cst_150 [1] : vector<24x32xf32> to vector<24xf32>
    %321 = vector.shape_cast %320 : vector<24xf32> to vector<24x1xf32>
    %cst_151 = arith.constant 3.200000e+01 : f32
    %322 = vector.broadcast %cst_151 : f32 to vector<24x1xf32>
    %323 = arith.divf %321, %322 : vector<24x1xf32>
    %324 = vector.broadcast %316 : vector<24x1xf32> to vector<24x32xf32>
    %325 = arith.subf %308, %324 : vector<24x32xf32>
    %cst_152 = arith.constant 9.99999974E-6 : f32
    %326 = vector.broadcast %cst_152 : f32 to vector<24x1xf32>
    %327 = arith.addf %323, %326 : vector<24x1xf32>
    %328 = math.rsqrt %327 : vector<24x1xf32>
    %329 = vector.broadcast %328 : vector<24x1xf32> to vector<24x32xf32>
    %330 = arith.mulf %325, %329 : vector<24x32xf32>
    %331 = vector.broadcast %310 : vector<1x32xf32> to vector<24x32xf32>
    %332 = arith.mulf %330, %331 : vector<24x32xf32>
    %333 = vector.broadcast %312 : vector<1x32xf32> to vector<24x32xf32>
    %334 = arith.addf %332, %333 : vector<24x32xf32>
    %c1_153 = arith.constant 1 : index
    %c0_154 = arith.constant 0 : index
    %c0_155 = arith.constant 0 : index
    %335 = vector.load %arg18[%c1_153, %c0_154, %c0_155] : memref<2x24x1xf32, #tpu.memory_space<vmem>>, vector<1x24x1xf32>
    %336 = vector.shape_cast %335 : vector<1x24x1xf32> to vector<24x1xf32>
    %337 = vector.broadcast %336 : vector<24x1xf32> to vector<24x32xf32>
    %338 = arith.mulf %334, %337 : vector<24x32xf32>
    %c1_156 = arith.constant 1 : index
    %c0_157 = arith.constant 0 : index
    %c0_158 = arith.constant 0 : index
    %339 = vector.load %arg19[%c1_156, %c0_157, %c0_158] : memref<2x24x1xf32, #tpu.memory_space<vmem>>, vector<1x24x1xf32>
    %340 = vector.shape_cast %339 : vector<1x24x1xf32> to vector<24x1xf32>
    %341 = vector.broadcast %340 : vector<24x1xf32> to vector<24x32xf32>
    %342 = arith.addf %338, %341 : vector<24x32xf32>
    %343 = arith.addf %342, %186 : vector<24x32xf32>
    %c0_159 = arith.constant 0 : index
    %c0_160 = arith.constant 0 : index
    %344 = vector.load %arg20[%c0_159, %c0_160] : memref<32x96xf32, #tpu.memory_space<vmem>>, vector<32x96xf32>
    %cst_161 = arith.constant dense<0.000000e+00> : vector<24x96xf32>
    %345 = tpu.matmul %343, %344, %cst_161 {dimension_numbers = #tpu.dot_dimension_numbers<[1], [0], [0], [1], [0, 0, 1, 1], [], []>} : vector<24x32xf32>, vector<32x96xf32>, vector<24x96xf32> -> vector<24x96xf32>
    %c0_162 = arith.constant 0 : index
    %c0_163 = arith.constant 0 : index
    %346 = vector.load %arg21[%c0_162, %c0_163] : memref<1x96xf32, #tpu.memory_space<vmem>>, vector<1x96xf32>
    %347 = vector.broadcast %346 : vector<1x96xf32> to vector<24x96xf32>
    %348 = arith.addf %345, %347 : vector<24x96xf32>
    %349 = vector.extract_strided_slice %348 {offsets = [0, 0], sizes = [24, 32], strides = [1, 1]} : vector<24x96xf32> to vector<24x32xf32>
    %350 = vector.extract_strided_slice %348 {offsets = [0, 32], sizes = [24, 32], strides = [1, 1]} : vector<24x96xf32> to vector<24x32xf32>
    %351 = vector.extract_strided_slice %348 {offsets = [0, 64], sizes = [24, 32], strides = [1, 1]} : vector<24x96xf32> to vector<24x32xf32>
    %cst_164 = arith.constant dense<0.000000e+00> : vector<24x24xf32>
    %352 = tpu.matmul %349, %350, %cst_164 {dimension_numbers = #tpu.dot_dimension_numbers<[1], [1], [0], [0], [0, 0, 1, 0], [], []>} : vector<24x32xf32>, vector<24x32xf32>, vector<24x24xf32> -> vector<24x24xf32>
    %353 = arith.addf %352, %29 : vector<24x24xf32>
    %cst_165 = arith.constant dense<0xFF800000> : vector<24xf32>
    %354 = vector.multi_reduction <maximumf>, %353, %cst_165 [1] : vector<24x24xf32> to vector<24xf32>
    %355 = vector.shape_cast %354 : vector<24xf32> to vector<24x1xf32>
    %356 = vector.broadcast %355 : vector<24x1xf32> to vector<24x24xf32>
    %357 = arith.subf %353, %356 : vector<24x24xf32>
    %358 = math.exp %357 : vector<24x24xf32>
    %cst_166 = arith.constant dense<0.000000e+00> : vector<24xf32>
    %359 = vector.multi_reduction <add>, %358, %cst_166 [1] : vector<24x24xf32> to vector<24xf32>
    %360 = vector.shape_cast %359 : vector<24xf32> to vector<24x1xf32>
    %361 = vector.broadcast %360 : vector<24x1xf32> to vector<24x24xf32>
    %362 = arith.divf %358, %361 : vector<24x24xf32>
    %cst_167 = arith.constant dense<0.000000e+00> : vector<24x32xf32>
    %363 = tpu.matmul %362, %351, %cst_167 {dimension_numbers = #tpu.dot_dimension_numbers<[1], [0], [0], [1], [0, 0, 1, 1], [], []>} : vector<24x24xf32>, vector<24x32xf32>, vector<24x32xf32> -> vector<24x32xf32>
    %c0_168 = arith.constant 0 : index
    %c0_169 = arith.constant 0 : index
    %364 = vector.load %arg22[%c0_168, %c0_169] : memref<32x32xf32, #tpu.memory_space<vmem>>, vector<32x32xf32>
    %cst_170 = arith.constant dense<0.000000e+00> : vector<24x32xf32>
    %365 = tpu.matmul %363, %364, %cst_170 {dimension_numbers = #tpu.dot_dimension_numbers<[1], [0], [0], [1], [0, 0, 1, 1], [], []>} : vector<24x32xf32>, vector<32x32xf32>, vector<24x32xf32> -> vector<24x32xf32>
    %c0_171 = arith.constant 0 : index
    %c0_172 = arith.constant 0 : index
    %366 = vector.load %arg23[%c0_171, %c0_172] : memref<1x32xf32, #tpu.memory_space<vmem>>, vector<1x32xf32>
    %367 = vector.broadcast %366 : vector<1x32xf32> to vector<24x32xf32>
    %368 = arith.addf %365, %367 : vector<24x32xf32>
    %c0_173 = arith.constant 0 : index
    %c0_174 = arith.constant 0 : index
    %369 = vector.load %arg24[%c0_173, %c0_174] : memref<24x1xf32, #tpu.memory_space<vmem>>, vector<24x1xf32>
    %370 = vector.broadcast %369 : vector<24x1xf32> to vector<24x32xf32>
    %371 = arith.mulf %368, %370 : vector<24x32xf32>
    %c0_175 = arith.constant 0 : index
    %c0_176 = arith.constant 0 : index
    %372 = vector.load %arg25[%c0_175, %c0_176] : memref<24x1xf32, #tpu.memory_space<vmem>>, vector<24x1xf32>
    %373 = vector.broadcast %372 : vector<24x1xf32> to vector<24x32xf32>
    %374 = arith.addf %371, %373 : vector<24x32xf32>
    %375 = arith.addf %374, %343 : vector<24x32xf32>
    %cst_177 = arith.constant 0.000000e+00 : f32
    %376 = vector.broadcast %cst_177 : f32 to vector<8x8xf32>
    %377 = vector.extract_strided_slice %375 {offsets = [0, 0], sizes = [8, 32], strides = [1, 1]} : vector<24x32xf32> to vector<8x32xf32>
    %c0_178 = arith.constant 0 : index
    %c0_179 = arith.constant 0 : index
    %c0_180 = arith.constant 0 : index
    %378 = vector.load %arg26[%c0_178, %c0_179, %c0_180] : memref<3x32x8xf32, #tpu.memory_space<vmem>>, vector<1x32x8xf32>
    %379 = vector.shape_cast %378 : vector<1x32x8xf32> to vector<32x8xf32>
    %cst_181 = arith.constant dense<0.000000e+00> : vector<8x8xf32>
    %380 = tpu.matmul %377, %379, %cst_181 {dimension_numbers = #tpu.dot_dimension_numbers<[1], [0], [0], [1], [0, 0, 1, 1], [], []>} : vector<8x32xf32>, vector<32x8xf32>, vector<8x8xf32> -> vector<8x8xf32>
    %381 = arith.addf %376, %380 : vector<8x8xf32>
    %382 = vector.extract_strided_slice %375 {offsets = [8, 0], sizes = [8, 32], strides = [1, 1]} : vector<24x32xf32> to vector<8x32xf32>
    %c1_182 = arith.constant 1 : index
    %c0_183 = arith.constant 0 : index
    %c0_184 = arith.constant 0 : index
    %383 = vector.load %arg26[%c1_182, %c0_183, %c0_184] : memref<3x32x8xf32, #tpu.memory_space<vmem>>, vector<1x32x8xf32>
    %384 = vector.shape_cast %383 : vector<1x32x8xf32> to vector<32x8xf32>
    %cst_185 = arith.constant dense<0.000000e+00> : vector<8x8xf32>
    %385 = tpu.matmul %382, %384, %cst_185 {dimension_numbers = #tpu.dot_dimension_numbers<[1], [0], [0], [1], [0, 0, 1, 1], [], []>} : vector<8x32xf32>, vector<32x8xf32>, vector<8x8xf32> -> vector<8x8xf32>
    %386 = arith.addf %381, %385 : vector<8x8xf32>
    %387 = vector.extract_strided_slice %375 {offsets = [16, 0], sizes = [8, 32], strides = [1, 1]} : vector<24x32xf32> to vector<8x32xf32>
    %c2 = arith.constant 2 : index
    %c0_186 = arith.constant 0 : index
    %c0_187 = arith.constant 0 : index
    %388 = vector.load %arg26[%c2, %c0_186, %c0_187] : memref<3x32x8xf32, #tpu.memory_space<vmem>>, vector<1x32x8xf32>
    %389 = vector.shape_cast %388 : vector<1x32x8xf32> to vector<32x8xf32>
    %cst_188 = arith.constant dense<0.000000e+00> : vector<8x8xf32>
    %390 = tpu.matmul %387, %389, %cst_188 {dimension_numbers = #tpu.dot_dimension_numbers<[1], [0], [0], [1], [0, 0, 1, 1], [], []>} : vector<8x32xf32>, vector<32x8xf32>, vector<8x8xf32> -> vector<8x8xf32>
    %391 = arith.addf %386, %390 : vector<8x8xf32>
    %c0_189 = arith.constant 0 : index
    %c0_190 = arith.constant 0 : index
    %392 = vector.load %arg27[%c0_189, %c0_190] : memref<1x8xf32, #tpu.memory_space<vmem>>, vector<1x8xf32>
    %393 = vector.broadcast %392 : vector<1x8xf32> to vector<8x8xf32>
    %394 = arith.addf %391, %393 : vector<8x8xf32>
    %395 = vector.broadcast %15 : vector<8x1xf32> to vector<8x8xf32>
    %396 = arith.mulf %394, %395 : vector<8x8xf32>
    %397 = vector.broadcast %1 : vector<8x1xf32> to vector<8x8xf32>
    %398 = arith.addf %396, %397 : vector<8x8xf32>
    %c0_191 = arith.constant 0 : index
    %c0_192 = arith.constant 0 : index
    %399 = vector.load %arg28[%c0_191, %c0_192] : memref<8x8xf32, #tpu.memory_space<vmem>>, vector<8x8xf32>
    tpu.vector_store %arg28[%c0_191, %c0_192], %398 {strides = array<i32>} : memref<8x8xf32, #tpu.memory_space<vmem>>, vector<8x8xf32>,
    return
  }
  func.func @transform_0(%arg0: i32) -> (i32, i32) {
    %c0_i32 = arith.constant 0 : i32
    %c0_i32_0 = arith.constant 0 : i32
    return %arg0, %c0_i32 : i32, i32
  }
  func.func @transform_1(%arg0: i32) -> (i32, i32) {
    %c0_i32 = arith.constant 0 : i32
    %c0_i32_0 = arith.constant 0 : i32
    %c0_i32_1 = arith.constant 0 : i32
    return %c0_i32, %c0_i32_0 : i32, i32
  }
  func.func @transform_2(%arg0: i32) -> (i32, i32) {
    %c0_i32 = arith.constant 0 : i32
    %c0_i32_0 = arith.constant 0 : i32
    %c0_i32_1 = arith.constant 0 : i32
    return %c0_i32, %c0_i32_0 : i32, i32
  }
  func.func @transform_3(%arg0: i32) -> (i32, i32) {
    %c0_i32 = arith.constant 0 : i32
    %c0_i32_0 = arith.constant 0 : i32
    %c0_i32_1 = arith.constant 0 : i32
    return %c0_i32, %c0_i32_0 : i32, i32
  }
  func.func @transform_4(%arg0: i32) -> (i32, i32) {
    %c0_i32 = arith.constant 0 : i32
    %c0_i32_0 = arith.constant 0 : i32
    %c0_i32_1 = arith.constant 0 : i32
    return %c0_i32, %c0_i32_0 : i32, i32
  }
  func.func @transform_5(%arg0: i32) -> (i32, i32, i32) {
    %c0_i32 = arith.constant 0 : i32
    %c0_i32_0 = arith.constant 0 : i32
    %c0_i32_1 = arith.constant 0 : i32
    %c0_i32_2 = arith.constant 0 : i32
    return %c0_i32, %c0_i32_0, %c0_i32_1 : i32, i32, i32
  }
  func.func @transform_6(%arg0: i32) -> (i32, i32, i32) {
    %c0_i32 = arith.constant 0 : i32
    %c0_i32_0 = arith.constant 0 : i32
    %c0_i32_1 = arith.constant 0 : i32
    %c0_i32_2 = arith.constant 0 : i32
    return %c0_i32, %c0_i32_0, %c0_i32_1 : i32, i32, i32
  }
  func.func @transform_7(%arg0: i32) -> (i32, i32, i32) {
    %c0_i32 = arith.constant 0 : i32
    %c0_i32_0 = arith.constant 0 : i32
    %c0_i32_1 = arith.constant 0 : i32
    %c0_i32_2 = arith.constant 0 : i32
    return %c0_i32, %c0_i32_0, %c0_i32_1 : i32, i32, i32
  }
  func.func @transform_8(%arg0: i32) -> (i32, i32, i32) {
    %c0_i32 = arith.constant 0 : i32
    %c0_i32_0 = arith.constant 0 : i32
    %c0_i32_1 = arith.constant 0 : i32
    %c0_i32_2 = arith.constant 0 : i32
    return %c0_i32, %c0_i32_0, %c0_i32_1 : i32, i32, i32
  }
  func.func @transform_9(%arg0: i32) -> (i32, i32, i32) {
    %c0_i32 = arith.constant 0 : i32
    %c0_i32_0 = arith.constant 0 : i32
    %c0_i32_1 = arith.constant 0 : i32
    %c0_i32_2 = arith.constant 0 : i32
    return %c0_i32, %c0_i32_0, %c0_i32_1 : i32, i32, i32
  }
  func.func @transform_10(%arg0: i32) -> (i32, i32, i32) {
    %c0_i32 = arith.constant 0 : i32
    %c0_i32_0 = arith.constant 0 : i32
    %c0_i32_1 = arith.constant 0 : i32
    %c0_i32_2 = arith.constant 0 : i32
    return %c0_i32, %c0_i32_0, %c0_i32_1 : i32, i32, i32
  }
  func.func @transform_11(%arg0: i32) -> (i32, i32, i32) {
    %c0_i32 = arith.constant 0 : i32
    %c0_i32_0 = arith.constant 0 : i32
    %c0_i32_1 = arith.constant 0 : i32
    %c0_i32_2 = arith.constant 0 : i32
    return %c0_i32, %c0_i32_0, %c0_i32_1 : i32, i32, i32
  }
  func.func @transform_12(%arg0: i32) -> (i32, i32, i32) {
    %c0_i32 = arith.constant 0 : i32
    %c0_i32_0 = arith.constant 0 : i32
    %c0_i32_1 = arith.constant 0 : i32
    %c0_i32_2 = arith.constant 0 : i32
    return %c0_i32, %c0_i32_0, %c0_i32_1 : i32, i32, i32
  }
  func.func @transform_13(%arg0: i32) -> (i32, i32, i32) {
    %c0_i32 = arith.constant 0 : i32
    %c0_i32_0 = arith.constant 0 : i32
    %c0_i32_1 = arith.constant 0 : i32
    %c0_i32_2 = arith.constant 0 : i32
    return %c0_i32, %c0_i32_0, %c0_i32_1 : i32, i32, i32
  }
  func.func @transform_14(%arg0: i32) -> (i32, i32, i32) {
    %c0_i32 = arith.constant 0 : i32
    %c0_i32_0 = arith.constant 0 : i32
    %c0_i32_1 = arith.constant 0 : i32
    %c0_i32_2 = arith.constant 0 : i32
    return %c0_i32, %c0_i32_0, %c0_i32_1 : i32, i32, i32
  }
  func.func @transform_15(%arg0: i32) -> (i32, i32, i32) {
    %c0_i32 = arith.constant 0 : i32
    %c0_i32_0 = arith.constant 0 : i32
    %c0_i32_1 = arith.constant 0 : i32
    %c0_i32_2 = arith.constant 0 : i32
    return %c0_i32, %c0_i32_0, %c0_i32_1 : i32, i32, i32
  }
  func.func @transform_16(%arg0: i32) -> (i32, i32, i32) {
    %c0_i32 = arith.constant 0 : i32
    %c0_i32_0 = arith.constant 0 : i32
    %c0_i32_1 = arith.constant 0 : i32
    %c0_i32_2 = arith.constant 0 : i32
    return %c0_i32, %c0_i32_0, %c0_i32_1 : i32, i32, i32
  }
  func.func @transform_17(%arg0: i32) -> (i32, i32, i32) {
    %c0_i32 = arith.constant 0 : i32
    %c0_i32_0 = arith.constant 0 : i32
    %c0_i32_1 = arith.constant 0 : i32
    %c0_i32_2 = arith.constant 0 : i32
    return %c0_i32, %c0_i32_0, %c0_i32_1 : i32, i32, i32
  }
  func.func @transform_18(%arg0: i32) -> (i32, i32, i32) {
    %c0_i32 = arith.constant 0 : i32
    %c0_i32_0 = arith.constant 0 : i32
    %c0_i32_1 = arith.constant 0 : i32
    %c0_i32_2 = arith.constant 0 : i32
    return %c0_i32, %c0_i32_0, %c0_i32_1 : i32, i32, i32
  }
  func.func @transform_19(%arg0: i32) -> (i32, i32) {
    %c0_i32 = arith.constant 0 : i32
    %c0_i32_0 = arith.constant 0 : i32
    %c0_i32_1 = arith.constant 0 : i32
    return %c0_i32, %c0_i32_0 : i32, i32
  }
  func.func @transform_20(%arg0: i32) -> (i32, i32) {
    %c0_i32 = arith.constant 0 : i32
    %c0_i32_0 = arith.constant 0 : i32
    %c0_i32_1 = arith.constant 0 : i32
    return %c0_i32, %c0_i32_0 : i32, i32
  }
  func.func @transform_21(%arg0: i32) -> (i32, i32) {
    %c0_i32 = arith.constant 0 : i32
    %c0_i32_0 = arith.constant 0 : i32
    %c0_i32_1 = arith.constant 0 : i32
    return %c0_i32, %c0_i32_0 : i32, i32
  }
  func.func @transform_22(%arg0: i32) -> (i32, i32) {
    %c0_i32 = arith.constant 0 : i32
    %c0_i32_0 = arith.constant 0 : i32
    %c0_i32_1 = arith.constant 0 : i32
    return %c0_i32, %c0_i32_0 : i32, i32
  }
  func.func @transform_23(%arg0: i32) -> (i32, i32) {
    %c0_i32 = arith.constant 0 : i32
    %c0_i32_0 = arith.constant 0 : i32
    %c0_i32_1 = arith.constant 0 : i32
    return %c0_i32, %c0_i32_0 : i32, i32
  }
  func.func @transform_24(%arg0: i32) -> (i32, i32) {
    %c0_i32 = arith.constant 0 : i32
    %c0_i32_0 = arith.constant 0 : i32
    %c0_i32_1 = arith.constant 0 : i32
    return %c0_i32, %c0_i32_0 : i32, i32
  }
  func.func @transform_25(%arg0: i32) -> (i32, i32, i32) {
    %c0_i32 = arith.constant 0 : i32
    %c0_i32_0 = arith.constant 0 : i32
    %c0_i32_1 = arith.constant 0 : i32
    %c0_i32_2 = arith.constant 0 : i32
    return %c0_i32, %c0_i32_0, %c0_i32_1 : i32, i32, i32
  }
  func.func @transform_26(%arg0: i32) -> (i32, i32) {
    %c0_i32 = arith.constant 0 : i32
    %c0_i32_0 = arith.constant 0 : i32
    %c0_i32_1 = arith.constant 0 : i32
    return %c0_i32, %c0_i32_0 : i32, i32
  }
  func.func @transform_27(%arg0: i32) -> (i32, i32) {
    %c0_i32 = arith.constant 0 : i32
    %c0_i32_0 = arith.constant 0 : i32
    return %arg0, %c0_i32 : i32, i32
  }
}

</mosaic_0001>

<bundles_post_ra>
// kernel: forward.1
= control target key start
LH: loop header
LB: loop body
LE: loop exit
PB: predicated region body
PF: predicated region fallthrough
CT: control target
= control target key end

     0   :  { %s4443_s0 = inlined_call_operand.vmem [shape: f32[8,16], index: 0, kind: input, shape index: {}]   ;;  %s4444_s1 = inlined_call_operand.vmem [shape: f32[24,24], index: 1, kind: input, shape index: {}]   ;;  %s4445_s2 = inlined_call_operand.vmem [shape: f32[24,24], index: 2, kind: input, shape index: {}]   ;;  %s4446_s3 = inlined_call_operand.vmem [shape: f32[8,32], index: 3, kind: input, shape index: {}]   ;;  %s4447_s4 = inlined_call_operand.vmem [shape: f32[24,32], index: 4, kind: input, shape index: {}]   ;;  %s4448_s5 = inlined_call_operand.vmem [shape: f32[2,32,96], index: 5, kind: input, shape index: {}]   ;;  %s4449_s6 = inlined_call_operand.vmem [shape: f32[2,1,96], index: 6, kind: input, shape index: {}]   ;;  %s4450_s7 = inlined_call_operand.vmem [shape: f32[2,32,32], index: 7, kind: input, shape index: {}]   ;;  %s4451_s8 = inlined_call_operand.vmem [shape: f32[2,1,32], index: 8, kind: input, shape index: {}]   ;;  %s4452_s9 = inlined_call_operand.vmem [shape: f32[2,1,32], index: 9, kind: input, shape index: {}]   ;;  %s4453_s10 = inlined_call_operand.vmem [shape: f32[2,1,32], index: 10, kind: input, shape index: {}]   ;;  %s4454_s11 = inlined_call_operand.vmem [shape: f32[2,1,32], index: 11, kind: input, shape index: {}]   ;;  %s4455_s12 = inlined_call_operand.vmem [shape: f32[2,1,32], index: 12, kind: input, shape index: {}]   ;;  %s4456_s13 = inlined_call_operand.vmem [shape: f32[2,32,64], index: 13, kind: input, shape index: {}]   ;;  %s4457_s14 = inlined_call_operand.vmem [shape: f32[2,1,64], index: 14, kind: input, shape index: {}]   ;;  %s4458_s15 = inlined_call_operand.vmem [shape: f32[2,64,32], index: 15, kind: input, shape index: {}]   ;;  %s4459_s16 = inlined_call_operand.vmem [shape: f32[2,1,32], index: 16, kind: input, shape index: {}]   ;;  %s4460_s17 = inlined_call_operand.vmem [shape: f32[2,24,1], index: 17, kind: input, shape index: {}]   ;;  %s4461_s18 = inlined_call_operand.vmem [shape: f32[2,24,1], index: 18, kind: input, shape index: {}]   ;;  %s4462_s19 = inlined_call_operand.vmem [shape: f32[32,96], index: 19, kind: input, shape index: {}]   ;;  %s4463_s20 = inlined_call_operand.vmem [shape: f32[1,96], index: 20, kind: input, shape index: {}]   ;;  %s4464_s21 = inlined_call_operand.vmem [shape: f32[32,32], index: 21, kind: input, shape index: {}]   ;;  %s4465_s22 = inlined_call_operand.vmem [shape: f32[1,32], index: 22, kind: input, shape index: {}]   ;;  %s4466_s23 = inlined_call_operand.vmem [shape: f32[24,1], index: 23, kind: input, shape index: {}]   ;;  %s4467_s24 = inlined_call_operand.vmem [shape: f32[24,1], index: 24, kind: input, shape index: {}]   ;;  %s4468_s25 = inlined_call_operand.vmem [shape: f32[3,32,8], index: 25, kind: input, shape index: {}]   ;;  %s4469_s26 = inlined_call_operand.vmem [shape: f32[1,8], index: 26, kind: input, shape index: {}]   ;;  %s4470_s27 = inlined_call_operand.hbm [shape: f32[8,8], index: 27, kind: output, shape index: {}]  }
   0x1   :  { %4509 = sst [smem:[#allocation5_spill]] %s4443_s0 }
   0x2   :  { %4510 = sst [smem:[#allocation6_spill]] %s4444_s1 }
   0x3   :  { %4511 = sst [smem:[#allocation7_spill]] %s4445_s2 }
   0x4   :  { %4512 = sst [smem:[#allocation8_spill]] %s4446_s3 }
   0x5   :  { %4513 = sst [smem:[#allocation9_spill]] %s4447_s4 }
   0x6   :  { %4514 = sst [smem:[#allocation10_spill]] %s4448_s5 }
   0x7   :  { %4515 = sst [smem:[#allocation11_spill]] %s4449_s6 }
   0x8   :  { %4516 = sst [smem:[#allocation12_spill]] %s4450_s7 }
   0x9   :  { %4517 = sst [smem:[#allocation13_spill]] %s4451_s8 }
   0xa   :  { %4518 = sst [smem:[#allocation14_spill]] %s4452_s9 }
   0xb   :  { %4519 = sst [smem:[#allocation15_spill]] %s4453_s10 }
   0xc   :  { %4520 = sst [smem:[#allocation16_spill]] %s4454_s11 }
   0xd   :  { %4521 = sst [smem:[#allocation17_spill]] %s4469_s26 }
   0xe   :  { %4522 = sst [smem:[#allocation18_spill]] %s4470_s27 }
   0xf   :  { %s4523_s8 = sld [smem:[#allocation5_spill]]  ;;  %vm88_vm0 = vcmask 130048  }
  0x15   :  { %v87_v0 = vld [vmem:[%s4523_s8] sm:$0xff] }
  0x16   :  { %v89_v1 = vsel %vm88_vm0, %v87_v0, 0.0 }
  0x17   :  { %90 = vadd.xlane.f32.xlu0 %v89_v1 }
  0x18   :  { %32 = vsyncpa [#allocation3], 0  ;;  %v3223_v2 = vmov 16.0   ;;  %v3224_v3 = vmov 15   ;;  %s4524_s5 = sld [smem:[#allocation8_spill]]  ;;  %vm149_vm8 = vcmask 64512  }
  0x19   :  { %3054 = vrcp.f32 %v3223_v2  ;;  %2986 = vset.pattern.permute.xlu1 %v3224_v3  ;;  %s4501_s28 = smov 120   ;;  %s3226_s0 = smov 124   ;;  %vm196_vm9 = vcmask 261120   ;;  %vm279_vm10 = vcmask 195584  }
  0x1a   :  { %121 = vperm.xlu1 %2986, %v87_v0   ;;  %s4525_s1 = sld [smem:[#allocation10_spill]]  ;;  %s4507_s3 = smov 96  }
  0x1b   :  { %s4526_s9 = sld [smem:[#allocation9_spill]]  ;;  %s4505_s7 = smov 88  }
  0x1c   :  { %s4527_s2 = sld [smem:[#allocation11_spill]]  ;;  %s4503_s4 = smov 80  }
  0x1d   :  { %s4493_s8 = smov 72   ;;  %s4491_s30 = smov 112  }
  0x1e   :  { %v145_v15 = vld [vmem:[%s4524_s5] sm:$0xff]  ;;  %s4485_s5 = smov 64   ;;  %s4528_s29 = sld [smem:[#allocation6_spill]] }
  0x1f   :  { %v3055_v4 = vpop.eup %3054  ;;  %171 = vmatpush.msra.mxu0 %v145_v15  ;;  %2965 = vmatpush.msra.mxu3 %v145_v15  ;;  %s4487_s6 = smov 56   ;;  %s4483_s11 = smov 48  }
  0x20   :  { %v93_v5 = vmul.f32 16.0, %v3055_v4  ;;  %vm97_vm1 = vweird.f32 %v3055_v4  ;;  %v191_v42 = vld [vmem:[%s4525_s1 + $0x18] sm:$0xff]  ;;  %v190_v43 = vld [vmem:[%s4525_s1 + $0x10] sm:$0xff]  ;;  %v189_v45 = vld [vmem:[%s4525_s1 + $0x8] sm:$0xff]  ;;  %s4497_s10 = smov 16   ;;  %s4542_s27 = smov 72  }
  0x21   :  { %218 = vmatpush.msra.mxu1 %v191_v42  ;;  %v188_v46 = vld [vmem:[%s4525_s1] sm:$0xff]  ;;  %v147_v51 = vld [vmem:[%s4526_s9 + $0x8] sm:$0xff]  ;;  %v148_v54 = vld [vmem:[%s4526_s9 + $0x10] sm:$0xff] }
  0x22   :  { %v94_v6 = vsub.f32 1.0, %v93_v5  ;;  %v146_v48 = vld [vmem:[%s4526_s9] sm:$0xff]  ;;  %s4489_s9 = smov 104  }
  0x23   :  { %219 = vmatpush.msra.mxu1 %v190_v43  ;;  %v3035_v57 = vld [vmem:[%s4527_s2] ss:$0 sm:$0xff] }
  0x24   :  { %v95_v7 = vmul.f32 %v3055_v4, %v94_v6 }
  0x25   :  { %220 = vmatpush.msra.mxu1 %v189_v45 }
  0x26   :  { %v96_v8 = vadd.f32 %v3055_v4, %v95_v7 }
  0x27   :  { %221 = vmatpush.msra.mxu1 %v188_v46 }
  0x28   :  { %v98_v9 = vsel %vm97_vm1, %v3055_v4, %v96_v8 }
  0x8a   :  { %v91_v10 = vpop.xlane.xlu0 %90 }
  0x8b   :  { %v99_v11 = vmul.f32 %v98_v9, %v91_v10 }
  0x8c   :  { %v3395_v32 = vpop.permute.xlu1 %121 }
  0x8d   :  { %v100_v12 = vsub.f32 %v87_v0, %v99_v11  ;;  %v124_v36 = vsub.f32 %v87_v0, %v3395_v32 }
  0x8f   :  { %v101_v13 = vmul.f32 %v100_v12, %v100_v12 }
  0x91   :  { %v102_v14 = vsel %vm88_vm0, %v101_v13, 0.0 }
  0x92   :  { %103 = vadd.xlane.f32.xlu0 %v102_v14 }
 0x105   :  { %v104_v16 = vpop.xlane.xlu0 %103 }
 0x106   :  { %v105_v17 = vmul.f32 %v104_v16, %v98_v9 }
 0x108   :  { %v106_v18 = vadd.f32 1e-05, %v105_v17 }
 0x10a   :  { %3056 = vrsqrt.f32 %v106_v18  ;;  %vm114_vm2 = vcmp.eq.f32.partialorder %v106_v18, inf  ;;  %v117_v26 = vand.u32 2147483648, %v106_v18  ;;  %vm116_vm3 = vcmp.eq.f32.partialorder %v106_v18, 0.0 }
 0x110   :  { %v3057_v19 = vpop.eup %3056 }
 0x111   :  { %v108_v20 = vmul.f32 %v3057_v19, %v106_v18 }
 0x113   :  { %v109_v21 = vmul.f32 %v3057_v19, %v108_v20 }
 0x115   :  { %v110_v22 = vmul.f32 0.5, %v109_v21 }
 0x117   :  { %v111_v23 = vsub.f32 1.5, %v110_v22 }
 0x119   :  { %v112_v24 = vmul.f32 %v3057_v19, %v111_v23 }
 0x11b   :  { %v113_v25 = vmul.f32 %v112_v24, %v106_v18 }
 0x11d   :  { %v115_v27 = vsel %vm114_vm2, %v106_v18, %v113_v25  ;;  %v182_v25 = vld [vmem:[%s4528_s29] sm:$0xff] }
 0x11e   :  { %v3391_v28 = vsel %vm116_vm3, %v117_v26, %v115_v27 }
 0x11f   :  { %3058 = vrcp.f32 %v3391_v28  ;;  %v136_v33 = vand.u32 2147483648, %v3391_v28  ;;  %v134_v35 = vand.u32 2147483647, %v3391_v28  ;;  %vm130_vm5 = vweird.f32 %v3391_v28 }
 0x121   :  { %v137_v38 = vor.u32 1.1754944e-38, %v136_v33  ;;  %vm135_vm7 = vcmp.eq.f32.partialorder %v134_v35, 8.507059e+37 }
 0x125   :  { %v3059_v29 = vpop.eup %3058 }
 0x126   :  { %v126_v30 = vmul.f32 %v3059_v29, %v3391_v28  ;;  %vm131_vm4 = vweird.f32 %v3059_v29 }
 0x127   :  { %vm132_vm6 = vmor %vm130_vm5, %vm131_vm4 }
 0x128   :  { %v127_v31 = vsub.f32 1.0, %v126_v30 }
 0x12a   :  { %v128_v34 = vmul.f32 %v3059_v29, %v127_v31 }
 0x12c   :  { %v129_v37 = vadd.f32 %v3059_v29, %v128_v34  ;;  %v183_v34 = vld [vmem:[%s4528_s29 + $0x8] sm:$0xff] }
 0x12e   :  { %v133_v39 = vsel %vm132_vm6, %v3059_v29, %v129_v37 }
 0x12f   :  { %v138_v40 = vsel %vm135_vm7, %v137_v38, %v133_v39  ;;  %v184_v38 = vld [vmem:[%s4528_s29 + $0x10] sm:$0xff] }
 0x130   :  { %v139_v41 = vmul.f32 %v138_v40, %v124_v36 }
 0x132   :  { %143 = vrot.lane.b32.xlu2 %v139_v41, %s4501_s28  ;;  %141 = vrot.lane.b32.xlu1 %v139_v41, %s3226_s0  ;;  %s4481_s0 = smov 40  }
 0x133   :  { %2806 = vmatmul.msk.f32.vlgmr.msra.gmra.mxu0 %vm149_vm8, %v139_v41 }
 0x18c   :  { %v144_v44 = vpop.permute.xlu2 %143 }
 0x18d   :  { %2808 = vmatmul.msk.f32.vlgmr.msra.gmra.mxu3 %vm149_vm8, %v144_v44 }
 0x1a4   :  { %v142_v47 = vpop.permute.xlu1 %141 }
 0x1a5   :  { %2807 = vmatmul.msk.f32.gmra.mxu0 %vm149_vm8, %v142_v47 }
 0x1b0   :  { %v173_v49 = vpop.f32.mrf.mxu0 }
 0x1b1   :  { %v3420_v50 = vadd.f32 %v173_v49, %v146_v48 }
 0x1b3   :  { %2809 = vmatmul.msk.f32.vlgmr.msra.gmra.mxu1 %vm196_vm9, %v3420_v50 }
 0x210   :  { %v179_v55 = vpop.f32.mrf.mxu3 }
 0x211   :  { %v3434_v56 = vadd.f32 %v179_v55, %v148_v54 }
 0x222   :  { %v176_v52 = vpop.f32.mrf.mxu0 }
 0x223   :  { %v3427_v53 = vadd.f32 %v176_v52, %v147_v51 }
 0x225   :  { %2810 = vmatmul.msk.f32.gmra.mxu1 %vm196_vm9, %v3427_v53 }
 0x22d   :  { %2811 = vmatmul.msk.f32.gmra.mxu1 %vm196_vm9, %v3434_v56 }
 0x230   :  { %v223_v58 = vpop.f32.mrf.mxu1 }
 0x231   :  { %v3441_v59 = vadd.f32 %v3035_v57, %v223_v58 }
 0x233   :  { %235 = vrot.lane.b32.xlu1 %v3441_v59, %s4507_s3 }
 0x2a2   :  { %v226_v60 = vpop.f32.mrf.mxu1 }
 0x2a3   :  { %v227_v61 = vadd.f32 %v3035_v57, %v226_v60 }
 0x2a5   :  { %237 = vrot.lane.b32.xlu0 %v227_v61, %s4507_s3  ;;  %404 = vrot.lane.b32.xlu1 %v227_v61, %s4505_s7  ;;  %v236_v3 = vpop.permute.xlu1 %235 }
 0x2aa   :  { %v229_v62 = vpop.f32.mrf.mxu1 }
 0x2ab   :  { %v230_v63 = vadd.f32 %v3035_v57, %v229_v62 }
 0x2ad   :  { %239 = vrot.lane.b32.xlu2 %v230_v63, %s4507_s3  ;;  %572 = vrot.lane.b32.xlu0 %v230_v63, %s4503_s4  ;;  %v3467_v0 = vpack.i.bf16 %v227_v61, %v230_v63  ;;  %s4546_s3 = smov 64  }
 0x2ae   :  { %396 = vrot.lane.b32.xlu1 %v3441_v59, %s4501_s28 }
 0x2b5   :  { %406 = vrot.lane.b32.xlu2 %v230_v63, %s4505_s7  ;;  %570 = vrot.lane.b32.xlu0 %v227_v61, %s4503_s4 }
 0x2b6   :  { %738 = vrot.lane.b32.xlu1 %v230_v63, %s4493_s8 }
 0x2bd   :  { %734 = vrot.lane.b32.xlu0 %v3441_v59, %s4493_s8  ;;  %402 = vrot.lane.b32.xlu2 %v3441_v59, %s4505_s7  ;;  %s4550_s7 = smov 16  }
 0x2be   :  { %736 = vrot.lane.b32.xlu1 %v227_v61, %s4493_s8  ;;  %s4495_s8 = smov 24  }
 0x2c5   :  { %564 = vrot.lane.b32.xlu0 %v227_v61, %s4491_s30  ;;  %398 = vrot.lane.b32.xlu2 %v227_v61, %s4501_s28 }
 0x2c6   :  { %562 = vrot.lane.b32.xlu1 %v3441_v59, %s4491_s30 }
 0x2cd   :  { %732 = vrot.lane.b32.xlu0 %v230_v63, %s4489_s9  ;;  %568 = vrot.lane.b32.xlu2 %v3441_v59, %s4503_s4  ;;  %s4537_s4 = sld [smem:[#allocation16_spill]] }
 0x2ce   :  { %730 = vrot.lane.b32.xlu1 %v227_v61, %s4489_s9 }
 0x2d5   :  { %2988 = vrot.lane.b32.xlu0 %v3467_v0, %s4485_s5  ;;  %400 = vrot.lane.b32.xlu2 %v230_v63, %s4501_s28  ;;  %s4540_s28 = smov 80  }
 0x2dd   :  { %728 = vrot.lane.b32.xlu2 %v3441_v59, %s4489_s9  ;;  %s4536_s9 = sld [smem:[#allocation15_spill]] }
 0x2e5   :  { %566 = vrot.lane.b32.xlu2 %v230_v63, %s4491_s30  ;;  %s4545_s30 = smov 56  }
 0x307   :  { %v240_v1 = vpop.permute.xlu2 %239 }
 0x308   :  { %2812 = vmatpush.xpose.msk.msra.mxu2 %vm149_vm8, %v240_v1 }
 0x30f   :  { %v407_v2 = vpop.permute.xlu2 %406 }
 0x310   :  { %2821 = vmatpush.xpose.msk.msrb.mxu0 %vm149_vm8, %v407_v2 }
 0x317   :  { %v238_v4 = vpop.permute.xlu0 %237  ;;  %v403_v5 = vpop.permute.xlu2 %402 }
 0x318   :  { %v405_v6 = vpop.permute.xlu1 %404  ;;  %2813 = vmatpush.xpose.msk.msra.mxu2 %vm149_vm8, %v238_v4 }
 0x319   :  { %2822 = vmatpush.xpose.msk.msrb.mxu0 %vm149_vm8, %v405_v6 }
 0x31c   :  { %2814 = vmatpush.xpose.msk.msra.mxu2 %vm149_vm8, %v236_v3 }
 0x31d   :  { %2823 = vmatpush.xpose.msk.msrb.mxu0 %vm149_vm8, %v403_v5 }
 0x31f   :  { %v573_v7 = vpop.permute.xlu0 %572  ;;  %v399_v8 = vpop.permute.xlu2 %398  ;;  %2815 = vmatmul.msk.f32.vlgmr.msra.gmra.mxu2 %vm149_vm8, %v3441_v59 }
 0x320   :  { %v397_v9 = vpop.permute.xlu1 %396  ;;  %2830 = vmatpush.xpose.msk.msrb.mxu1 %vm149_vm8, %v573_v7 }
 0x321   :  { %2824 = vmatmul.msk.f32.vlgmr.msrb.gmra.mxu0 %vm149_vm8, %v397_v9 }
 0x327   :  { %v571_v10 = vpop.permute.xlu0 %570  ;;  %v569_v11 = vpop.permute.xlu2 %568  ;;  %2816 = vmatmul.msk.f32.gmra.mxu2 %vm149_vm8, %v227_v61 }
 0x328   :  { %v739_v12 = vpop.permute.xlu1 %738  ;;  %2831 = vmatpush.xpose.msk.msrb.mxu1 %vm149_vm8, %v571_v10 }
 0x329   :  { %2825 = vmatmul.msk.f32.gmra.mxu0 %vm149_vm8, %v399_v8 }
 0x32a   :  { %2839 = vmatpush.xpose.msk.msra.mxu0 %vm149_vm8, %v739_v12 }
 0x32c   :  { %2832 = vmatpush.xpose.msk.msrb.mxu1 %vm149_vm8, %v569_v11 }
 0x32f   :  { %v735_v13 = vpop.permute.xlu0 %734  ;;  %v401_v14 = vpop.permute.xlu2 %400  ;;  %2817 = vmatmul.msk.f32.gmra.mxu2 %vm149_vm8, %v230_v63 }
 0x330   :  { %v737_v15 = vpop.permute.xlu1 %736 }
 0x331   :  { %2826 = vmatmul.msk.f32.gmra.mxu0 %vm149_vm8, %v401_v14 }
 0x332   :  { %2840 = vmatpush.xpose.msk.msra.mxu0 %vm149_vm8, %v737_v15 }
 0x336   :  { %2841 = vmatpush.xpose.msk.msra.mxu0 %vm149_vm8, %v735_v13 }
 0x337   :  { %v565_v16 = vpop.permute.xlu0 %564  ;;  %v729_v17 = vpop.permute.xlu2 %728 }
 0x338   :  { %v563_v18 = vpop.permute.xlu1 %562 }
 0x339   :  { %2833 = vmatmul.msk.f32.vlgmr.msrb.gmra.mxu1 %vm149_vm8, %v563_v18  ;;  %2842 = vmatmul.msk.f32.vlgmr.msra.gmra.mxu0 %vm149_vm8, %v729_v17 }
 0x33f   :  { %v733_v19 = vpop.permute.xlu0 %732  ;;  %v567_v22 = vpop.permute.xlu2 %566 }
 0x340   :  { %v731_v20 = vpop.permute.xlu1 %730 }
 0x341   :  { %2834 = vmatmul.msk.f32.gmra.mxu1 %vm149_vm8, %v565_v16  ;;  %2843 = vmatmul.msk.f32.gmra.mxu0 %vm149_vm8, %v731_v20 }
 0x347   :  { %v2989_v21 = vpop.permute.xlu0 %2988 }
 0x348   :  { %v2990_v23 = vunpack.i.l.bf16 %v2989_v21  ;;  %v2991_v24 = vunpack.i.h.bf16 %v2989_v21 }
 0x349   :  { %2835 = vmatmul.msk.f32.gmra.mxu1 %vm149_vm8, %v567_v22  ;;  %2844 = vmatmul.msk.f32.gmra.mxu0 %vm149_vm8, %v733_v19 }
 0x34a   :  { %383 = vmatpush.msrb.mxu3 %v2990_v23 }
 0x34c   :  { %384 = vmatpush.msrb.mxu3 %v2991_v24 }
 0x39e   :  { %v437_v26 = vpop.f32.mrf.mxu0 }
 0x39f   :  { %v438_v27 = vadd.f32 %v437_v26, %v182_v25 }
 0x3a1   :  { %v446_v29 = vsel %vm279_vm10, %v438_v27, -inf }
 0x3a2   :  { %447 = vmax.xlane.f32.xlu2 %v446_v29  ;;  %v270_v30 = vpop.f32.mrf.mxu2 }
 0x3a3   :  { %v271_v31 = vadd.f32 %v270_v30, %v182_v25 }
 0x3a5   :  { %v280_v33 = vsel %vm279_vm10, %v271_v31, -inf }
 0x3a6   :  { %v440_v35 = vpop.f32.mrf.mxu0  ;;  %281 = vmax.xlane.f32.xlu1 %v280_v33 }
 0x3a7   :  { %v441_v36 = vadd.f32 %v440_v35, %v183_v34 }
 0x3a9   :  { %v449_v39 = vsel %vm279_vm10, %v441_v36, -inf }
 0x3aa   :  { %v273_v37 = vpop.f32.mrf.mxu2 }
 0x3ab   :  { %v274_v54 = vadd.f32 %v273_v37, %v183_v34 }
 0x3ad   :  { %v283_v55 = vsel %vm279_vm10, %v274_v54, -inf }
 0x3ae   :  { %v443_v40 = vpop.f32.mrf.mxu0  ;;  %450 = vmax.xlane.f32.xlu1 %v449_v39 }
 0x3af   :  { %v3512_v41 = vadd.f32 %v443_v40, %v184_v38 }
 0x3b1   :  { %v452_v42 = vsel %vm279_vm10, %v3512_v41, -inf }
 0x3b2   :  { %453 = vmax.xlane.f32.xlu0 %v452_v42  ;;  %v276_v43 = vpop.f32.mrf.mxu2 }
 0x3b3   :  { %v3516_v44 = vadd.f32 %v276_v43, %v184_v38 }
 0x3b5   :  { %v286_v47 = vsel %vm279_vm10, %v3516_v44, -inf }
 0x3b6   :  { %v603_v45 = vpop.f32.mrf.mxu1  ;;  %v769_v61 = vpop.f32.mrf.mxu0 }
 0x3b7   :  { %v604_v46 = vadd.f32 %v603_v45, %v182_v25  ;;  %v3534_v62 = vadd.f32 %v769_v61, %v182_v25 }
 0x3b9   :  { %v612_v48 = vsel %vm279_vm10, %v604_v46, -inf  ;;  %v778_v1 = vsel %vm279_vm10, %v3534_v62, -inf }
 0x3ba   :  { %287 = vmax.xlane.f32.xlu0 %v286_v47  ;;  %613 = vmax.xlane.f32.xlu2 %v612_v48 }
 0x3be   :  { %v606_v49 = vpop.f32.mrf.mxu1  ;;  %v772_v63 = vpop.f32.mrf.mxu0 }
 0x3bf   :  { %v3521_v51 = vadd.f32 %v606_v49, %v183_v34  ;;  %v3538_v2 = vadd.f32 %v772_v63, %v183_v34 }
 0x3c1   :  { %v615_v52 = vsel %vm279_vm10, %v3521_v51, -inf  ;;  %v781_v3 = vsel %vm279_vm10, %v3538_v2, -inf }
 0x3c2   :  { %616 = vmax.xlane.f32.xlu2 %v615_v52 }
 0x3c6   :  { %v609_v57 = vpop.f32.mrf.mxu1  ;;  %v775_v4 = vpop.f32.mrf.mxu0 }
 0x3c7   :  { %352 = vrot.lane.b32.xlu1 %v3441_v59, %s4485_s5  ;;  %v3528_v58 = vadd.f32 %v609_v57, %v184_v38  ;;  %v3542_v5 = vadd.f32 %v775_v4, %v184_v38  ;;  %s4534_s5 = sld [smem:[#allocation13_spill]] }
 0x3c9   :  { %v618_v60 = vsel %vm279_vm10, %v3528_v58, -inf  ;;  %v784_v6 = vsel %vm279_vm10, %v3542_v5, -inf }
 0x3ca   :  { %284 = vmax.xlane.f32.xlu2 %v283_v55 }
 0x3ce   :  { %2993 = vrot.lane.b32.xlu0 %v3467_v0, %s4487_s6 }
 0x3d2   :  { %619 = vmax.xlane.f32.xlu2 %v618_v60 }
 0x3f1   :  { %779 = vmax.xlane.f32.xlu1 %v778_v1 }
 0x3f9   :  { %782 = vmax.xlane.f32.xlu1 %v781_v3 }
 0x401   :  { %785 = vmax.xlane.f32.xlu1 %v784_v6 }
 0x415   :  { %v448_v7 = vpop.xlane.xlu2 %447 }
 0x416   :  { %v455_v8 = vsub.f32 %v438_v27, %v448_v7 }
 0x418   :  { %v458_v9 = vmul.f32 1.442695, %v455_v8 }
 0x419   :  { %v282_v10 = vpop.xlane.xlu1 %281 }
 0x41a   :  { %3060 = vpow2.f32 %v458_v9  ;;  %v289_v11 = vsub.f32 %v271_v31, %v282_v10 }
 0x41c   :  { %v292_v12 = vmul.f32 1.442695, %v289_v11 }
 0x41e   :  { %3062 = vpow2.f32 %v292_v12 }
 0x420   :  { %v3546_v13 = vpop.eup %3060 }
 0x421   :  { %v464_v14 = vsel %vm279_vm10, %v3546_v13, 0.0  ;;  %v451_v15 = vpop.xlane.xlu1 %450 }
 0x422   :  { %465 = vadd.xlane.f32.xlu2 %v464_v14  ;;  %v456_v16 = vsub.f32 %v441_v36, %v451_v15 }
 0x424   :  { %v3550_v17 = vpop.eup %3062  ;;  %v460_v18 = vmul.f32 1.442695, %v456_v16 }
 0x425   :  { %v298_v19 = vsel %vm279_vm10, %v3550_v17, 0.0  ;;  %v454_v23 = vpop.xlane.xlu0 %453 }
 0x426   :  { %3064 = vpow2.f32 %v460_v18  ;;  %299 = vadd.xlane.f32.xlu0 %v298_v19  ;;  %v457_v48 = vsub.f32 %v3512_v41, %v454_v23 }
 0x428   :  { %v462_v52 = vmul.f32 1.442695, %v457_v48 }
 0x42c   :  { %v3554_v20 = vpop.eup %3064 }
 0x42d   :  { %v614_v21 = vpop.xlane.xlu2 %613  ;;  %v467_v22 = vsel %vm279_vm10, %v3554_v20, 0.0  ;;  %v288_v27 = vpop.xlane.xlu0 %287 }
 0x42e   :  { %v621_v24 = vsub.f32 %v604_v46, %v614_v21  ;;  %468 = vadd.xlane.f32.xlu2 %v467_v22 }
 0x430   :  { %v624_v25 = vmul.f32 1.442695, %v621_v24 }
 0x432   :  { %3066 = vpow2.f32 %v624_v25 }
 0x435   :  { %v617_v26 = vpop.xlane.xlu2 %616 }
 0x436   :  { %v622_v60 = vsub.f32 %v3521_v51, %v617_v26 }
 0x438   :  { %v3558_v29 = vpop.eup %3066  ;;  %v626_v63 = vmul.f32 1.442695, %v622_v60 }
 0x439   :  { %v353_v30 = vpop.permute.xlu1 %352  ;;  %v630_v31 = vsel %vm279_vm10, %v3558_v29, 0.0 }
 0x43a   :  { %385 = vmatpush.msrb.mxu3 %v353_v30  ;;  %631 = vadd.xlane.f32.xlu1 %v630_v31 }
 0x43d   :  { %v285_v33 = vpop.xlane.xlu2 %284 }
 0x43e   :  { %v290_v34 = vsub.f32 %v274_v54, %v285_v33  ;;  %v291_v54 = vsub.f32 %v3516_v44, %v288_v27 }
 0x440   :  { %v294_v35 = vmul.f32 1.442695, %v290_v34  ;;  %v2994_v36 = vpop.permute.xlu0 %2993 }
 0x441   :  { %v2995_v37 = vunpack.i.l.bf16 %v2994_v36  ;;  %v2996_v38 = vunpack.i.h.bf16 %v2994_v36 }
 0x442   :  { %3068 = vpow2.f32 %v294_v35 }
 0x443   :  { %549 = vmatpush.msra.mxu3 %v2995_v37 }
 0x445   :  { %v620_v39 = vpop.xlane.xlu2 %619  ;;  %550 = vmatpush.msra.mxu3 %v2996_v38 }
 0x446   :  { %v623_v40 = vsub.f32 %v3528_v58, %v620_v39  ;;  %2998 = vrot.lane.b32.xlu2 %v3467_v0, %s4483_s11 }
 0x448   :  { %v3565_v42 = vpop.eup %3068  ;;  %v628_v43 = vmul.f32 1.442695, %v623_v40 }
 0x449   :  { %v301_v45 = vsel %vm279_vm10, %v3565_v42, 0.0 }
 0x44a   :  { %3070 = vpow2.f32 %v628_v43  ;;  %302 = vadd.xlane.f32.xlu0 %v301_v45 }
 0x44b   :  { %3072 = vpow2.f32 %v462_v52 }
 0x44e   :  { %3003 = vrot.lane.b32.xlu2 %v3467_v0, %s4481_s0  ;;  %v296_v0 = vmul.f32 1.442695, %v291_v54 }
 0x450   :  { %v3571_v46 = vpop.eup %3070  ;;  %3074 = vpow2.f32 %v296_v0 }
 0x451   :  { %v636_v47 = vsel %vm279_vm10, %v3571_v46, 0.0  ;;  %v3581_v57 = vpop.eup %3072 }
 0x452   :  { %637 = vadd.xlane.f32.xlu1 %v636_v47  ;;  %v470_v41 = vsel %vm279_vm10, %v3581_v57, 0.0 }
 0x456   :  { %v3587_v1 = vpop.eup %3074 }
 0x45e   :  { %518 = vrot.lane.b32.xlu0 %v3441_v59, %s4487_s6  ;;  %s4533_s6 = sld [smem:[#allocation12_spill]] }
 0x464   :  { %v780_v49 = vpop.xlane.xlu1 %779 }
 0x465   :  { %v787_v58 = vsub.f32 %v3534_v62, %v780_v49  ;;  %v304_v62 = vsel %vm279_vm10, %v3587_v1, 0.0 }
 0x467   :  { %v790_v61 = vmul.f32 1.442695, %v787_v58 }
 0x469   :  { %3076 = vpow2.f32 %v790_v61 }
 0x46a   :  { %3078 = vpow2.f32 %v626_v63 }
 0x46b   :  { %684 = vrot.lane.b32.xlu1 %v3441_v59, %s4483_s11  ;;  %s4544_s11 = smov 104  }
 0x46c   :  { %v783_v55 = vpop.xlane.xlu1 %782 }
 0x46d   :  { %v788_v44 = vsub.f32 %v3538_v2, %v783_v55 }
 0x46f   :  { %v792_v51 = vmul.f32 1.442695, %v788_v44  ;;  %v3593_v7 = vpop.eup %3076 }
 0x470   :  { %v3595_v8 = vpop.eup %3078  ;;  %v796_v9 = vsel %vm279_vm10, %v3593_v7, 0.0 }
 0x471   :  { %3080 = vpow2.f32 %v792_v51  ;;  %v633_v2 = vsel %vm279_vm10, %v3595_v8, 0.0 }
 0x474   :  { %v786_v3 = vpop.xlane.xlu1 %785 }
 0x475   :  { %v789_v4 = vsub.f32 %v3542_v5, %v786_v3 }
 0x477   :  { %471 = vadd.xlane.f32.xlu2 %v470_v41  ;;  %v794_v6 = vmul.f32 1.442695, %v789_v4  ;;  %v3601_v5 = vpop.eup %3080 }
 0x478   :  { %v799_v11 = vsel %vm279_vm10, %v3601_v5, 0.0 }
 0x479   :  { %3082 = vpow2.f32 %v794_v6 }
 0x47f   :  { %305 = vadd.xlane.f32.xlu2 %v304_v62  ;;  %v3603_v10 = vpop.eup %3082 }
 0x480   :  { %v802_v12 = vsel %vm279_vm10, %v3603_v10, 0.0 }
 0x487   :  { %797 = vadd.xlane.f32.xlu2 %v796_v9 }
 0x488   :  { %634 = vadd.xlane.f32.xlu0 %v633_v2 }
 0x48f   :  { %800 = vadd.xlane.f32.xlu2 %v799_v11 }
 0x490   :  { %803 = vadd.xlane.f32.xlu0 %v802_v12 }
 0x495   :  { %v3609_v14 = vpop.xlane.xlu2 %465 }
 0x499   :  { %v300_v15 = vpop.xlane.xlu0 %299 }
 0x49a   :  { %3084 = vrcp.f32 %v300_v15  ;;  %v318_v22 = vand.u32 2147483648, %v300_v15  ;;  %v316_v24 = vand.u32 2147483647, %v300_v15  ;;  %vm312_vm12 = vweird.f32 %v300_v15 }
 0x49c   :  { %v319_v26 = vor.u32 1.1754944e-38, %v318_v22  ;;  %vm317_vm14 = vcmp.eq.f32.partialorder %v316_v24, 8.507059e+37 }
 0x4a0   :  { %v3085_v16 = vpop.eup %3084 }
 0x4a1   :  { %v308_v18 = vmul.f32 %v3085_v16, %v300_v15  ;;  %v3611_v19 = vpop.xlane.xlu2 %468  ;;  %vm313_vm11 = vweird.f32 %v3085_v16 }
 0x4a2   :  { %vm314_vm13 = vmor %vm312_vm12, %vm313_vm11 }
 0x4a3   :  { %v309_v21 = vsub.f32 1.0, %v308_v18 }
 0x4a5   :  { %v310_v23 = vmul.f32 %v3085_v16, %v309_v21 }
 0x4a7   :  { %v311_v25 = vadd.f32 %v3085_v16, %v310_v23  ;;  %850 = vrot.lane.b32.xlu2 %v3441_v59, %s4481_s0  ;;  %s4499_s0 = smov 8  }
 0x4a9   :  { %v2999_v27 = vpop.permute.xlu2 %2998  ;;  %v315_v30 = vsel %vm314_vm13, %v3085_v16, %v311_v25 }
 0x4aa   :  { %v3000_v31 = vunpack.i.l.bf16 %v2999_v27  ;;  %v320_v33 = vsel %vm317_vm14, %v319_v26, %v315_v30  ;;  %v3001_v35 = vunpack.i.h.bf16 %v2999_v27 }
 0x4ab   :  { %v321_v34 = vmul.f32 %v3550_v17, %v320_v33 }
 0x4ac   :  { %715 = vmatpush.msrb.mxu2 %v3000_v31 }
 0x4ad   :  { %2818 = vmatmul.msk.f32.vlgmr.msrb.gmra.mxu3 %vm279_vm10, %v321_v34  ;;  %v632_v36 = vpop.xlane.xlu1 %631 }
 0x4ae   :  { %716 = vmatpush.msrb.mxu2 %v3001_v35  ;;  %3086 = vrcp.f32 %v632_v36  ;;  %v650_v44 = vand.u32 2147483648, %v632_v36  ;;  %vm644_vm5 = vweird.f32 %v632_v36  ;;  %v648_v4 = vand.u32 2147483647, %v632_v36 }
 0x4b0   :  { %v651_v6 = vor.u32 1.1754944e-38, %v650_v44  ;;  %vm649_vm7 = vcmp.eq.f32.partialorder %v648_v4, 8.507059e+37 }
 0x4b1   :  { %v3004_v0 = vpop.permute.xlu2 %3003 }
 0x4b2   :  { %v3005_v61 = vunpack.i.l.bf16 %v3004_v0  ;;  %v3006_v3 = vunpack.i.h.bf16 %v3004_v0 }
 0x4b4   :  { %v3087_v38 = vpop.eup %3086 }
 0x4b5   :  { %v640_v40 = vmul.f32 %v3087_v38, %v632_v36  ;;  %vm645_vm4 = vweird.f32 %v3087_v38 }
 0x4b6   :  { %vm646_vm6 = vmor %vm644_vm5, %vm645_vm4 }
 0x4b7   :  { %v641_v49 = vsub.f32 1.0, %v640_v40 }
 0x4b9   :  { %v642_v58 = vmul.f32 %v3087_v38, %v641_v49 }
 0x4bb   :  { %v643_v63 = vadd.f32 %v3087_v38, %v642_v58 }
 0x4bd   :  { %v303_v37 = vpop.xlane.xlu0 %302  ;;  %v647_v51 = vsel %vm646_vm6, %v3087_v38, %v643_v63 }
 0x4be   :  { %3088 = vrcp.f32 %v303_v37  ;;  %v333_v45 = vand.u32 2147483648, %v303_v37  ;;  %v331_v48 = vand.u32 2147483647, %v303_v37  ;;  %vm327_vm1 = vweird.f32 %v303_v37 }
 0x4bf   :  { %3090 = vrcp.f32 %v3609_v14 }
 0x4c0   :  { %v334_v52 = vor.u32 1.1754944e-38, %v333_v45  ;;  %vm332_vm3 = vcmp.eq.f32.partialorder %v331_v48, 8.507059e+37  ;;  %v484_v48 = vand.u32 2147483648, %v3609_v14 }
 0x4c2   :  { %v485_v44 = vor.u32 1.1754944e-38, %v484_v48 }
 0x4c4   :  { %v3089_v59 = vpop.eup %3088 }
 0x4c5   :  { %v323_v39 = vmul.f32 %v3089_v59, %v303_v37  ;;  %vm328_vm15 = vweird.f32 %v3089_v59  ;;  %v3619_v62 = vpop.xlane.xlu1 %637  ;;  %v3091_v15 = vpop.eup %3090 }
 0x4c6   :  { %vm329_vm2 = vmor %vm327_vm1, %vm328_vm15  ;;  %v474_v16 = vmul.f32 %v3091_v15, %v3609_v14  ;;  %vm479_vm14 = vweird.f32 %v3091_v15  ;;  %vm478_vm15 = vweird.f32 %v3609_v14 }
 0x4c7   :  { %v324_v43 = vsub.f32 1.0, %v323_v39 }
 0x4c8   :  { %v475_v21 = vsub.f32 1.0, %v474_v16 }
 0x4c9   :  { %v325_v47 = vmul.f32 %v3089_v59, %v324_v43 }
 0x4ca   :  { %v476_v27 = vmul.f32 %v3091_v15, %v475_v21 }
 0x4cb   :  { %v326_v17 = vadd.f32 %v3089_v59, %v325_v47 }
 0x4cd   :  { %v330_v54 = vsel %vm329_vm2, %v3089_v59, %v326_v17  ;;  %v477_v59 = vadd.f32 %v3091_v15, %v476_v27  ;;  %vm3652_vm2 = vmor %vm478_vm15, %vm479_vm14  ;;  %vm493_vm14 = vweird.f32 %v3611_v19 }
 0x4ce   :  { %v335_v55 = vsel %vm332_vm3, %v334_v52, %v330_v54  ;;  %v482_v54 = vand.u32 2147483647, %v3609_v14 }
 0x4cf   :  { %v336_v60 = vmul.f32 %v3565_v42, %v335_v55  ;;  %v652_v42 = vsel %vm649_vm7, %v651_v6, %v647_v51  ;;  %v481_v58 = vsel %vm3652_vm2, %v3091_v15, %v477_v59 }
 0x4d0   :  { %v519_v41 = vpop.permute.xlu0 %518  ;;  %v653_v2 = vmul.f32 %v3558_v29, %v652_v42  ;;  %vm483_vm4 = vcmp.eq.f32.partialorder %v482_v54, 8.507059e+37 }
 0x4d1   :  { %2819 = vmatmul.msk.f32.gmra.mxu3 %vm279_vm10, %v336_v60 }
 0x4d2   :  { %551 = vmatpush.msra.mxu3 %v519_v41 }
 0x4d4   :  { %881 = vmatpush.msrb.mxu3 %v3005_v61 }
 0x4d6   :  { %882 = vmatpush.msrb.mxu3 %v3006_v3 }
 0x4dd   :  { %v685_v9 = vpop.permute.xlu1 %684 }
 0x4de   :  { %717 = vmatpush.msrb.mxu2 %v685_v9  ;;  %v486_v9 = vsel %vm483_vm4, %v485_v44, %v481_v58 }
 0x4df   :  { %2836 = vmatmul.msk.f32.vlgmr.msrb.gmra.mxu2 %vm279_vm10, %v653_v2  ;;  %v487_v27 = vmul.f32 %v3546_v13, %v486_v9 }
 0x4ea   :  { %v3623_v11 = vpop.xlane.xlu2 %471 }
 0x4eb   :  { %v514_v59 = vand.u32 2147483648, %v3623_v11 }
 0x4f2   :  { %v306_v12 = vpop.xlane.xlu2 %305 }
 0x4f3   :  { %3092 = vrcp.f32 %v306_v12  ;;  %v348_v33 = vand.u32 2147483648, %v306_v12  ;;  %vm342_vm12 = vweird.f32 %v306_v12  ;;  %v346_v36 = vand.u32 2147483647, %v306_v12 }
 0x4f4   :  { %3094 = vrcp.f32 %v3619_v62 }
 0x4f5   :  { %3096 = vrcp.f32 %v3611_v19  ;;  %v349_v45 = vor.u32 1.1754944e-38, %v348_v33  ;;  %vm347_vm1 = vcmp.eq.f32.partialorder %v346_v36, 8.507059e+37 }
 0x4f9   :  { %v3093_v18 = vpop.eup %3092 }
 0x4fa   :  { %v338_v22 = vmul.f32 %v3093_v18, %v306_v12  ;;  %v3629_v29 = vpop.xlane.xlu2 %797  ;;  %v3631_v23 = vpop.eup %3094  ;;  %vm343_vm11 = vweird.f32 %v3093_v18  ;;  %v680_v12 = vand.u32 2147483648, %v3619_v62 }
 0x4fb   :  { %v635_v24 = vpop.xlane.xlu0 %634  ;;  %v3633_v26 = vpop.eup %3096  ;;  %v670_v30 = vmul.f32 %v3631_v23, %v3619_v62  ;;  %vm3640_vm13 = vmor %vm342_vm12, %vm343_vm11  ;;  %vm675_vm12 = vweird.f32 %v3631_v23 }
 0x4fc   :  { %v339_v25 = vsub.f32 1.0, %v338_v22  ;;  %3098 = vrcp.f32 %v635_v24  ;;  %v489_v34 = vmul.f32 %v3633_v26, %v3611_v19  ;;  %v665_v41 = vand.u32 2147483648, %v635_v24 }
 0x4fd   :  { %3100 = vrcp.f32 %v3623_v11  ;;  %v671_v39 = vsub.f32 1.0, %v670_v30  ;;  %v663_v3 = vand.u32 2147483647, %v635_v24  ;;  %vm659_vm5 = vweird.f32 %v635_v24 }
 0x4fe   :  { %v340_v31 = vmul.f32 %v3093_v18, %v339_v25  ;;  %v490_v49 = vsub.f32 1.0, %v489_v34  ;;  %3102 = vrcp.f32 %v3629_v29  ;;  %v666_v6 = vor.u32 1.1754944e-38, %v665_v41 }
 0x4ff   :  { %v672_v60 = vmul.f32 %v3631_v23, %v671_v39  ;;  %vm494_vm7 = vweird.f32 %v3633_v26  ;;  %vm664_vm11 = vcmp.eq.f32.partialorder %v663_v3, 8.507059e+37  ;;  %v678_v25 = vand.u32 2147483647, %v3619_v62 }
 0x500   :  { %v341_v35 = vadd.f32 %v3093_v18, %v340_v31  ;;  %v491_v14 = vmul.f32 %v3633_v26, %v490_v49  ;;  %v497_v30 = vand.u32 2147483647, %v3611_v19  ;;  %v681_v31 = vor.u32 1.1754944e-38, %v680_v12 }
 0x501   :  { %v673_v2 = vadd.f32 %v3631_v23, %v672_v60  ;;  %vm679_vm2 = vcmp.eq.f32.partialorder %v678_v25, 8.507059e+37  ;;  %v515_v49 = vor.u32 1.1754944e-38, %v514_v59 }
 0x502   :  { %v3099_v38 = vpop.eup %3098  ;;  %v3644_v40 = vpop.xlane.xlu2 %800  ;;  %v345_v43 = vsel %vm3640_vm13, %v3093_v18, %v341_v35  ;;  %v492_v18 = vadd.f32 %v3633_v26, %v491_v14  ;;  %vm674_vm13 = vweird.f32 %v3619_v62 }
 0x503   :  { %v655_v47 = vmul.f32 %v3099_v38, %v635_v24  ;;  %v3650_v17 = vpop.eup %3100  ;;  %v350_v55 = vsel %vm347_vm1, %v349_v45, %v345_v43  ;;  %vm660_vm3 = vweird.f32 %v3099_v38  ;;  %v499_v24 = vand.u32 2147483648, %v3611_v19  ;;  %vm676_vm15 = vmor %vm674_vm13, %vm675_vm12  ;;  %v804_v37 = vpop.xlane.xlu0 %803 }
 0x504   :  { %v351_v61 = vmul.f32 %v3587_v1, %v350_v55  ;;  %v504_v4 = vmul.f32 %v3650_v17, %v3623_v11  ;;  %vm661_vm6 = vmor %vm659_vm5, %vm660_vm3  ;;  %v3103_v21 = vpop.eup %3102  ;;  %3104 = vrcp.f32 %v3644_v40  ;;  %vm498_vm3 = vcmp.eq.f32.partialorder %v497_v30, 8.507059e+37 }
 0x505   :  { %v656_v0 = vsub.f32 1.0, %v655_v47  ;;  %vm495_vm1 = vmor %vm493_vm14, %vm494_vm7  ;;  %v806_v62 = vmul.f32 %v3103_v21, %v3629_v29  ;;  %v500_v19 = vor.u32 1.1754944e-38, %v499_v24  ;;  %vm509_vm4 = vweird.f32 %v3650_v17 }
 0x506   :  { %2820 = vmatmul.msk.f32.gmra.mxu3 %vm279_vm10, %v351_v61  ;;  %v505_v15 = vsub.f32 1.0, %v504_v4  ;;  %v496_v13 = vsel %vm495_vm1, %v3633_v26, %v492_v18  ;;  %vm508_vm5 = vweird.f32 %v3623_v11  ;;  %v512_v43 = vand.u32 2147483647, %v3623_v11 }
 0x507   :  { %v657_v63 = vmul.f32 %v3099_v38, %v656_v0  ;;  %v501_v35 = vsel %vm498_vm3, %v500_v19, %v496_v13  ;;  %v807_v36 = vsub.f32 1.0, %v806_v62  ;;  %3106 = vrcp.f32 %v804_v37  ;;  %v940_v13 = vld [vmem:[%s4533_s6 + $0x8] sm:$0xff]  ;;  %v939_v19 = vld [vmem:[%s4533_s6] sm:$0xff] }
 0x508   :  { %v506_v33 = vmul.f32 %v3650_v17, %v505_v15  ;;  %v502_v26 = vmul.f32 %v3554_v20, %v501_v35  ;;  %vm513_vm7 = vcmp.eq.f32.partialorder %v512_v43, 8.507059e+37  ;;  %v816_v11 = vand.u32 2147483648, %v3629_v29 }
 0x509   :  { %v658_v51 = vadd.f32 %v3099_v38, %v657_v63  ;;  %v808_v45 = vmul.f32 %v3103_v21, %v807_v36  ;;  %vm810_vm12 = vweird.f32 %v3629_v29  ;;  %v814_v0 = vand.u32 2147483647, %v3629_v29 }
 0x50a   :  { %v851_v42 = vpop.permute.xlu2 %850  ;;  %v831_v44 = vand.u32 2147483648, %v3644_v40  ;;  %vm825_vm1 = vweird.f32 %v3644_v40  ;;  %v846_v9 = vand.u32 2147483648, %v804_v37 }
 0x50b   :  { %883 = vmatpush.msrb.mxu3 %v851_v42  ;;  %v662_v1 = vsel %vm661_vm6, %v3099_v38, %v658_v51  ;;  %v507_v38 = vadd.f32 %v3650_v17, %v506_v33  ;;  %vm510_vm6 = vmor %vm508_vm5, %vm509_vm4  ;;  %v809_v52 = vadd.f32 %v3103_v21, %v808_v45  ;;  %vm815_vm14 = vcmp.eq.f32.partialorder %v814_v0, 8.507059e+37 }
 0x50c   :  { %v667_v16 = vsel %vm664_vm11, %v666_v6, %v662_v1  ;;  %vm811_vm11 = vweird.f32 %v3103_v21  ;;  %v832_v51 = vor.u32 1.1754944e-38, %v831_v44  ;;  %vm840_vm5 = vweird.f32 %v804_v37 }
 0x50d   :  { %v668_v22 = vmul.f32 %v3595_v8, %v667_v16  ;;  %v677_v8 = vsel %vm676_vm15, %v3631_v23, %v673_v2  ;;  %v3105_v23 = vpop.eup %3104  ;;  %v511_v48 = vsel %vm510_vm6, %v3650_v17, %v507_v38  ;;  %vm812_vm13 = vmor %vm810_vm12, %vm811_vm11  ;;  %v817_v17 = vor.u32 1.1754944e-38, %v816_v11  ;;  %v3036_v11 = vld [vmem:[%s4534_s5] ss:$0 sm:$0xff] }
 0x50e   :  { %2827 = vmatmul.msk.f32.vlgmr.msra.gmra.mxu3 %vm279_vm10, %v487_v27  ;;  %v682_v34 = vsel %vm679_vm2, %v681_v31, %v677_v8  ;;  %v821_v47 = vmul.f32 %v3105_v23, %v3644_v40  ;;  %v3107_v20 = vpop.eup %3106  ;;  %v813_v58 = vsel %vm812_vm13, %v3103_v21, %v809_v52  ;;  %vm826_vm15 = vweird.f32 %v3105_v23  ;;  %v941_v27 = vld [vmem:[%s4533_s6 + $0x10] sm:$0xff] }
 0x50f   :  { %2837 = vmatmul.msk.f32.gmra.mxu2 %vm279_vm10, %v668_v22  ;;  %v683_v39 = vmul.f32 %v3571_v46, %v682_v34  ;;  %v516_v46 = vsel %vm513_vm7, %v515_v49, %v511_v48  ;;  %v836_v41 = vmul.f32 %v3107_v20, %v804_v37  ;;  %v818_v61 = vsel %vm815_vm14, %v817_v17, %v813_v58  ;;  %vm827_vm2 = vmor %vm825_vm1, %vm826_vm15 }
 0x510   :  { %v822_v54 = vsub.f32 1.0, %v821_v47  ;;  %v517_v55 = vmul.f32 %v3581_v57, %v516_v46  ;;  %v819_v29 = vmul.f32 %v3593_v7, %v818_v61  ;;  %v829_v57 = vand.u32 2147483647, %v3644_v40 }
 0x511   :  { %v837_v63 = vsub.f32 1.0, %v836_v41  ;;  %vm841_vm4 = vweird.f32 %v3107_v20  ;;  %v844_v2 = vand.u32 2147483647, %v804_v37  ;;  %v847_v40 = vor.u32 1.1754944e-38, %v846_v9 }
 0x512   :  { %v823_v60 = vmul.f32 %v3105_v23, %v822_v54  ;;  %vm830_vm3 = vcmp.eq.f32.partialorder %v829_v57, 8.507059e+37  ;;  %vm842_vm6 = vmor %vm840_vm5, %vm841_vm4 }
 0x513   :  { %v838_v4 = vmul.f32 %v3107_v20, %v837_v63  ;;  %vm845_vm7 = vcmp.eq.f32.partialorder %v844_v2, 8.507059e+37 }
 0x514   :  { %v824_v3 = vadd.f32 %v3105_v23, %v823_v60 }
 0x515   :  { %v839_v42 = vadd.f32 %v3107_v20, %v838_v4  ;;  %v3240_v4 = vmov 32.0  }
 0x516   :  { %2828 = vmatmul.msk.f32.gmra.mxu3 %vm279_vm10, %v502_v26  ;;  %v828_v14 = vsel %vm827_vm2, %v3105_v23, %v824_v3  ;;  %3108 = vrcp.f32 %v3240_v4 }
 0x517   :  { %2838 = vmatmul.msk.f32.gmra.mxu2 %vm279_vm10, %v683_v39  ;;  %v833_v6 = vsel %vm830_vm3, %v832_v51, %v828_v14  ;;  %v843_v7 = vsel %vm842_vm6, %v3107_v20, %v839_v42  ;;  %vm1130_vm6 = vcmask 523264  }
 0x518   :  { %v834_v1 = vmul.f32 %v3601_v5, %v833_v6  ;;  %v848_v12 = vsel %vm845_vm7, %v847_v40, %v843_v7 }
 0x519   :  { %v849_v15 = vmul.f32 %v3603_v10, %v848_v12  ;;  %v942_v10 = vld [vmem:[%s4533_s6 + $0x18] sm:$0xff] }
 0x51a   :  { %968 = vmatpush.msra.mxu1 %v942_v10 }
 0x51c   :  { %969 = vmatpush.msra.mxu1 %v941_v27  ;;  %v3109_v14 = vpop.eup %3108 }
 0x51d   :  { %v997_v51 = vmul.f32 32.0, %v3109_v14  ;;  %vm1001_vm11 = vweird.f32 %v3109_v14 }
 0x51e   :  { %2829 = vmatmul.msk.f32.gmra.mxu3 %vm279_vm10, %v517_v55  ;;  %970 = vmatpush.msra.mxu1 %v940_v13 }
 0x51f   :  { %v998_v6 = vsub.f32 1.0, %v997_v51 }
 0x520   :  { %971 = vmatpush.msra.mxu1 %v939_v19 }
 0x521   :  { %v999_v42 = vmul.f32 %v3109_v14, %v998_v6 }
 0x523   :  { %v1000_v9 = vadd.f32 %v3109_v14, %v999_v42 }
 0x526   :  { %2845 = vmatmul.msk.f32.vlgmr.msrb.gmra.mxu3 %vm279_vm10, %v819_v29 }
 0x52e   :  { %2846 = vmatmul.msk.f32.gmra.mxu3 %vm279_vm10, %v834_v1  ;;  %v3754_v1 = vsel %vm1001_vm11, %v3109_v14, %v1000_v9 }
 0x530   :  { %v387_v18 = vpop.f32.mrf.mxu3 }
 0x536   :  { %2847 = vmatmul.msk.f32.gmra.mxu3 %vm279_vm10, %v849_v15 }
 0x554   :  { %v390_v21 = vpop.f32.mrf.mxu3 }
 0x562   :  { %v719_v16 = vpop.f32.mrf.mxu2 }
 0x563   :  { %909 = vrot.lane.b32.xlu2 %v719_v16, %s4497_s10 }
 0x589   :  { %v393_v22 = vpop.f32.mrf.mxu3 }
 0x591   :  { %v553_v5 = vpop.f32.mrf.mxu3 }
 0x592   :  { %897 = vrot.lane.b32.xlu0 %v553_v5, %s4499_s0  ;;  %v722_v24 = vpop.f32.mrf.mxu2 }
 0x599   :  { %v556_v25 = vpop.f32.mrf.mxu3 }
 0x59a   :  { %899 = vrot.lane.b32.xlu1 %v556_v25, %s4499_s0  ;;  %911 = vrot.lane.b32.xlu0 %v722_v24, %s4497_s10  ;;  %v725_v30 = vpop.f32.mrf.mxu2 }
 0x5a1   :  { %v559_v8 = vpop.f32.mrf.mxu3 }
 0x5a2   :  { %901 = vrot.lane.b32.xlu1 %v559_v8, %s4499_s0  ;;  %913 = vrot.lane.b32.xlu0 %v725_v30, %s4497_s10  ;;  %v1075_v8 = vld [vmem:[%s4456_s13 + $0x18] sm:$0xff]  ;;  %s4535_s10 = sld [smem:[#allocation14_spill]]  ;;  %s4539_s0 = smov 88  }
 0x5a3   :  { %1101 = vmatpush.msra.mxu2 %v1075_v8 }
 0x5a9   :  { %v885_v31 = vpop.f32.mrf.mxu3 }
 0x5aa   :  { %921 = vrot.lane.b32.xlu2 %v885_v31, %s4495_s8  ;;  %v1074_v31 = vld [vmem:[%s4456_s13 + $0x10] sm:$0xff] }
 0x5ab   :  { %1102 = vmatpush.msra.mxu2 %v1074_v31 }
 0x5b1   :  { %v888_v33 = vpop.f32.mrf.mxu3 }
 0x5b2   :  { %923 = vrot.lane.b32.xlu2 %v888_v33, %s4495_s8  ;;  %v1073_v33 = vld [vmem:[%s4456_s13 + $0x8] sm:$0xff] }
 0x5b3   :  { %1103 = vmatpush.msra.mxu2 %v1073_v33 }
 0x5b9   :  { %v891_v62 = vpop.f32.mrf.mxu3 }
 0x5ba   :  { %925 = vrot.lane.b32.xlu2 %v891_v62, %s4495_s8  ;;  %v1072_v62 = vld [vmem:[%s4456_s13] sm:$0xff]  ;;  %s4538_s8 = smov 96  }
 0x5bb   :  { %1104 = vmatpush.msra.mxu2 %v1072_v62 }
 0x5bd   :  { %v910_v34 = vpop.permute.xlu2 %909 }
 0x604   :  { %v898_v35 = vpop.permute.xlu0 %897  ;;  %v922_v36 = vpop.permute.xlu2 %921 }
 0x605   :  { %v930_v37 = vsel %vm149_vm8, %v387_v18, %v898_v35 }
 0x606   :  { %v933_v38 = vsel %vm88_vm0, %v930_v37, %v910_v34 }
 0x607   :  { %v936_v23 = vsel %vm279_vm10, %v933_v38, %v922_v36 }
 0x608   :  { %2848 = vmatmul.msk.f32.vlgmr.msra.gmra.mxu1 %vm196_vm9, %v936_v23 }
 0x60c   :  { %v912_v59 = vpop.permute.xlu0 %911  ;;  %v924_v39 = vpop.permute.xlu2 %923 }
 0x60d   :  { %v900_v26 = vpop.permute.xlu1 %899 }
 0x60e   :  { %v931_v43 = vsel %vm149_vm8, %v390_v21, %v900_v26  ;;  %v1124_v26 = vld [vmem:[%s4458_s15 + $0x30] sm:$0xff] }
 0x60f   :  { %v934_v45 = vsel %vm88_vm0, %v931_v43, %v912_v59 }
 0x610   :  { %v937_v47 = vsel %vm279_vm10, %v934_v45, %v924_v39  ;;  %v1125_v39 = vld [vmem:[%s4458_s15 + $0x38] sm:$0xff]  ;;  %v1123_v45 = vld [vmem:[%s4458_s15 + $0x28] sm:$0xff] }
 0x611   :  { %2849 = vmatmul.msk.f32.gmra.mxu1 %vm196_vm9, %v937_v47  ;;  %1148 = vmatpush.msrb.mxu0 %v1125_v39 }
 0x613   :  { %1149 = vmatpush.msrb.mxu0 %v1124_v26 }
 0x614   :  { %v914_v48 = vpop.permute.xlu0 %913  ;;  %v926_v52 = vpop.permute.xlu2 %925 }
 0x615   :  { %v902_v49 = vpop.permute.xlu1 %901  ;;  %1150 = vmatpush.msrb.mxu0 %v1123_v45 }
 0x616   :  { %v932_v46 = vsel %vm149_vm8, %v393_v22, %v902_v49 }
 0x617   :  { %v935_v54 = vsel %vm88_vm0, %v932_v46, %v914_v48  ;;  %v1122_v46 = vld [vmem:[%s4458_s15 + $0x20] sm:$0xff] }
 0x618   :  { %v938_v20 = vsel %vm279_vm10, %v935_v54, %v926_v52  ;;  %1151 = vmatpush.msrb.mxu0 %v1122_v46  ;;  %v1250_v46 = vld [vmem:[%s4460_s17 + $0x8] sm:$0xff] }
 0x619   :  { %2850 = vmatmul.msk.f32.gmra.mxu1 %vm196_vm9, %v938_v20 }
 0x685   :  { %v973_v0 = vpop.f32.mrf.mxu1 }
 0x686   :  { %v974_v55 = vadd.f32 %v3036_v11, %v973_v0  ;;  %v3037_v0 = vld [vmem:[%s4535_s10] ss:$0 sm:$0xff] }
 0x688   :  { %v982_v58 = vadd.f32 %v974_v55, %v3420_v50 }
 0x68a   :  { %v987_v60 = vsel %vm196_vm9, %v982_v58, 0.0 }
 0x68b   :  { %988 = vadd.xlane.f32.xlu1 %v987_v60 }
 0x68e   :  { %v976_v41 = vpop.f32.mrf.mxu1 }
 0x68f   :  { %v977_v17 = vadd.f32 %v3036_v11, %v976_v41 }
 0x691   :  { %v983_v61 = vadd.f32 %v977_v17, %v3427_v53  ;;  %v3038_v17 = vld [vmem:[%s4536_s9] ss:$0 sm:$0xff] }
 0x693   :  { %v990_v63 = vsel %vm196_vm9, %v983_v61, 0.0 }
 0x694   :  { %991 = vadd.xlane.f32.xlu0 %v990_v63 }
 0x696   :  { %v979_v3 = vpop.f32.mrf.mxu1 }
 0x697   :  { %v980_v44 = vadd.f32 %v3036_v11, %v979_v3  ;;  %v1121_v11 = vld [vmem:[%s4458_s15 + $0x18] sm:$0xff] }
 0x698   :  { %1152 = vmatpush.msrb.mxu0 %v1121_v11 }
 0x699   :  { %v984_v29 = vadd.f32 %v980_v44, %v3434_v56 }
 0x69b   :  { %v993_v57 = vsel %vm196_vm9, %v984_v29, 0.0 }
 0x69c   :  { %994 = vadd.xlane.f32.xlu2 %v993_v57 }
 0x6fe   :  { %v989_v2 = vpop.xlane.xlu1 %988 }
 0x6ff   :  { %v1003_v7 = vmul.f32 %v3754_v1, %v989_v2 }
 0x701   :  { %v1006_v40 = vsub.f32 %v982_v58, %v1003_v7 }
 0x703   :  { %v1009_v12 = vmul.f32 %v1006_v40, %v1006_v40 }
 0x705   :  { %v1012_v15 = vsel %vm196_vm9, %v1009_v12, 0.0 }
 0x706   :  { %1013 = vadd.xlane.f32.xlu1 %v1012_v15 }
 0x707   :  { %v992_v16 = vpop.xlane.xlu0 %991 }
 0x708   :  { %v1004_v18 = vmul.f32 %v3754_v1, %v992_v16 }
 0x70a   :  { %v3759_v21 = vsub.f32 %v983_v61, %v1004_v18 }
 0x70c   :  { %v1010_v22 = vmul.f32 %v3759_v21, %v3759_v21 }
 0x70e   :  { %v1015_v5 = vsel %vm196_vm9, %v1010_v22, 0.0  ;;  %v1119_v22 = vld [vmem:[%s4458_s15 + $0x8] sm:$0xff] }
 0x70f   :  { %1016 = vadd.xlane.f32.xlu0 %v1015_v5  ;;  %v995_v24 = vpop.xlane.xlu2 %994  ;;  %v1118_v5 = vld [vmem:[%s4458_s15] sm:$0xff] }
 0x710   :  { %v1005_v25 = vmul.f32 %v3754_v1, %v995_v24  ;;  %v3039_v24 = vld [vmem:[%s4457_s14] ss:$0 sm:$0xff] }
 0x712   :  { %v3765_v10 = vsub.f32 %v984_v29, %v1005_v25 }
 0x714   :  { %v1011_v27 = vmul.f32 %v3765_v10, %v3765_v10 }
 0x716   :  { %v1018_v30 = vsel %vm196_vm9, %v1011_v27, 0.0 }
 0x717   :  { %1019 = vadd.xlane.f32.xlu2 %v1018_v30 }
 0x779   :  { %v1014_v13 = vpop.xlane.xlu1 %1013 }
 0x77a   :  { %v1021_v19 = vmul.f32 %v1014_v13, %v3754_v1 }
 0x77c   :  { %v1024_v34 = vadd.f32 1e-05, %v1021_v19  ;;  %v3241_v19 = vmov 0  }
 0x77d   :  { %3007 = vset.pattern.permute.xlu1 %v3241_v19  ;;  %3009 = vset.pattern.permute.xlu2 %v3241_v19 }
 0x77e   :  { %3110 = vrsqrt.f32 %v1024_v34  ;;  %vm1033_vm13 = vweird.f32 %v1024_v34  ;;  %3008 = vset.pattern.permute.xlu0 %v3241_v19  ;;  %v3041_v19 = vld [vmem:[%s4537_s4] ss:$0 sm:$0xff] }
 0x782   :  { %v1017_v35 = vpop.xlane.xlu0 %1016 }
 0x783   :  { %v1022_v36 = vmul.f32 %v1017_v35, %v3754_v1 }
 0x784   :  { %v3111_v37 = vpop.eup %3110 }
 0x785   :  { %v1028_v38 = vmul.f32 %v3111_v37, %v1024_v34  ;;  %v1025_v23 = vadd.f32 1e-05, %v1022_v36  ;;  %vm1034_vm12 = vweird.f32 %v3111_v37  ;;  %v3040_v34 = vld [vmem:[%s4459_s16] ss:$0 sm:$0xff] }
 0x786   :  { %vm1035_vm14 = vmor %vm1033_vm13, %vm1034_vm12 }
 0x787   :  { %v1029_v59 = vmul.f32 %v3111_v37, %v1028_v38  ;;  %3112 = vrsqrt.f32 %v1025_v23  ;;  %vm1043_vm1 = vweird.f32 %v1025_v23 }
 0x789   :  { %v1030_v43 = vmul.f32 0.5, %v1029_v59 }
 0x78a   :  { %v1020_v47 = vpop.xlane.xlu2 %1019 }
 0x78b   :  { %v1031_v48 = vsub.f32 1.5, %v1030_v43  ;;  %v1023_v49 = vmul.f32 %v1020_v47, %v3754_v1 }
 0x78d   :  { %v3113_v52 = vpop.eup %3112  ;;  %v1032_v54 = vmul.f32 %v3111_v37, %v1031_v48  ;;  %v1026_v20 = vadd.f32 1e-05, %v1023_v49  ;;  %v1249_v49 = vld [vmem:[%s4460_s17] sm:$0xff] }
 0x78e   :  { %v1038_v55 = vmul.f32 %v3113_v52, %v1025_v23  ;;  %vm1044_vm15 = vweird.f32 %v3113_v52 }
 0x78f   :  { %v1036_v58 = vsel %vm1035_vm14, %v3111_v37, %v1032_v54  ;;  %3114 = vrsqrt.f32 %v1026_v20  ;;  %vm1045_vm2 = vmor %vm1043_vm1, %vm1044_vm15  ;;  %vm1053_vm4 = vweird.f32 %v1026_v20 }
 0x790   :  { %v1057_v60 = vmul.f32 %v1036_v58, %v1006_v40  ;;  %v1039_v41 = vmul.f32 %v3113_v52, %v1038_v55 }
 0x792   :  { %v1063_v61 = vmul.f32 %v3037_v0, %v1057_v60  ;;  %v1040_v63 = vmul.f32 0.5, %v1039_v41 }
 0x794   :  { %v1041_v3 = vsub.f32 1.5, %v1040_v63  ;;  %v1069_v44 = vadd.f32 %v3038_v17, %v1063_v61 }
 0x795   :  { %v3115_v29 = vpop.eup %3114 }
 0x796   :  { %v1042_v57 = vmul.f32 %v3113_v52, %v1041_v3  ;;  %v1048_v4 = vmul.f32 %v3115_v29, %v1026_v20  ;;  %2851 = vmatmul.msk.f32.vlgmr.msra.gmra.mxu2 %vm196_vm9, %v1069_v44  ;;  %vm1054_vm3 = vweird.f32 %v3115_v29 }
 0x797   :  { %vm1055_vm5 = vmor %vm1053_vm4, %vm1054_vm3 }
 0x798   :  { %v1046_v14 = vsel %vm1045_vm2, %v3113_v52, %v1042_v57  ;;  %v1049_v51 = vmul.f32 %v3115_v29, %v1048_v4  ;;  %v1271_v57 = vld [vmem:[%s4461_s18 + $0x8] sm:$0xff]  ;;  %v1270_v4 = vld [vmem:[%s4461_s18] sm:$0xff] }
 0x799   :  { %v1058_v6 = vmul.f32 %v1046_v14, %v3759_v21  ;;  %v1120_v21 = vld [vmem:[%s4458_s15 + $0x10] sm:$0xff] }
 0x79a   :  { %v1050_v42 = vmul.f32 0.5, %v1049_v51  ;;  %1153 = vmatpush.msrb.mxu0 %v1120_v21  ;;  %v1272_v14 = vld [vmem:[%s4461_s18 + $0x10] sm:$0xff] }
 0x79b   :  { %v1064_v9 = vmul.f32 %v3037_v0, %v1058_v6  ;;  %v1251_v51 = vld [vmem:[%s4460_s17 + $0x10] sm:$0xff] }
 0x79c   :  { %v1051_v2 = vsub.f32 1.5, %v1050_v42  ;;  %1154 = vmatpush.msrb.mxu0 %v1119_v22  ;;  %v2860_v42 = vld [vmem:[%s4525_s1 + $0x38] sm:$0xff] }
 0x79d   :  { %v1070_v7 = vadd.f32 %v3038_v17, %v1064_v9  ;;  %1325 = vmatpush.msra.mxu3 %v2860_v42  ;;  %v2859_v9 = vld [vmem:[%s4525_s1 + $0x30] sm:$0xff] }
 0x79e   :  { %v1052_v40 = vmul.f32 %v3115_v29, %v1051_v2  ;;  %1155 = vmatpush.msrb.mxu0 %v1118_v5 }
 0x79f   :  { %2852 = vmatmul.msk.f32.gmra.mxu2 %vm196_vm9, %v1070_v7  ;;  %1326 = vmatpush.msra.mxu3 %v2859_v9 }
 0x7a0   :  { %v1056_v12 = vsel %vm1055_vm5, %v3115_v29, %v1052_v40  ;;  %v2858_v40 = vld [vmem:[%s4525_s1 + $0x28] sm:$0xff] }
 0x7a1   :  { %v1059_v15 = vmul.f32 %v1056_v12, %v3765_v10  ;;  %1327 = vmatpush.msra.mxu3 %v2858_v40 }
 0x7a3   :  { %v1065_v16 = vmul.f32 %v3037_v0, %v1059_v15  ;;  %v2857_v15 = vld [vmem:[%s4525_s1 + $0x20] sm:$0xff]  ;;  %s4543_s1 = smov 112  }
 0x7a4   :  { %1328 = vmatpush.msra.mxu3 %v2857_v15 }
 0x7a5   :  { %v1071_v18 = vadd.f32 %v3038_v17, %v1065_v16 }
 0x7a7   :  { %2853 = vmatmul.msk.f32.gmra.mxu2 %vm196_vm9, %v1071_v18 }
 0x819   :  { %v1106_v25 = vpop.f32.mrf.mxu2 }
 0x81a   :  { %v1107_v10 = vadd.f32 %v3039_v24, %v1106_v25 }
 0x81c   :  { %v1115_v27 = vmax.f32 %v1107_v10, 0.0 }
 0x81e   :  { %2854 = vmatmul.msk.f32.vlgmr.msrb.gmra.mxu0 %vm1130_vm6, %v1115_v27 }
 0x822   :  { %v1109_v30 = vpop.f32.mrf.mxu2 }
 0x823   :  { %v1110_v8 = vadd.f32 %v3039_v24, %v1109_v30 }
 0x825   :  { %v1116_v31 = vmax.f32 %v1110_v8, 0.0 }
 0x827   :  { %2855 = vmatmul.msk.f32.gmra.mxu0 %vm1130_vm6, %v1116_v31 }
 0x82a   :  { %v1112_v33 = vpop.f32.mrf.mxu2 }
 0x82b   :  { %v1113_v62 = vadd.f32 %v3039_v24, %v1112_v33 }
 0x82d   :  { %v1117_v13 = vmax.f32 %v1113_v62, 0.0 }
 0x82f   :  { %2856 = vmatmul.msk.f32.gmra.mxu0 %vm1130_vm6, %v1117_v13 }
 0x89b   :  { %v1157_v35 = vpop.f32.mrf.mxu0 }
 0x89c   :  { %v1158_v36 = vadd.f32 %v3040_v34, %v1157_v35 }
 0x89e   :  { %v1166_v37 = vadd.f32 %v1158_v36, %v1069_v44  ;;  %v3042_v36 = vld [vmem:[%s4455_s12] ss:$0 sm:$0xff] }
 0x8a0   :  { %v1171_v38 = vsel %vm196_vm9, %v1166_v37, 0.0 }
 0x8a1   :  { %1172 = vadd.xlane.f32.xlu1 %v1171_v38 }
 0x8a4   :  { %v1160_v23 = vpop.f32.mrf.mxu0 }
 0x8a5   :  { %v1161_v59 = vadd.f32 %v3040_v34, %v1160_v23 }
 0x8a7   :  { %v1167_v39 = vadd.f32 %v1161_v59, %v1070_v7 }
 0x8a9   :  { %v1174_v26 = vsel %vm196_vm9, %v1167_v39, 0.0 }
 0x8aa   :  { %1175 = vadd.xlane.f32.xlu0 %v1174_v26 }
 0x8ac   :  { %v1163_v43 = vpop.f32.mrf.mxu0 }
 0x8ad   :  { %v1164_v45 = vadd.f32 %v3040_v34, %v1163_v43 }
 0x8af   :  { %v1168_v47 = vadd.f32 %v1164_v45, %v1071_v18 }
 0x8b1   :  { %v1177_v48 = vsel %vm196_vm9, %v1168_v47, 0.0 }
 0x8b2   :  { %1178 = vadd.xlane.f32.xlu2 %v1177_v48 }
 0x8ba   :  { %1254 = vperm.xlu1 %3007, %v1249_v49  }
 0x8ca   :  { %1259 = vperm.xlu2 %3009, %v1250_v46  }
 0x914   :  { %v1173_v52 = vpop.xlane.xlu1 %1172 }
 0x915   :  { %v1180_v54 = vmul.f32 %v1173_v52, %v3754_v1 }
 0x917   :  { %v1183_v20 = vsub.f32 %v1166_v37, %v1180_v54 }
 0x919   :  { %v1186_v11 = vmul.f32 %v1183_v20, %v1183_v20 }
 0x91b   :  { %v1189_v0 = vsel %vm196_vm9, %v1186_v11, 0.0 }
 0x91c   :  { %1190 = vadd.xlane.f32.xlu1 %v1189_v0 }
 0x91d   :  { %v1176_v55 = vpop.xlane.xlu0 %1175 }
 0x91e   :  { %v1181_v58 = vmul.f32 %v1176_v55, %v3754_v1 }
 0x920   :  { %v3841_v60 = vsub.f32 %v1167_v39, %v1181_v58 }
 0x922   :  { %v1187_v41 = vmul.f32 %v3841_v60, %v3841_v60 }
 0x924   :  { %v1192_v17 = vsel %vm196_vm9, %v1187_v41, 0.0 }
 0x925   :  { %v1179_v61 = vpop.xlane.xlu2 %1178  ;;  %1193 = vadd.xlane.f32.xlu0 %v1192_v17 }
 0x926   :  { %v1182_v63 = vmul.f32 %v1179_v61, %v3754_v1 }
 0x928   :  { %v3847_v3 = vsub.f32 %v1168_v47, %v1182_v63 }
 0x92a   :  { %v1188_v44 = vmul.f32 %v3847_v3, %v3847_v3 }
 0x92c   :  { %v1195_v29 = vsel %vm196_vm9, %v1188_v44, 0.0  ;;  %v1255_v6 = vpop.permute.xlu1 %1254 }
 0x92d   :  { %1196 = vadd.xlane.f32.xlu2 %v1195_v29  ;;  %v1260_v16 = vpop.permute.xlu2 %1259 }
 0x935   :  { %1280 = vperm.xlu1 %3007, %v1271_v57  }
 0x939   :  { %1275 = vperm.xlu0 %3008, %v1270_v4  }
 0x93d   :  { %1285 = vperm.xlu1 %3007, %v1272_v14  }
 0x945   :  { %1264 = vperm.xlu2 %3009, %v1251_v51  }
 0x98f   :  { %v1191_v2 = vpop.xlane.xlu1 %1190 }
 0x990   :  { %v1198_v7 = vmul.f32 %v1191_v2, %v3754_v1 }
 0x992   :  { %v1201_v12 = vadd.f32 1e-05, %v1198_v7 }
 0x994   :  { %3116 = vrsqrt.f32 %v1201_v12  ;;  %vm1210_vm11 = vweird.f32 %v1201_v12 }
 0x998   :  { %v1194_v18 = vpop.xlane.xlu0 %1193 }
 0x999   :  { %v1199_v21 = vmul.f32 %v1194_v18, %v3754_v1 }
 0x99a   :  { %v3117_v22 = vpop.eup %3116 }
 0x99b   :  { %v1205_v5 = vmul.f32 %v3117_v22, %v1201_v12  ;;  %v1202_v24 = vadd.f32 1e-05, %v1199_v21  ;;  %vm1211_vm7 = vweird.f32 %v3117_v22 }
 0x99c   :  { %vm1212_vm12 = vmor %vm1210_vm11, %vm1211_vm7 }
 0x99d   :  { %v1206_v25 = vmul.f32 %v3117_v22, %v1205_v5  ;;  %3118 = vrsqrt.f32 %v1202_v24  ;;  %vm1220_vm14 = vweird.f32 %v1202_v24 }
 0x99f   :  { %v1207_v10 = vmul.f32 0.5, %v1206_v25 }
 0x9a0   :  { %v1197_v27 = vpop.xlane.xlu2 %1196 }
 0x9a1   :  { %v1208_v30 = vsub.f32 1.5, %v1207_v10  ;;  %v1200_v8 = vmul.f32 %v1197_v27, %v3754_v1 }
 0x9a3   :  { %v3119_v31 = vpop.eup %3118  ;;  %v1209_v33 = vmul.f32 %v3117_v22, %v1208_v30  ;;  %v1203_v62 = vadd.f32 1e-05, %v1200_v8 }
 0x9a4   :  { %v1215_v13 = vmul.f32 %v3119_v31, %v1202_v24  ;;  %vm1221_vm13 = vweird.f32 %v3119_v31 }
 0x9a5   :  { %v1213_v34 = vsel %vm1212_vm12, %v3117_v22, %v1209_v33  ;;  %3120 = vrsqrt.f32 %v1203_v62  ;;  %vm1222_vm15 = vmor %vm1220_vm14, %vm1221_vm13  ;;  %vm1230_vm2 = vweird.f32 %v1203_v62 }
 0x9a6   :  { %v1216_v35 = vmul.f32 %v3119_v31, %v1215_v13  ;;  %v1234_v37 = vmul.f32 %v1213_v34, %v1183_v20 }
 0x9a7   :  { %v1281_v17 = vpop.permute.xlu1 %1280 }
 0x9a8   :  { %v1217_v38 = vmul.f32 0.5, %v1216_v35  ;;  %v1240_v23 = vmul.f32 %v3041_v19, %v1234_v37  ;;  %v1265_v4 = vpop.permute.xlu2 %1264 }
 0x9aa   :  { %v1218_v59 = vsub.f32 1.5, %v1217_v38  ;;  %v1246_v39 = vadd.f32 %v3042_v36, %v1240_v23 }
 0x9ab   :  { %v3121_v26 = vpop.eup %3120  ;;  %v1276_v43 = vpop.permute.xlu0 %1275 }
 0x9ac   :  { %v1219_v45 = vmul.f32 %v3119_v31, %v1218_v59  ;;  %v1225_v47 = vmul.f32 %v3121_v26, %v1203_v62  ;;  %v1267_v48 = vmul.f32 %v1255_v6, %v1246_v39  ;;  %vm1231_vm1 = vweird.f32 %v3121_v26 }
 0x9ad   :  { %vm1232_vm3 = vmor %vm1230_vm2, %vm1231_vm1 }
 0x9ae   :  { %v1223_v49 = vsel %vm1222_vm15, %v3119_v31, %v1219_v45  ;;  %v1226_v46 = vmul.f32 %v3121_v26, %v1225_v47  ;;  %v1288_v52 = vadd.f32 %v1276_v43, %v1267_v48 }
 0x9af   :  { %v1235_v54 = vmul.f32 %v1223_v49, %v3841_v60  ;;  %v1286_v51 = vpop.permute.xlu1 %1285 }
 0x9b0   :  { %v1227_v11 = vmul.f32 0.5, %v1226_v46  ;;  %v3887_v20 = vadd.f32 %v1288_v52, %v3420_v50  ;;  %v3194_v46 = vld [vmem:[%s4528_s29] sm:$0xff] }
 0x9b1   :  { %v1241_v0 = vmul.f32 %v3041_v19, %v1235_v54 }
 0x9b2   :  { %v1228_v55 = vsub.f32 1.5, %v1227_v11  ;;  %2862 = vmatmul.msk.f32.vlgmr.msra.gmra.mxu3 %vm196_vm9, %v3887_v20 }
 0x9b3   :  { %v1247_v58 = vadd.f32 %v3042_v36, %v1241_v0 }
 0x9b4   :  { %v1229_v41 = vmul.f32 %v3121_v26, %v1228_v55 }
 0x9b5   :  { %v1268_v61 = vmul.f32 %v1260_v16, %v1247_v58 }
 0x9b6   :  { %v1233_v63 = vsel %vm1232_vm3, %v3121_v26, %v1229_v41  ;;  %v3195_v41 = vld [vmem:[%s4528_s29 + $0x8] sm:$0xff] }
 0x9b7   :  { %v1236_v44 = vmul.f32 %v1233_v63, %v3847_v3  ;;  %v1289_v60 = vadd.f32 %v1281_v17, %v1268_v61 }
 0x9b9   :  { %v1242_v29 = vmul.f32 %v3041_v19, %v1236_v44  ;;  %v3893_v50 = vadd.f32 %v1289_v60, %v3427_v53  ;;  %v3043_v53 = vld [vmem:[%s4527_s2 + $0x1] ss:$0 sm:$0xff]  ;;  %s4541_s2 = smov 120  }
 0x9bb   :  { %v1248_v57 = vadd.f32 %v3042_v36, %v1242_v29  ;;  %2863 = vmatmul.msk.f32.gmra.mxu3 %vm196_vm9, %v3893_v50  ;;  %v3196_v29 = vld [vmem:[%s4528_s29 + $0x10] sm:$0xff]  ;;  %s4548_s29 = smov 40  }
 0x9bd   :  { %v1269_v14 = vmul.f32 %v1265_v4, %v1248_v57 }
 0x9bf   :  { %v1290_v6 = vadd.f32 %v1286_v51, %v1269_v14 }
 0x9c1   :  { %v3898_v42 = vadd.f32 %v1290_v6, %v3434_v56 }
 0x9c3   :  { %2864 = vmatmul.msk.f32.gmra.mxu3 %vm196_vm9, %v3898_v42 }
 0xa35   :  { %v1330_v3 = vpop.f32.mrf.mxu3 }
 0xa36   :  { %v3906_v40 = vadd.f32 %v3043_v53, %v1330_v3 }
 0xa3e   :  { %v1333_v9 = vpop.f32.mrf.mxu3 }
 0xa3f   :  { %v1334_v2 = vadd.f32 %v3043_v53, %v1333_v9 }
 0xa41   :  { %1344 = vrot.lane.b32.xlu0 %v1334_v2, %s4538_s8 }
 0xa46   :  { %v1336_v7 = vpop.f32.mrf.mxu3 }
 0xa47   :  { %v1337_v12 = vadd.f32 %v3043_v53, %v1336_v7 }
 0xa49   :  { %1508 = vrot.lane.b32.xlu0 %v3906_v40, %s4539_s0  ;;  %1512 = vrot.lane.b32.xlu1 %v1337_v12, %s4539_s0  ;;  %v3937_v56 = vpack.i.bf16 %v1334_v2, %v1337_v12 }
 0xa4a   :  { %1346 = vrot.lane.b32.xlu2 %v1337_v12, %s4538_s8 }
 0xa51   :  { %1678 = vrot.lane.b32.xlu0 %v1337_v12, %s4540_s28  ;;  %1342 = vrot.lane.b32.xlu1 %v3906_v40, %s4538_s8 }
 0xa52   :  { %1510 = vrot.lane.b32.xlu2 %v1334_v2, %s4539_s0  ;;  %s4551_s0 = smov 24  }
 0xa59   :  { %1676 = vrot.lane.b32.xlu0 %v1334_v2, %s4540_s28  ;;  %1504 = vrot.lane.b32.xlu1 %v1334_v2, %s4541_s2 }
 0xa5a   :  { %1502 = vrot.lane.b32.xlu2 %v3906_v40, %s4541_s2 }
 0xa61   :  { %1840 = vrot.lane.b32.xlu0 %v3906_v40, %s4542_s27  ;;  %1674 = vrot.lane.b32.xlu1 %v3906_v40, %s4540_s28  ;;  %s3242_s28 = smov [#allocation2]  }
 0xa62   :  { %1844 = vrot.lane.b32.xlu2 %v1337_v12, %s4542_s27 }
 0xa69   :  { %1670 = vrot.lane.b32.xlu0 %v1334_v2, %s4543_s1  ;;  %1506 = vrot.lane.b32.xlu1 %v1337_v12, %s4541_s2  ;;  %s4554_s2 = sld [smem:[#allocation18_spill]] }
 0xa6a   :  { %1842 = vrot.lane.b32.xlu2 %v1334_v2, %s4542_s27  ;;  %s4552_s27 = sld [smem:[#allocation7_spill]] }
 0xa71   :  { %1838 = vrot.lane.b32.xlu0 %v1337_v12, %s4544_s11  ;;  %1834 = vrot.lane.b32.xlu1 %v3906_v40, %s4544_s11 }
 0xa72   :  { %1668 = vrot.lane.b32.xlu2 %v3906_v40, %s4543_s1 }
 0xa79   :  { %1624 = vrot.lane.b32.xlu0 %v3906_v40, %s4545_s30  ;;  %1672 = vrot.lane.b32.xlu1 %v1337_v12, %s4543_s1 }
 0xa7a   :  { %1836 = vrot.lane.b32.xlu2 %v1334_v2, %s4544_s11  ;;  %s4547_s11 = smov 48  }
 0xa81   :  { %3016 = vrot.lane.b32.xlu0 %v3937_v56, %s4545_s30  ;;  %3011 = vrot.lane.b32.xlu1 %v3937_v56, %s4546_s3  ;;  %s4549_s30 = smov 8  }
 0xa82   :  { %1458 = vrot.lane.b32.xlu2 %v3906_v40, %s4546_s3 }
 0xaa4   :  { %v1347_v15 = vpop.permute.xlu2 %1346 }
 0xaa5   :  { %2865 = vmatpush.xpose.msk.msrb.mxu1 %vm149_vm8, %v1347_v15 }
 0xaac   :  { %v1511_v16 = vpop.permute.xlu2 %1510 }
 0xab3   :  { %v1345_v18 = vpop.permute.xlu0 %1344 }
 0xab4   :  { %v1503_v21 = vpop.permute.xlu2 %1502  ;;  %2866 = vmatpush.xpose.msk.msrb.mxu1 %vm149_vm8, %v1345_v18 }
 0xabb   :  { %v1509_v22 = vpop.permute.xlu0 %1508  ;;  %v1513_v5 = vpop.permute.xlu1 %1512 }
 0xabc   :  { %2874 = vmatpush.xpose.msk.msra.mxu0 %vm149_vm8, %v1513_v5  ;;  %v1845_v24 = vpop.permute.xlu2 %1844 }
 0xac0   :  { %2875 = vmatpush.xpose.msk.msra.mxu0 %vm149_vm8, %v1511_v16 }
 0xac3   :  { %v1679_v25 = vpop.permute.xlu0 %1678  ;;  %v1343_v10 = vpop.permute.xlu1 %1342 }
 0xac4   :  { %2867 = vmatpush.xpose.msk.msrb.mxu1 %vm149_vm8, %v1343_v10  ;;  %2876 = vmatpush.xpose.msk.msra.mxu0 %vm149_vm8, %v1509_v22  ;;  %v1843_v27 = vpop.permute.xlu2 %1842 }
 0xac7   :  { %2868 = vmatmul.msk.f32.vlgmr.msrb.gmra.mxu1 %vm149_vm8, %v3906_v40  ;;  %2877 = vmatmul.msk.f32.vlgmr.msra.gmra.mxu0 %vm149_vm8, %v1503_v21 }
 0xac8   :  { %2883 = vmatpush.xpose.msk.msra.mxu1 %vm149_vm8, %v1679_v25  ;;  %2892 = vmatpush.xpose.msk.msrb.mxu0 %vm149_vm8, %v1845_v24 }
 0xacb   :  { %v1677_v30 = vpop.permute.xlu0 %1676  ;;  %v1505_v8 = vpop.permute.xlu1 %1504 }
 0xacc   :  { %2893 = vmatpush.xpose.msk.msrb.mxu0 %vm149_vm8, %v1843_v27  ;;  %2884 = vmatpush.xpose.msk.msra.mxu1 %vm149_vm8, %v1677_v30  ;;  %v1669_v19 = vpop.permute.xlu2 %1668 }
 0xacf   :  { %2869 = vmatmul.msk.f32.gmra.mxu1 %vm149_vm8, %v1334_v2  ;;  %2878 = vmatmul.msk.f32.gmra.mxu0 %vm149_vm8, %v1505_v8 }
 0xad3   :  { %v1841_v31 = vpop.permute.xlu0 %1840  ;;  %v1675_v33 = vpop.permute.xlu1 %1674 }
 0xad4   :  { %2885 = vmatpush.xpose.msk.msra.mxu1 %vm149_vm8, %v1675_v33  ;;  %2894 = vmatpush.xpose.msk.msrb.mxu0 %vm149_vm8, %v1841_v31  ;;  %v1837_v36 = vpop.permute.xlu2 %1836 }
 0xad7   :  { %2870 = vmatmul.msk.f32.gmra.mxu1 %vm149_vm8, %v1337_v12 }
 0xadb   :  { %v1671_v62 = vpop.permute.xlu0 %1670  ;;  %v1507_v13 = vpop.permute.xlu1 %1506 }
 0xadc   :  { %2879 = vmatmul.msk.f32.gmra.mxu0 %vm149_vm8, %v1507_v13  ;;  %v1459_v47 = vpop.permute.xlu2 %1458 }
 0xadf   :  { %2886 = vmatmul.msk.f32.vlgmr.msra.gmra.mxu1 %vm149_vm8, %v1669_v19 }
 0xae3   :  { %v1839_v34 = vpop.permute.xlu0 %1838  ;;  %v1835_v35 = vpop.permute.xlu1 %1834 }
 0xae4   :  { %2895 = vmatmul.msk.f32.vlgmr.msrb.gmra.mxu0 %vm149_vm8, %v1835_v35 }
 0xae7   :  { %2887 = vmatmul.msk.f32.gmra.mxu1 %vm149_vm8, %v1671_v62 }
 0xaeb   :  { %v1625_v37 = vpop.permute.xlu0 %1624  ;;  %v1673_v38 = vpop.permute.xlu1 %1672 }
 0xaec   :  { %2896 = vmatmul.msk.f32.gmra.mxu0 %vm149_vm8, %v1837_v36 }
 0xaef   :  { %2888 = vmatmul.msk.f32.gmra.mxu1 %vm149_vm8, %v1673_v38 }
 0xaf3   :  { %v3017_v23 = vpop.permute.xlu0 %3016  ;;  %v3012_v59 = vpop.permute.xlu1 %3011 }
 0xaf4   :  { %v3018_v39 = vunpack.i.l.bf16 %v3017_v23  ;;  %v3013_v26 = vunpack.i.l.bf16 %v3012_v59  ;;  %2897 = vmatmul.msk.f32.gmra.mxu0 %vm149_vm8, %v1839_v34  ;;  %v3019_v43 = vunpack.i.h.bf16 %v3017_v23  ;;  %v3014_v45 = vunpack.i.h.bf16 %v3012_v59 }
 0xaf6   :  { %1489 = vmatpush.msrb.mxu2 %v3013_v26  ;;  %1655 = vmatpush.msrb.mxu3 %v3018_v39 }
 0xaf8   :  { %1490 = vmatpush.msrb.mxu2 %v3014_v45  ;;  %1656 = vmatpush.msrb.mxu3 %v3019_v43 }
 0xafa   :  { %1491 = vmatpush.msrb.mxu2 %v1459_v47  ;;  %1657 = vmatpush.msrb.mxu3 %v1625_v37 }
 0xb44   :  { %v1377_v48 = vpop.f32.mrf.mxu1  ;;  %v1543_v49 = vpop.f32.mrf.mxu0 }
 0xb45   :  { %v1378_v52 = vadd.f32 %v3194_v46, %v1377_v48  ;;  %v1544_v54 = vadd.f32 %v3194_v46, %v1543_v49 }
 0xb47   :  { %v1386_v11 = vsel %vm279_vm10, %v1378_v52, -inf  ;;  %v1552_v0 = vsel %vm279_vm10, %v1544_v54, -inf }
 0xb48   :  { %1387 = vmax.xlane.f32.xlu2 %v1386_v11  ;;  %1553 = vmax.xlane.f32.xlu1 %v1552_v0 }
 0xb4c   :  { %v1380_v55 = vpop.f32.mrf.mxu1  ;;  %v1546_v58 = vpop.f32.mrf.mxu0 }
 0xb4d   :  { %v1381_v17 = vadd.f32 %v3195_v41, %v1380_v55  ;;  %v1547_v61 = vadd.f32 %v3195_v41, %v1546_v58 }
 0xb4f   :  { %v1389_v63 = vsel %vm279_vm10, %v1381_v17, -inf  ;;  %v1555_v44 = vsel %vm279_vm10, %v1547_v61, -inf }
 0xb50   :  { %1390 = vmax.xlane.f32.xlu0 %v1389_v63  ;;  %1556 = vmax.xlane.f32.xlu2 %v1555_v44 }
 0xb54   :  { %v1383_v60 = vpop.f32.mrf.mxu1 }
 0xb55   :  { %v1384_v57 = vadd.f32 %v3196_v29, %v1383_v60 }
 0xb57   :  { %v1392_v4 = vsel %vm279_vm10, %v1384_v57, -inf }
 0xb58   :  { %1393 = vmax.xlane.f32.xlu1 %v1392_v4 }
 0xb59   :  { %v1549_v14 = vpop.f32.mrf.mxu0 }
 0xb5a   :  { %v1550_v51 = vadd.f32 %v3196_v29, %v1549_v14 }
 0xb5c   :  { %v1709_v6 = vpop.f32.mrf.mxu1  ;;  %v1558_v3 = vsel %vm279_vm10, %v1550_v51, -inf }
 0xb5d   :  { %1559 = vmax.xlane.f32.xlu2 %v1558_v3  ;;  %v4003_v10 = vadd.f32 %v3194_v46, %v1709_v6 }
 0xb5f   :  { %v1718_v27 = vsel %vm279_vm10, %v4003_v10, -inf }
 0xb61   :  { %v1875_v53 = vpop.f32.mrf.mxu0 }
 0xb62   :  { %v3985_v9 = vadd.f32 %v3194_v46, %v1875_v53 }
 0xb64   :  { %3021 = vrot.lane.b32.xlu0 %v3937_v56, %s4547_s11  ;;  %v1712_v2 = vpop.f32.mrf.mxu1  ;;  %v1884_v7 = vsel %vm279_vm10, %v3985_v9, -inf }
 0xb65   :  { %v3991_v12 = vadd.f32 %v3195_v41, %v1712_v2  ;;  %1885 = vmax.xlane.f32.xlu1 %v1884_v7 }
 0xb67   :  { %v1721_v15 = vsel %vm279_vm10, %v3991_v12, -inf }
 0xb68   :  { %1722 = vmax.xlane.f32.xlu2 %v1721_v15 }
 0xb69   :  { %v1878_v16 = vpop.f32.mrf.mxu0 }
 0xb6a   :  { %v4007_v30 = vadd.f32 %v3195_v41, %v1878_v16 }
 0xb6c   :  { %v1715_v18 = vpop.f32.mrf.mxu1  ;;  %v1887_v8 = vsel %vm279_vm10, %v4007_v30, -inf }
 0xb6d   :  { %v3995_v21 = vadd.f32 %v3196_v29, %v1715_v18 }
 0xb6f   :  { %v1724_v22 = vsel %vm279_vm10, %v3995_v21, -inf }
 0xb70   :  { %1725 = vmax.xlane.f32.xlu1 %v1724_v22 }
 0xb71   :  { %v1881_v5 = vpop.f32.mrf.mxu0 }
 0xb72   :  { %v3999_v24 = vadd.f32 %v3196_v29, %v1881_v5 }
 0xb74   :  { %v1890_v25 = vsel %vm279_vm10, %v3999_v24, -inf }
 0xb75   :  { %1891 = vmax.xlane.f32.xlu2 %v1890_v25 }
 0xb8e   :  { %1719 = vmax.xlane.f32.xlu0 %v1718_v27 }
 0xb96   :  { %1888 = vmax.xlane.f32.xlu0 %v1887_v8 }
 0xbbb   :  { %v1554_v31 = vpop.xlane.xlu1 %1553  ;;  %v1388_v33 = vpop.xlane.xlu2 %1387 }
 0xbbc   :  { %v1561_v62 = vsub.f32 %v1544_v54, %v1554_v31  ;;  %v1395_v13 = vsub.f32 %v1378_v52, %v1388_v33 }
 0xbbe   :  { %v1564_v19 = vmul.f32 1.442695, %v1561_v62  ;;  %v1398_v34 = vmul.f32 1.442695, %v1395_v13 }
 0xbc0   :  { %3122 = vpow2.f32 %v1564_v19 }
 0xbc1   :  { %3124 = vpow2.f32 %v1398_v34 }
 0xbc3   :  { %v1391_v35 = vpop.xlane.xlu0 %1390  ;;  %v1557_v36 = vpop.xlane.xlu2 %1556 }
 0xbc4   :  { %v1396_v37 = vsub.f32 %v1381_v17, %v1391_v35  ;;  %v1562_v38 = vsub.f32 %v1547_v61, %v1557_v36 }
 0xbc6   :  { %v4011_v23 = vpop.eup %3122  ;;  %v1400_v59 = vmul.f32 1.442695, %v1396_v37  ;;  %v1566_v39 = vmul.f32 1.442695, %v1562_v38 }
 0xbc7   :  { %v4013_v26 = vpop.eup %3124  ;;  %v1570_v43 = vsel %vm279_vm10, %v4011_v23, 0.0 }
 0xbc8   :  { %3126 = vpow2.f32 %v1400_v59  ;;  %1571 = vadd.xlane.f32.xlu1 %v1570_v43  ;;  %v1404_v45 = vsel %vm279_vm10, %v4013_v26, 0.0 }
 0xbc9   :  { %3128 = vpow2.f32 %v1566_v39  ;;  %1405 = vadd.xlane.f32.xlu0 %v1404_v45 }
 0xbcb   :  { %v1394_v47 = vpop.xlane.xlu1 %1393 }
 0xbcc   :  { %v1397_v48 = vsub.f32 %v1384_v57, %v1394_v47 }
 0xbce   :  { %v4019_v49 = vpop.eup %3126  ;;  %v1402_v46 = vmul.f32 1.442695, %v1397_v48 }
 0xbcf   :  { %v4021_v52 = vpop.eup %3128  ;;  %v1407_v54 = vsel %vm279_vm10, %v4019_v49, 0.0 }
 0xbd0   :  { %3130 = vpow2.f32 %v1402_v46  ;;  %1408 = vadd.xlane.f32.xlu2 %v1407_v54  ;;  %v1573_v11 = vsel %vm279_vm10, %v4021_v52, 0.0  ;;  %v1560_v0 = vpop.xlane.xlu2 %1559 }
 0xbd1   :  { %1574 = vadd.xlane.f32.xlu0 %v1573_v11  ;;  %v1563_v55 = vsub.f32 %v1550_v51, %v1560_v0 }
 0xbd3   :  { %v1568_v58 = vmul.f32 1.442695, %v1563_v55 }
 0xbd5   :  { %3132 = vpow2.f32 %v1568_v58 }
 0xbd6   :  { %v4027_v41 = vpop.eup %3130  ;;  %v3022_v17 = vpop.permute.xlu0 %3021 }
 0xbd7   :  { %v3023_v61 = vunpack.i.l.bf16 %v3022_v17  ;;  %v1410_v63 = vsel %vm279_vm10, %v4027_v41, 0.0  ;;  %v3024_v60 = vunpack.i.h.bf16 %v3022_v17 }
 0xbd8   :  { %v1886_v44 = vpop.xlane.xlu1 %1885  ;;  %1411 = vadd.xlane.f32.xlu2 %v1410_v63 }
 0xbd9   :  { %v1893_v29 = vsub.f32 %v3985_v9, %v1886_v44  ;;  %1821 = vmatpush.msra.mxu2 %v3023_v61 }
 0xbdb   :  { %v1896_v57 = vmul.f32 1.442695, %v1893_v29  ;;  %1822 = vmatpush.msra.mxu2 %v3024_v60  ;;  %v1723_v4 = vpop.xlane.xlu2 %1722  ;;  %v4032_v14 = vpop.eup %3132 }
 0xbdc   :  { %v1728_v51 = vsub.f32 %v3991_v12, %v1723_v4  ;;  %v1576_v3 = vsel %vm279_vm10, %v4032_v14, 0.0 }
 0xbdd   :  { %3134 = vpow2.f32 %v1896_v57 }
 0xbde   :  { %v1732_v6 = vmul.f32 1.442695, %v1728_v51 }
 0xbe0   :  { %3136 = vpow2.f32 %v1732_v6  ;;  %1577 = vadd.xlane.f32.xlu2 %v1576_v3 }
 0xbe3   :  { %v4037_v53 = vpop.eup %3134  ;;  %v1726_v18 = vpop.xlane.xlu1 %1725 }
 0xbe4   :  { %v1902_v9 = vsel %vm279_vm10, %v4037_v53, 0.0  ;;  %v1729_v27 = vsub.f32 %v3995_v21, %v1726_v18 }
 0xbe5   :  { %1903 = vadd.xlane.f32.xlu0 %v1902_v9 }
 0xbe6   :  { %v4041_v2 = vpop.eup %3136 }
 0xbe7   :  { %v1739_v7 = vsel %vm279_vm10, %v4041_v2, 0.0 }
 0xbe8   :  { %1740 = vadd.xlane.f32.xlu2 %v1739_v7  ;;  %v1892_v33 = vpop.xlane.xlu2 %1891 }
 0xbf9   :  { %1790 = vrot.lane.b32.xlu0 %v3906_v40, %s4547_s11 }
 0xc00   :  { %3026 = vrot.lane.b32.xlu2 %v3937_v56, %s4548_s29  ;;  %v1734_v56 = vmul.f32 1.442695, %v1729_v27 }
 0xc01   :  { %v1720_v12 = vpop.xlane.xlu0 %1719 }
 0xc02   :  { %v1727_v15 = vsub.f32 %v4003_v10, %v1720_v12  ;;  %v1895_v10 = vsub.f32 %v3999_v24, %v1892_v33 }
 0xc04   :  { %v1730_v16 = vmul.f32 1.442695, %v1727_v15  ;;  %v1900_v13 = vmul.f32 1.442695, %v1895_v10 }
 0xc06   :  { %3138 = vpow2.f32 %v1730_v16 }
 0xc09   :  { %v1889_v22 = vpop.xlane.xlu0 %1888 }
 0xc0a   :  { %v1894_v5 = vsub.f32 %v4007_v30, %v1889_v22 }
 0xc0c   :  { %v4051_v25 = vpop.eup %3138  ;;  %v1898_v8 = vmul.f32 1.442695, %v1894_v5 }
 0xc0d   :  { %v1736_v31 = vsel %vm279_vm10, %v4051_v25, 0.0 }
 0xc0e   :  { %3140 = vpow2.f32 %v1898_v8  ;;  %1737 = vadd.xlane.f32.xlu1 %v1736_v31 }
 0xc0f   :  { %3142 = vpow2.f32 %v1734_v56 }
 0xc10   :  { %3144 = vpow2.f32 %v1900_v13 }
 0xc14   :  { %v4056_v62 = vpop.eup %3140 }
 0xc15   :  { %v1905_v30 = vsel %vm279_vm10, %v4056_v62, 0.0  ;;  %v4061_v19 = vpop.eup %3142 }
 0xc16   :  { %1906 = vadd.xlane.f32.xlu1 %v1905_v30  ;;  %v1742_v21 = vsel %vm279_vm10, %v4061_v19, 0.0  ;;  %v4065_v34 = vpop.eup %3144 }
 0xc17   :  { %v1908_v35 = vsel %vm279_vm10, %v4065_v34, 0.0 }
 0xc1e   :  { %1743 = vadd.xlane.f32.xlu1 %v1742_v21 }
 0xc26   :  { %1909 = vadd.xlane.f32.xlu1 %v1908_v35 }
 0xc3b   :  { %v1572_v36 = vpop.xlane.xlu1 %1571 }
 0xc3c   :  { %3146 = vrcp.f32 %v1572_v36  ;;  %v1406_v24 = vpop.xlane.xlu0 %1405  ;;  %v1588_v48 = vand.u32 2147483647, %v1572_v36  ;;  %v1590_v46 = vand.u32 2147483648, %v1572_v36  ;;  %vm1584_vm7 = vweird.f32 %v1572_v36 }
 0xc3d   :  { %3148 = vrcp.f32 %v1406_v24  ;;  %v1422_v0 = vand.u32 2147483647, %v1406_v24  ;;  %v1424_v55 = vand.u32 2147483648, %v1406_v24  ;;  %vm1418_vm13 = vweird.f32 %v1406_v24 }
 0xc3e   :  { %vm1589_vm12 = vcmp.eq.f32.partialorder %v1588_v48, 8.507059e+37  ;;  %v1591_v61 = vor.u32 1.1754944e-38, %v1590_v46 }
 0xc3f   :  { %1956 = vrot.lane.b32.xlu1 %v3906_v40, %s4548_s29  ;;  %vm1423_vm15 = vcmp.eq.f32.partialorder %v1422_v0, 8.507059e+37  ;;  %v1425_v29 = vor.u32 1.1754944e-38, %v1424_v55 }
 0xc42   :  { %v3147_v37 = vpop.eup %3146 }
 0xc43   :  { %v3149_v38 = vpop.eup %3148  ;;  %v1580_v59 = vmul.f32 %v3147_v37, %v1572_v36  ;;  %v1409_v39 = vpop.xlane.xlu2 %1408  ;;  %vm1585_vm4 = vweird.f32 %v3147_v37 }
 0xc44   :  { %v1414_v43 = vmul.f32 %v3149_v38, %v1406_v24  ;;  %v4071_v45 = vpop.xlane.xlu0 %1574  ;;  %3150 = vrcp.f32 %v1409_v39  ;;  %vm1419_vm5 = vweird.f32 %v3149_v38  ;;  %vm1586_vm11 = vmor %vm1584_vm7, %vm1585_vm4  ;;  %v1439_v15 = vand.u32 2147483648, %v1409_v39 }
 0xc45   :  { %v1581_v47 = vsub.f32 1.0, %v1580_v59  ;;  %3152 = vrcp.f32 %v4071_v45  ;;  %vm1420_vm14 = vmor %vm1418_vm13, %vm1419_vm5  ;;  %v1437_v5 = vand.u32 2147483647, %v1409_v39  ;;  %v1605_v8 = vand.u32 2147483648, %v4071_v45 }
 0xc46   :  { %v1415_v54 = vsub.f32 1.0, %v1414_v43  ;;  %vm1433_vm2 = vweird.f32 %v1409_v39  ;;  %v1603_v56 = vand.u32 2147483647, %v4071_v45  ;;  %v1440_v10 = vor.u32 1.1754944e-38, %v1439_v15 }
 0xc47   :  { %v1582_v11 = vmul.f32 %v3147_v37, %v1581_v47  ;;  %vm1599_vm5 = vweird.f32 %v4071_v45  ;;  %vm1438_vm7 = vcmp.eq.f32.partialorder %v1437_v5, 8.507059e+37  ;;  %v1606_v21 = vor.u32 1.1754944e-38, %v1605_v8 }
 0xc48   :  { %v1416_v58 = vmul.f32 %v3149_v38, %v1415_v54 }
 0xc49   :  { %v1583_v40 = vadd.f32 %v3147_v37, %v1582_v11 }
 0xc4a   :  { %v3151_v17 = vpop.eup %3150  ;;  %v1417_v63 = vadd.f32 %v3149_v38, %v1416_v58 }
 0xc4b   :  { %v3153_v44 = vpop.eup %3152  ;;  %v1587_v60 = vsel %vm1586_vm11, %v3147_v37, %v1583_v40  ;;  %v1429_v57 = vmul.f32 %v3151_v17, %v1409_v39  ;;  %v1412_v4 = vpop.xlane.xlu2 %1411  ;;  %vm1434_vm1 = vweird.f32 %v3151_v17 }
 0xc4c   :  { %v1592_v51 = vsel %vm1589_vm12, %v1591_v61, %v1587_v60  ;;  %v1421_v6 = vsel %vm1420_vm14, %v3149_v38, %v1417_v63  ;;  %v1595_v3 = vmul.f32 %v3153_v44, %v4071_v45  ;;  %3154 = vrcp.f32 %v1412_v4  ;;  %vm1435_vm4 = vmor %vm1433_vm2, %vm1434_vm1 }
 0xc4d   :  { %v1426_v9 = vsel %vm1423_vm15, %v1425_v29, %v1421_v6  ;;  %v1430_v7 = vsub.f32 1.0, %v1429_v57  ;;  %v1593_v18 = vmul.f32 %v4011_v23, %v1592_v51  ;;  %vm1600_vm3 = vweird.f32 %v3153_v44 }
 0xc4e   :  { %v1596_v12 = vsub.f32 1.0, %v1595_v3  ;;  %v1427_v16 = vmul.f32 %v4013_v26, %v1426_v9  ;;  %vm1601_vm11 = vmor %vm1599_vm5, %vm1600_vm3  ;;  %vm1604_vm12 = vcmp.eq.f32.partialorder %v1603_v56, 8.507059e+37  ;;  %v1454_v39 = vand.u32 2147483648, %v1412_v4 }
 0xc4f   :  { %v1431_v22 = vmul.f32 %v3151_v17, %v1430_v7  ;;  %2880 = vmatmul.msk.f32.vlgmr.msrb.gmra.mxu3 %vm279_vm10, %v1593_v18  ;;  %v1452_v45 = vand.u32 2147483647, %v1412_v4  ;;  %vm1448_vm14 = vweird.f32 %v1412_v4 }
 0xc50   :  { %v1597_v27 = vmul.f32 %v3153_v44, %v1596_v12  ;;  %2871 = vmatmul.msk.f32.vlgmr.msrb.gmra.mxu2 %vm279_vm10, %v1427_v16  ;;  %v1455_v46 = vor.u32 1.1754944e-38, %v1454_v39 }
 0xc51   :  { %v1432_v31 = vadd.f32 %v3151_v17, %v1431_v22  ;;  %vm1453_vm1 = vcmp.eq.f32.partialorder %v1452_v45, 8.507059e+37 }
 0xc52   :  { %v3155_v33 = vpop.eup %3154  ;;  %v1598_v26 = vadd.f32 %v3153_v44, %v1597_v27 }
 0xc53   :  { %v1444_v23 = vmul.f32 %v3155_v33, %v1412_v4  ;;  %v1578_v30 = vpop.xlane.xlu2 %1577  ;;  %v1436_v13 = vsel %vm1435_vm4, %v3151_v17, %v1432_v31  ;;  %vm1449_vm13 = vweird.f32 %v3155_v33 }
 0xc54   :  { %3156 = vrcp.f32 %v1578_v30  ;;  %v1441_v35 = vsel %vm1438_vm7, %v1440_v10, %v1436_v13  ;;  %v1602_v37 = vsel %vm1601_vm11, %v3153_v44, %v1598_v26  ;;  %vm1450_vm15 = vmor %vm1448_vm14, %vm1449_vm13  ;;  %v1620_v58 = vand.u32 2147483648, %v1578_v30 }
 0xc55   :  { %v1445_v36 = vsub.f32 1.0, %v1444_v23  ;;  %v1442_v24 = vmul.f32 %v4019_v49, %v1441_v35  ;;  %v1607_v38 = vsel %vm1604_vm12, %v1606_v21, %v1602_v37  ;;  %v1618_v17 = vand.u32 2147483647, %v1578_v30 }
 0xc56   :  { %v1608_v43 = vmul.f32 %v4021_v52, %v1607_v38  ;;  %vm1614_vm3 = vweird.f32 %v1578_v30  ;;  %v1621_v63 = vor.u32 1.1754944e-38, %v1620_v58 }
 0xc57   :  { %v1446_v59 = vmul.f32 %v3155_v33, %v1445_v36  ;;  %vm1619_vm5 = vcmp.eq.f32.partialorder %v1618_v17, 8.507059e+37 }
 0xc58   :  { %2872 = vmatmul.msk.f32.gmra.mxu2 %vm279_vm10, %v1442_v24  ;;  %2881 = vmatmul.msk.f32.gmra.mxu3 %vm279_vm10, %v1608_v43  ;;  %v4090_v44 = vpop.xlane.xlu0 %1903 }
 0xc59   :  { %v1447_v48 = vadd.f32 %v3155_v33, %v1446_v59 }
 0xc5a   :  { %v3157_v47 = vpop.eup %3156 }
 0xc5b   :  { %v1610_v54 = vmul.f32 %v3157_v47, %v1578_v30  ;;  %v4086_v11 = vpop.xlane.xlu2 %1740  ;;  %v1451_v49 = vsel %vm1450_vm15, %v3155_v33, %v1447_v48  ;;  %vm1615_vm2 = vweird.f32 %v3157_v47 }
 0xc5c   :  { %v1456_v55 = vsel %vm1453_vm1, %v1455_v46, %v1451_v49  ;;  %vm1616_vm4 = vmor %vm1614_vm3, %vm1615_vm2  ;;  %3158 = vrcp.f32 %v4086_v11  ;;  %v1771_v23 = vand.u32 2147483648, %v4086_v11  ;;  %vm1765_vm15 = vweird.f32 %v4086_v11 }
 0xc5d   :  { %v1611_v0 = vsub.f32 1.0, %v1610_v54  ;;  %v1457_v52 = vmul.f32 %v4027_v41, %v1456_v55  ;;  %v1769_v21 = vand.u32 2147483647, %v4086_v11 }
 0xc5e   :  { %v1772_v24 = vor.u32 1.1754944e-38, %v1771_v23 }
 0xc5f   :  { %v1612_v40 = vmul.f32 %v3157_v47, %v1611_v0  ;;  %vm1770_vm2 = vcmp.eq.f32.partialorder %v1769_v21, 8.507059e+37 }
 0xc60   :  { %2873 = vmatmul.msk.f32.gmra.mxu2 %vm279_vm10, %v1457_v52 }
 0xc61   :  { %v1613_v61 = vadd.f32 %v3157_v47, %v1612_v40 }
 0xc62   :  { %v3159_v9 = vpop.eup %3158 }
 0xc63   :  { %v3027_v60 = vpop.permute.xlu2 %3026  ;;  %v1617_v29 = vsel %vm1616_vm4, %v3157_v47, %v1613_v61  ;;  %v1761_v7 = vmul.f32 %v3159_v9, %v4086_v11  ;;  %vm1766_vm14 = vweird.f32 %v3159_v9 }
 0xc64   :  { %v3028_v57 = vunpack.i.l.bf16 %v3027_v60  ;;  %v1622_v4 = vsel %vm1619_vm5, %v1621_v63, %v1617_v29  ;;  %v3029_v6 = vunpack.i.h.bf16 %v3027_v60  ;;  %vm1767_vm1 = vmor %vm1765_vm15, %vm1766_vm14  ;;  %v1922_v60 = vand.u32 2147483648, %v4090_v44 }
 0xc65   :  { %v1623_v51 = vmul.f32 %v4032_v14, %v1622_v4  ;;  %v1762_v15 = vsub.f32 1.0, %v1761_v7  ;;  %v1920_v29 = vand.u32 2147483647, %v4090_v44 }
 0xc66   :  { %1987 = vmatpush.msra.mxu3 %v3028_v57 }
 0xc67   :  { %2882 = vmatmul.msk.f32.gmra.mxu3 %vm279_vm10, %v1623_v51  ;;  %v1763_v5 = vmul.f32 %v3159_v9, %v1762_v15  ;;  %vm1921_vm14 = vcmp.eq.f32.partialorder %v1920_v29, 8.507059e+37  ;;  %v3044_v29 = vld [vmem:[%s4534_s5 + $0x1] ss:$0 sm:$0xff] }
 0xc68   :  { %1988 = vmatpush.msra.mxu3 %v3029_v6  ;;  %v1923_v6 = vor.u32 1.1754944e-38, %v1922_v60 }
 0xc69   :  { %v1764_v26 = vadd.f32 %v3159_v9, %v1763_v5 }
 0xc6b   :  { %v1791_v41 = vpop.permute.xlu0 %1790  ;;  %v1768_v35 = vsel %vm1767_vm1, %v3159_v9, %v1764_v26 }
 0xc6c   :  { %1823 = vmatpush.msra.mxu2 %v1791_v41  ;;  %v1773_v38 = vsel %vm1770_vm2, %v1772_v24, %v1768_v35 }
 0xc6d   :  { %v1774_v45 = vmul.f32 %v4041_v2, %v1773_v38  ;;  %v2904_v38 = vld [vmem:[%s4533_s6 + $0x38] sm:$0xff] }
 0xc6e   :  { %2076 = vmatpush.msrb.mxu1 %v2904_v38 }
 0xc81   :  { %v1738_v3 = vpop.xlane.xlu1 %1737 }
 0xc82   :  { %3160 = vrcp.f32 %v1738_v3  ;;  %v1756_v22 = vand.u32 2147483648, %v1738_v3  ;;  %v1754_v8 = vand.u32 2147483647, %v1738_v3  ;;  %vm1750_vm11 = vweird.f32 %v1738_v3 }
 0xc83   :  { %3162 = vrcp.f32 %v4090_v44 }
 0xc84   :  { %v1757_v56 = vor.u32 1.1754944e-38, %v1756_v22  ;;  %vm1755_vm13 = vcmp.eq.f32.partialorder %v1754_v8, 8.507059e+37 }
 0xc88   :  { %v3161_v12 = vpop.eup %3160 }
 0xc89   :  { %v1746_v16 = vmul.f32 %v3161_v12, %v1738_v3  ;;  %v4096_v18 = vpop.xlane.xlu1 %1906  ;;  %vm1751_vm7 = vweird.f32 %v3161_v12  ;;  %v3163_v36 = vpop.eup %3162 }
 0xc8a   :  { %vm1752_vm12 = vmor %vm1750_vm11, %vm1751_vm7  ;;  %v1912_v39 = vmul.f32 %v3163_v36, %v4090_v44  ;;  %vm1917_vm11 = vweird.f32 %v3163_v36  ;;  %v1937_v9 = vand.u32 2147483648, %v4096_v18  ;;  %vm1931_vm1 = vweird.f32 %v4096_v18 }
 0xc8b   :  { %v1747_v14 = vsub.f32 1.0, %v1746_v16  ;;  %v1935_v15 = vand.u32 2147483647, %v4096_v18 }
 0xc8c   :  { %v1913_v46 = vsub.f32 1.0, %v1912_v39  ;;  %v2902_v39 = vld [vmem:[%s4533_s6 + $0x28] sm:$0xff] }
 0xc8d   :  { %v1748_v27 = vmul.f32 %v3161_v12, %v1747_v14  ;;  %v1938_v14 = vor.u32 1.1754944e-38, %v1937_v9 }
 0xc8e   :  { %v1914_v52 = vmul.f32 %v3163_v36, %v1913_v46 }
 0xc8f   :  { %v1749_v31 = vadd.f32 %v3161_v12, %v1748_v27 }
 0xc90   :  { %v1915_v17 = vadd.f32 %v3163_v36, %v1914_v52 }
 0xc91   :  { %v1753_v33 = vsel %vm1752_vm12, %v3161_v12, %v1749_v31  ;;  %v1744_v10 = vpop.xlane.xlu1 %1743  ;;  %vm1916_vm12 = vweird.f32 %v4090_v44 }
 0xc92   :  { %v1758_v30 = vsel %vm1755_vm13, %v1757_v56, %v1753_v33  ;;  %3164 = vrcp.f32 %v1744_v10  ;;  %v1784_v48 = vand.u32 2147483647, %v1744_v10  ;;  %vm1780_vm4 = vweird.f32 %v1744_v10  ;;  %vm1918_vm13 = vmor %vm1916_vm12, %vm1917_vm11 }
 0xc93   :  { %v1759_v13 = vmul.f32 %v4051_v25, %v1758_v30  ;;  %3166 = vrcp.f32 %v4096_v18  ;;  %v1786_v25 = vand.u32 2147483648, %v1744_v10  ;;  %v1919_v57 = vsel %vm1918_vm13, %v3163_v36, %v1915_v17 }
 0xc94   :  { %vm1785_vm7 = vcmp.eq.f32.partialorder %v1784_v48, 8.507059e+37  ;;  %v1924_v41 = vsel %vm1921_vm14, %v1923_v6, %v1919_v57 }
 0xc95   :  { %2889 = vmatmul.msk.f32.vlgmr.msra.gmra.mxu2 %vm279_vm10, %v1759_v13  ;;  %v1787_v0 = vor.u32 1.1754944e-38, %v1786_v25  ;;  %v1925_v12 = vmul.f32 %v4037_v53, %v1924_v41 }
 0xc98   :  { %v3165_v37 = vpop.eup %3164 }
 0xc99   :  { %v1776_v59 = vmul.f32 %v3165_v37, %v1744_v10  ;;  %vm1781_vm3 = vweird.f32 %v3165_v37  ;;  %v1910_v54 = vpop.xlane.xlu1 %1909  ;;  %v3167_v49 = vpop.eup %3166 }
 0xc9a   :  { %vm1782_vm5 = vmor %vm1780_vm4, %vm1781_vm3  ;;  %3168 = vrcp.f32 %v1910_v54  ;;  %v1927_v2 = vmul.f32 %v3167_v49, %v4096_v18  ;;  %vm1932_vm15 = vweird.f32 %v3167_v49  ;;  %vm1936_vm3 = vcmp.eq.f32.partialorder %v1935_v15, 8.507059e+37 }
 0xc9b   :  { %v1777_v43 = vsub.f32 1.0, %v1776_v59  ;;  %vm1933_vm2 = vmor %vm1931_vm1, %vm1932_vm15  ;;  %v1952_v27 = vand.u32 2147483648, %v1910_v54  ;;  %v1950_v31 = vand.u32 2147483647, %v1910_v54  ;;  %v2903_v59 = vld [vmem:[%s4533_s6 + $0x30] sm:$0xff] }
 0xc9c   :  { %v1928_v61 = vsub.f32 1.0, %v1927_v2  ;;  %2077 = vmatpush.msrb.mxu1 %v2903_v59 }
 0xc9d   :  { %v1778_v47 = vmul.f32 %v3165_v37, %v1777_v43  ;;  %2890 = vmatmul.msk.f32.gmra.mxu2 %vm279_vm10, %v1774_v45  ;;  %v1953_v18 = vor.u32 1.1754944e-38, %v1952_v27  ;;  %vm1951_vm11 = vcmp.eq.f32.partialorder %v1950_v31, 8.507059e+37  ;;  %v2901_v43 = vld [vmem:[%s4533_s6 + $0x20] sm:$0xff] }
 0xc9e   :  { %v1929_v4 = vmul.f32 %v3167_v49, %v1928_v61  ;;  %2078 = vmatpush.msrb.mxu1 %v2902_v39 }
 0xc9f   :  { %v1779_v11 = vadd.f32 %v3165_v37, %v1778_v47 }
 0xca0   :  { %v3169_v63 = vpop.eup %3168  ;;  %v1930_v3 = vadd.f32 %v3167_v49, %v1929_v4  ;;  %2079 = vmatpush.msrb.mxu1 %v2901_v43 }
 0xca1   :  { %v1783_v55 = vsel %vm1782_vm5, %v3165_v37, %v1779_v11  ;;  %v1942_v51 = vmul.f32 %v3169_v63, %v1910_v54  ;;  %vm1947_vm4 = vweird.f32 %v3169_v63  ;;  %vm1946_vm5 = vweird.f32 %v1910_v54 }
 0xca2   :  { %v1788_v58 = vsel %vm1785_vm7, %v1787_v0, %v1783_v55  ;;  %v1934_v16 = vsel %vm1933_vm2, %v3167_v49, %v1930_v3  ;;  %vm1948_vm7 = vmor %vm1946_vm5, %vm1947_vm4 }
 0xca3   :  { %v1789_v40 = vmul.f32 %v4061_v19, %v1788_v58  ;;  %v1943_v19 = vsub.f32 1.0, %v1942_v51  ;;  %v1939_v22 = vsel %vm1936_vm3, %v1938_v14, %v1934_v16 }
 0xca4   :  { %v1940_v8 = vmul.f32 %v4056_v62, %v1939_v22 }
 0xca5   :  { %2891 = vmatmul.msk.f32.gmra.mxu2 %vm279_vm10, %v1789_v40  ;;  %v1944_v44 = vmul.f32 %v3169_v63, %v1943_v19 }
 0xca7   :  { %v1945_v5 = vadd.f32 %v3169_v63, %v1944_v44 }
 0xca9   :  { %v1949_v53 = vsel %vm1948_vm7, %v3169_v63, %v1945_v5 }
 0xcaa   :  { %v1954_v56 = vsel %vm1951_vm11, %v1953_v18, %v1949_v53 }
 0xcab   :  { %v1955_v33 = vmul.f32 %v4065_v34, %v1954_v56 }
 0xcb1   :  { %v1957_v7 = vpop.permute.xlu1 %1956 }
 0xcb2   :  { %1989 = vmatpush.msra.mxu3 %v1957_v7 }
 0xcb3   :  { %2898 = vmatmul.msk.f32.vlgmr.msra.gmra.mxu3 %vm279_vm10, %v1925_v12 }
 0xcbb   :  { %2899 = vmatmul.msk.f32.gmra.mxu3 %vm279_vm10, %v1940_v8 }
 0xcc3   :  { %2900 = vmatmul.msk.f32.gmra.mxu3 %vm279_vm10, %v1955_v33 }
 0xcd2   :  { %v1659_v10 = vpop.f32.mrf.mxu3 }
 0xcd3   :  { %2003 = vrot.lane.b32.xlu0 %v1659_v10, %s4549_s30  ;;  %v1493_v26 = vpop.f32.mrf.mxu2 }
 0xcdb   :  { %v1496_v23 = vpop.f32.mrf.mxu2  ;;  %v1662_v62 = vpop.f32.mrf.mxu3 }
 0xce3   :  { %v1499_v30 = vpop.f32.mrf.mxu2 }
 0xcea   :  { %v1665_v21 = vpop.f32.mrf.mxu3 }
 0xd18   :  { %v1825_v13 = vpop.f32.mrf.mxu2 }
 0xd19   :  { %2015 = vrot.lane.b32.xlu2 %v1825_v13, %s4550_s7  ;;  %v2914_v13 = vld [vmem:[%s4456_s13 + $0x38] sm:$0xff] }
 0xd1a   :  { %2206 = vmatpush.msrb.mxu2 %v2914_v13 }
 0xd20   :  { %v1828_v34 = vpop.f32.mrf.mxu2 }
 0xd21   :  { %2005 = vrot.lane.b32.xlu2 %v1662_v62, %s4549_s30  ;;  %v2913_v62 = vld [vmem:[%s4456_s13 + $0x30] sm:$0xff] }
 0xd22   :  { %2207 = vmatpush.msrb.mxu2 %v2913_v62 }
 0xd28   :  { %v1831_v24 = vpop.f32.mrf.mxu2 }
 0xd29   :  { %2007 = vrot.lane.b32.xlu2 %v1665_v21, %s4549_s30  ;;  %v2912_v21 = vld [vmem:[%s4456_s13 + $0x28] sm:$0xff] }
 0xd2a   :  { %2208 = vmatpush.msrb.mxu2 %v2912_v21 }
 0xd36   :  { %v1991_v35 = vpop.f32.mrf.mxu3 }
 0xd37   :  { %2027 = vrot.lane.b32.xlu0 %v1991_v35, %s4551_s0  ;;  %v2911_v35 = vld [vmem:[%s4456_s13 + $0x20] sm:$0xff] }
 0xd38   :  { %2209 = vmatpush.msrb.mxu2 %v2911_v35 }
 0xd3e   :  { %v1994_v36 = vpop.f32.mrf.mxu3 }
 0xd3f   :  { %2017 = vrot.lane.b32.xlu0 %v1828_v34, %s4550_s7  ;;  %2029 = vrot.lane.b32.xlu1 %v1994_v36, %s4551_s0 }
 0xd45   :  { %v2004_v45 = vpop.permute.xlu0 %2003 }
 0xd46   :  { %v1997_v37 = vpop.f32.mrf.mxu3  ;;  %v2036_v47 = vsel %vm149_vm8, %v1493_v26, %v2004_v45 }
 0xd47   :  { %2019 = vrot.lane.b32.xlu0 %v1831_v24, %s4550_s7  ;;  %2031 = vrot.lane.b32.xlu1 %v1997_v37, %s4551_s0 }
 0xd73   :  { %v2016_v25 = vpop.permute.xlu2 %2015 }
 0xd74   :  { %v2039_v48 = vsel %vm88_vm0, %v2036_v47, %v2016_v25  ;;  %v2926_v25 = vld [vmem:[%s4458_s15 + $0x78] sm:$0xff]  ;;  %v2925_v47 = vld [vmem:[%s4458_s15 + $0x70] sm:$0xff] }
 0xd75   :  { %2254 = vmatpush.msra.mxu0 %v2926_v25 }
 0xd77   :  { %2255 = vmatpush.msra.mxu0 %v2925_v47 }
 0xd7b   :  { %v2006_v11 = vpop.permute.xlu2 %2005 }
 0xd7c   :  { %v2037_v49 = vsel %vm149_vm8, %v1496_v23, %v2006_v11 }
 0xd83   :  { %v2008_v2 = vpop.permute.xlu2 %2007 }
 0xd84   :  { %v2038_v40 = vsel %vm149_vm8, %v1499_v30, %v2008_v2  ;;  %v2922_v2 = vld [vmem:[%s4458_s15 + $0x58] sm:$0xff] }
 0xda9   :  { %v2028_v46 = vpop.permute.xlu0 %2027 }
 0xdaa   :  { %v2042_v54 = vsel %vm279_vm10, %v2039_v48, %v2028_v46  ;;  %v2924_v46 = vld [vmem:[%s4458_s15 + $0x68] sm:$0xff] }
 0xdab   :  { %2906 = vmatmul.msk.f32.vlgmr.msrb.gmra.mxu1 %vm196_vm9, %v2042_v54  ;;  %2256 = vmatpush.msra.mxu0 %v2924_v46 }
 0xdb1   :  { %v2018_v0 = vpop.permute.xlu0 %2017  ;;  %v2030_v55 = vpop.permute.xlu1 %2029 }
 0xdb2   :  { %v2040_v58 = vsel %vm88_vm0, %v2037_v49, %v2018_v0  ;;  %v2923_v0 = vld [vmem:[%s4458_s15 + $0x60] sm:$0xff] }
 0xdb3   :  { %v2043_v52 = vsel %vm279_vm10, %v2040_v58, %v2030_v55  ;;  %2257 = vmatpush.msra.mxu0 %v2923_v0 }
 0xdb4   :  { %2907 = vmatmul.msk.f32.gmra.mxu1 %vm196_vm9, %v2043_v52 }
 0xdb5   :  { %2258 = vmatpush.msra.mxu0 %v2922_v2 }
 0xdb9   :  { %v2020_v17 = vpop.permute.xlu0 %2019  ;;  %v2032_v61 = vpop.permute.xlu1 %2031 }
 0xdba   :  { %v2041_v63 = vsel %vm88_vm0, %v2038_v40, %v2020_v17  ;;  %v3045_v40 = vld [vmem:[%s4535_s10 + $0x1] ss:$0 sm:$0xff] }
 0xdbb   :  { %v2044_v60 = vsel %vm279_vm10, %v2041_v63, %v2032_v61 }
 0xdbc   :  { %2908 = vmatmul.msk.f32.gmra.mxu1 %vm196_vm9, %v2044_v60 }
 0xe28   :  { %v2081_v57 = vpop.f32.mrf.mxu1 }
 0xe29   :  { %v2082_v4 = vadd.f32 %v3044_v29, %v2081_v57 }
 0xe2b   :  { %v2090_v51 = vadd.f32 %v2082_v4, %v3887_v20 }
 0xe2d   :  { %v2097_v6 = vsel %vm196_vm9, %v2090_v51, 0.0 }
 0xe2e   :  { %2098 = vadd.xlane.f32.xlu2 %v2097_v6 }
 0xe31   :  { %v2084_v41 = vpop.f32.mrf.mxu1 }
 0xe32   :  { %v2085_v19 = vadd.f32 %v3044_v29, %v2084_v41 }
 0xe34   :  { %v2091_v3 = vadd.f32 %v2085_v19, %v3893_v50 }
 0xe36   :  { %v2100_v9 = vsel %vm196_vm9, %v2091_v3, 0.0 }
 0xe37   :  { %2101 = vadd.xlane.f32.xlu0 %v2100_v9 }
 0xe39   :  { %v2087_v7 = vpop.f32.mrf.mxu1 }
 0xe3a   :  { %v2088_v12 = vadd.f32 %v3044_v29, %v2087_v7  ;;  %v3046_v29 = vld [vmem:[%s4536_s9 + $0x1] ss:$0 sm:$0xff] }
 0xe3c   :  { %v2092_v15 = vadd.f32 %v2088_v12, %v3898_v42 }
 0xe3e   :  { %v2103_v44 = vsel %vm196_vm9, %v2092_v15, 0.0 }
 0xe3f   :  { %2104 = vadd.xlane.f32.xlu1 %v2103_v44 }
 0xea1   :  { %v2099_v16 = vpop.xlane.xlu2 %2098 }
 0xea2   :  { %v2106_v14 = vmul.f32 %v2099_v16, %v3754_v1 }
 0xea4   :  { %v2109_v22 = vsub.f32 %v2090_v51, %v2106_v14 }
 0xea6   :  { %v2112_v5 = vmul.f32 %v2109_v22, %v2109_v22 }
 0xea8   :  { %v2115_v27 = vsel %vm196_vm9, %v2112_v5, 0.0 }
 0xea9   :  { %2116 = vadd.xlane.f32.xlu2 %v2115_v27 }
 0xeaa   :  { %v2102_v8 = vpop.xlane.xlu0 %2101 }
 0xeab   :  { %v2107_v31 = vmul.f32 %v2102_v8, %v3754_v1 }
 0xead   :  { %v4168_v53 = vsub.f32 %v2091_v3, %v2107_v31 }
 0xeaf   :  { %v2113_v18 = vmul.f32 %v4168_v53, %v4168_v53 }
 0xeb1   :  { %v2118_v56 = vsel %vm196_vm9, %v2113_v18, 0.0  ;;  %v2920_v18 = vld [vmem:[%s4458_s15 + $0x48] sm:$0xff] }
 0xeb2   :  { %2119 = vadd.xlane.f32.xlu0 %v2118_v56  ;;  %v2105_v33 = vpop.xlane.xlu1 %2104  ;;  %v2919_v56 = vld [vmem:[%s4458_s15 + $0x40] sm:$0xff] }
 0xeb3   :  { %v2108_v10 = vmul.f32 %v2105_v33, %v3754_v1  ;;  %v3047_v33 = vld [vmem:[%s4457_s14 + $0x1] ss:$0 sm:$0xff] }
 0xeb5   :  { %v4174_v26 = vsub.f32 %v2092_v15, %v2108_v10 }
 0xeb7   :  { %v2114_v23 = vmul.f32 %v4174_v26, %v4174_v26 }
 0xeb9   :  { %v2121_v30 = vsel %vm196_vm9, %v2114_v23, 0.0 }
 0xeba   :  { %2122 = vadd.xlane.f32.xlu1 %v2121_v30 }
 0xf1c   :  { %v2117_v34 = vpop.xlane.xlu2 %2116 }
 0xf1d   :  { %v2124_v36 = vmul.f32 %v2117_v34, %v3754_v1 }
 0xf1f   :  { %v2127_v24 = vadd.f32 1e-05, %v2124_v36  ;;  %v3048_v36 = vld [vmem:[%s4459_s16 + $0x1] ss:$0 sm:$0xff]  ;;  %s4553_s16 = sld [smem:[#allocation17_spill]] }
 0xf21   :  { %3170 = vrsqrt.f32 %v2127_v24  ;;  %vm2136_vm12 = vweird.f32 %v2127_v24 }
 0xf25   :  { %v2120_v37 = vpop.xlane.xlu0 %2119 }
 0xf26   :  { %v2125_v38 = vmul.f32 %v2120_v37, %v3754_v1 }
 0xf27   :  { %v3171_v59 = vpop.eup %3170 }
 0xf28   :  { %v2131_v39 = vmul.f32 %v3171_v59, %v2127_v24  ;;  %v2128_v43 = vadd.f32 1e-05, %v2125_v38  ;;  %vm2137_vm0 = vweird.f32 %v3171_v59 }
 0xf29   :  { %vm2138_vm13 = vmor %vm2136_vm12, %vm2137_vm0 }
 0xf2a   :  { %v2132_v45 = vmul.f32 %v3171_v59, %v2131_v39  ;;  %3172 = vrsqrt.f32 %v2128_v43  ;;  %vm2146_vm15 = vweird.f32 %v2128_v43 }
 0xf2c   :  { %v2133_v48 = vmul.f32 0.5, %v2132_v45 }
 0xf2d   :  { %v2123_v54 = vpop.xlane.xlu1 %2122 }
 0xf2e   :  { %v2134_v11 = vsub.f32 1.5, %v2133_v48  ;;  %v2126_v49 = vmul.f32 %v2123_v54, %v3754_v1 }
 0xf30   :  { %v3173_v55 = vpop.eup %3172  ;;  %v2135_v58 = vmul.f32 %v3171_v59, %v2134_v11  ;;  %v2129_v52 = vadd.f32 1e-05, %v2126_v49  ;;  %v2936_v11 = vld [vmem:[%s4461_s18 + $0x18] sm:$0xff]  ;;  %v2934_v49 = vld [vmem:[%s4460_s17 + $0x20] sm:$0xff] }
 0xf31   :  { %v2141_v17 = vmul.f32 %v3173_v55, %v2128_v43  ;;  %vm2147_vm14 = vweird.f32 %v3173_v55 }
 0xf32   :  { %v2139_v61 = vsel %vm2138_vm13, %v3171_v59, %v2135_v58  ;;  %3174 = vrsqrt.f32 %v2129_v52  ;;  %vm2148_vm1 = vmor %vm2146_vm15, %vm2147_vm14  ;;  %vm2156_vm3 = vweird.f32 %v2129_v52 }
 0xf33   :  { %v2160_v63 = vmul.f32 %v2139_v61, %v2109_v22  ;;  %v2142_v60 = vmul.f32 %v3173_v55, %v2141_v17 }
 0xf35   :  { %v2166_v57 = vmul.f32 %v3045_v40, %v2160_v63  ;;  %v2143_v4 = vmul.f32 0.5, %v2142_v60 }
 0xf37   :  { %v2144_v51 = vsub.f32 1.5, %v2143_v4  ;;  %v2172_v6 = vadd.f32 %v3046_v29, %v2166_v57 }
 0xf38   :  { %v3175_v41 = vpop.eup %3174 }
 0xf39   :  { %v2145_v19 = vmul.f32 %v3173_v55, %v2144_v51  ;;  %v2151_v3 = vmul.f32 %v3175_v41, %v2129_v52  ;;  %2916 = vmatmul.msk.f32.vlgmr.msrb.gmra.mxu2 %vm196_vm9, %v2172_v6  ;;  %vm2157_vm2 = vweird.f32 %v3175_v41 }
 0xf3a   :  { %vm2158_vm4 = vmor %vm2156_vm3, %vm2157_vm2 }
 0xf3b   :  { %v2149_v9 = vsel %vm2148_vm1, %v3173_v55, %v2145_v19  ;;  %v2152_v7 = vmul.f32 %v3175_v41, %v2151_v3  ;;  %v2937_v19 = vld [vmem:[%s4461_s18 + $0x20] sm:$0xff]  ;;  %v2935_v3 = vld [vmem:[%s4460_s17 + $0x28] sm:$0xff] }
 0xf3c   :  { %v2161_v12 = vmul.f32 %v2149_v9, %v4168_v53  ;;  %v2921_v53 = vld [vmem:[%s4458_s15 + $0x50] sm:$0xff]  ;;  %v2938_v9 = vld [vmem:[%s4461_s18 + $0x28] sm:$0xff] }
 0xf3d   :  { %v2153_v15 = vmul.f32 0.5, %v2152_v7  ;;  %2259 = vmatpush.msra.mxu0 %v2921_v53  ;;  %v2407_v7 = vld [vmem:[%s4462_s19 + $0x18] sm:$0xff] }
 0xf3e   :  { %v2167_v44 = vmul.f32 %v3045_v40, %v2161_v12  ;;  %2433 = vmatpush.msrb.mxu3 %v2407_v7 }
 0xf3f   :  { %v2154_v16 = vsub.f32 1.5, %v2153_v15  ;;  %2260 = vmatpush.msra.mxu0 %v2920_v18  ;;  %v2406_v15 = vld [vmem:[%s4462_s19 + $0x10] sm:$0xff] }
 0xf40   :  { %v2173_v14 = vadd.f32 %v3046_v29, %v2167_v44  ;;  %2434 = vmatpush.msrb.mxu3 %v2406_v15 }
 0xf41   :  { %v2155_v22 = vmul.f32 %v3175_v41, %v2154_v16  ;;  %2261 = vmatpush.msra.mxu0 %v2919_v56 }
 0xf42   :  { %2917 = vmatmul.msk.f32.gmra.mxu2 %vm196_vm9, %v2173_v14 }
 0xf43   :  { %v2159_v5 = vsel %vm2158_vm4, %v3175_v41, %v2155_v22  ;;  %v2933_v41 = vld [vmem:[%s4460_s17 + $0x18] sm:$0xff] }
 0xf44   :  { %v2162_v27 = vmul.f32 %v2159_v5, %v4174_v26  ;;  %v2404_v5 = vld [vmem:[%s4462_s19] sm:$0xff] }
 0xf46   :  { %v2168_v8 = vmul.f32 %v3045_v40, %v2162_v27 }
 0xf48   :  { %v2174_v31 = vadd.f32 %v3046_v29, %v2168_v8 }
 0xf4a   :  { %2918 = vmatmul.msk.f32.gmra.mxu2 %vm196_vm9, %v2174_v31 }
 0xfbc   :  { %v2211_v10 = vpop.f32.mrf.mxu2 }
 0xfbd   :  { %v2212_v26 = vadd.f32 %v3047_v33, %v2211_v10 }
 0xfbf   :  { %v2220_v23 = vmax.f32 %v2212_v26, 0.0 }
 0xfc1   :  { %2928 = vmatmul.msk.f32.vlgmr.msra.gmra.mxu0 %vm1130_vm6, %v2220_v23 }
 0xfc5   :  { %v2214_v30 = vpop.f32.mrf.mxu2 }
 0xfc6   :  { %v2215_v13 = vadd.f32 %v3047_v33, %v2214_v30 }
 0xfc8   :  { %v2221_v62 = vmax.f32 %v2215_v13, 0.0 }
 0xfca   :  { %2929 = vmatmul.msk.f32.gmra.mxu0 %vm1130_vm6, %v2221_v62 }
 0xfcd   :  { %v2217_v21 = vpop.f32.mrf.mxu2 }
 0xfce   :  { %v2218_v35 = vadd.f32 %v3047_v33, %v2217_v21 }
 0xfd0   :  { %v2222_v34 = vmax.f32 %v2218_v35, 0.0  ;;  %v3049_v35 = vld [vmem:[%s4537_s4 + $0x1] ss:$0 sm:$0xff] }
 0xfd2   :  { %2930 = vmatmul.msk.f32.gmra.mxu0 %vm1130_vm6, %v2222_v34 }
0x103e   :  { %v2263_v24 = vpop.f32.mrf.mxu0 }
0x103f   :  { %v2264_v37 = vadd.f32 %v3048_v36, %v2263_v24 }
0x1041   :  { %v2272_v38 = vadd.f32 %v2264_v37, %v2172_v6  ;;  %v3050_v37 = vld [vmem:[%s4455_s12 + $0x1] ss:$0 sm:$0xff]  ;;  %s2795_s12 = sshll.u32 %s3242_s28, 4  ;;  %s2796_s12 = int_to_ptr.vmem [resolvable:$true] %s2795_s12 }
0x1043   :  { %v2279_v59 = vsel %vm196_vm9, %v2272_v38, 0.0 }
0x1044   :  { %2280 = vadd.xlane.f32.xlu2 %v2279_v59 }
0x1047   :  { %v2266_v39 = vpop.f32.mrf.mxu0 }
0x1048   :  { %v2267_v43 = vadd.f32 %v3048_v36, %v2266_v39 }
0x104a   :  { %v2273_v45 = vadd.f32 %v2267_v43, %v2173_v14  ;;  %v2405_v14 = vld [vmem:[%s4462_s19 + $0x8] sm:$0xff] }
0x104b   :  { %2435 = vmatpush.msrb.mxu3 %v2405_v14 }
0x104c   :  { %v2282_v25 = vsel %vm196_vm9, %v2273_v45, 0.0 }
0x104d   :  { %2283 = vadd.xlane.f32.xlu0 %v2282_v25  ;;  %2436 = vmatpush.msrb.mxu3 %v2404_v5 }
0x104f   :  { %v2269_v47 = vpop.f32.mrf.mxu0 }
0x1050   :  { %v2270_v48 = vadd.f32 %v3048_v36, %v2269_v47 }
0x1052   :  { %v2274_v46 = vadd.f32 %v2270_v48, %v2174_v31 }
0x1054   :  { %v2285_v54 = vsel %vm196_vm9, %v2274_v46, 0.0 }
0x1055   :  { %2286 = vadd.xlane.f32.xlu1 %v2285_v54 }
0x1061   :  { %2385 = vperm.xlu0 %3008, %v2936_v11  }
0x106e   :  { %2368 = vperm.xlu1 %3007, %v2934_v49  }
0x10b7   :  { %v2281_v0 = vpop.xlane.xlu2 %2280 }
0x10b8   :  { %v2288_v55 = vmul.f32 %v2281_v0, %v3754_v1 }
0x10ba   :  { %v2291_v58 = vsub.f32 %v2272_v38, %v2288_v55 }
0x10bc   :  { %v2294_v52 = vmul.f32 %v2291_v58, %v2291_v58 }
0x10be   :  { %v2297_v2 = vsel %vm196_vm9, %v2294_v52, 0.0 }
0x10bf   :  { %2298 = vadd.xlane.f32.xlu2 %v2297_v2 }
0x10c0   :  { %v2284_v40 = vpop.xlane.xlu0 %2283 }
0x10c1   :  { %v2289_v17 = vmul.f32 %v2284_v40, %v3754_v1 }
0x10c3   :  { %v4250_v61 = vsub.f32 %v2273_v45, %v2289_v17 }
0x10c5   :  { %v2295_v63 = vmul.f32 %v4250_v61, %v4250_v61 }
0x10c7   :  { %v2300_v60 = vsel %vm196_vm9, %v2295_v63, 0.0 }
0x10c8   :  { %2301 = vadd.xlane.f32.xlu0 %v2300_v60  ;;  %v2287_v29 = vpop.xlane.xlu1 %2286 }
0x10c9   :  { %v2290_v57 = vmul.f32 %v2287_v29, %v3754_v1 }
0x10cb   :  { %v4256_v4 = vsub.f32 %v2274_v46, %v2290_v57 }
0x10cd   :  { %v2296_v51 = vmul.f32 %v4256_v4, %v4256_v4 }
0x10cf   :  { %v2303_v6 = vsel %vm196_vm9, %v2296_v51, 0.0 }
0x10d0   :  { %2304 = vadd.xlane.f32.xlu1 %v2303_v6 }
0x10d3   :  { %v2386_v44 = vpop.permute.xlu0 %2385 }
0x10d7   :  { %2363 = vperm.xlu2 %3009, %v2933_v41  }
0x10dc   :  { %2390 = vperm.xlu0 %3008, %v2937_v19  }
0x10df   :  { %2373 = vperm.xlu2 %3009, %v2935_v3  }
0x10e0   :  { %v2369_v27 = vpop.permute.xlu1 %2368 }
0x10e9   :  { %2395 = vperm.xlu1 %3007, %v2938_v9  }
0x1132   :  { %v2299_v12 = vpop.xlane.xlu2 %2298 }
0x1133   :  { %v2306_v16 = vmul.f32 %v2299_v12, %v3754_v1 }
0x1135   :  { %v2309_v22 = vadd.f32 1e-05, %v2306_v16 }
0x1137   :  { %3176 = vrsqrt.f32 %v2309_v22  ;;  %vm2318_vm5 = vweird.f32 %v2309_v22 }
0x113a   :  { %v2364_v25 = vpop.permute.xlu2 %2363 }
0x113b   :  { %v2302_v8 = vpop.xlane.xlu0 %2301 }
0x113c   :  { %v2307_v31 = vmul.f32 %v2302_v8, %v3754_v1 }
0x113d   :  { %v3177_v53 = vpop.eup %3176 }
0x113e   :  { %v2313_v18 = vmul.f32 %v3177_v53, %v2309_v22  ;;  %v2310_v56 = vadd.f32 1e-05, %v2307_v31  ;;  %vm2319_vm6 = vweird.f32 %v3177_v53 }
0x113f   :  { %vm2320_vm7 = vmor %vm2318_vm5, %vm2319_vm6 }
0x1140   :  { %v2314_v33 = vmul.f32 %v3177_v53, %v2313_v18  ;;  %3178 = vrsqrt.f32 %v2310_v56  ;;  %vm2328_vm0 = vweird.f32 %v2310_v56  ;;  %v186_v18 = vld [vmem:[%s4552_s27 + $0x8] sm:$0xff] }
0x1142   :  { %v2315_v10 = vmul.f32 0.5, %v2314_v33  ;;  %v2374_v41 = vpop.permute.xlu2 %2373 }
0x1143   :  { %v2305_v26 = vpop.xlane.xlu1 %2304 }
0x1144   :  { %v2316_v23 = vsub.f32 1.5, %v2315_v10  ;;  %v2308_v30 = vmul.f32 %v2305_v26, %v3754_v1  ;;  %v187_v26 = vld [vmem:[%s4552_s27 + $0x10] sm:$0xff] }
0x1146   :  { %v3179_v13 = vpop.eup %3178  ;;  %v2317_v62 = vmul.f32 %v3177_v53, %v2316_v23  ;;  %v2311_v21 = vadd.f32 1e-05, %v2308_v30 }
0x1147   :  { %v2323_v34 = vmul.f32 %v3179_v13, %v2310_v56  ;;  %vm2329_vm11 = vweird.f32 %v3179_v13 }
0x1148   :  { %v2321_v36 = vsel %vm2320_vm7, %v3177_v53, %v2317_v62  ;;  %3180 = vrsqrt.f32 %v2311_v21  ;;  %vm2330_vm12 = vmor %vm2328_vm0, %vm2329_vm11  ;;  %vm2338_vm14 = vweird.f32 %v2311_v21 }
0x1149   :  { %v2342_v24 = vmul.f32 %v2321_v36, %v2291_v58  ;;  %v2324_v38 = vmul.f32 %v3179_v13, %v2323_v34 }
0x114b   :  { %v2348_v59 = vmul.f32 %v3049_v35, %v2342_v24  ;;  %v2325_v1 = vmul.f32 0.5, %v2324_v38 }
0x114d   :  { %v2354_v39 = vadd.f32 %v3050_v37, %v2348_v59  ;;  %v2326_v43 = vsub.f32 1.5, %v2325_v1 }
0x114e   :  { %v3181_v45 = vpop.eup %3180  ;;  %v2391_v29 = vpop.permute.xlu0 %2390 }
0x114f   :  { %v2376_v47 = vmul.f32 %v2364_v25, %v2354_v39  ;;  %v2327_v48 = vmul.f32 %v3179_v13, %v2326_v43  ;;  %v2333_v46 = vmul.f32 %v3181_v45, %v2311_v21  ;;  %vm2339_vm13 = vweird.f32 %v3181_v45  ;;  %v2655_v21 = vld [vmem:[%s4466_s23 + $0x10] sm:$0xff] }
0x1150   :  { %vm2340_vm15 = vmor %vm2338_vm14, %vm2339_vm13 }
0x1151   :  { %v2398_v54 = vadd.f32 %v2386_v44, %v2376_v47  ;;  %v2331_v11 = vsel %vm2330_vm12, %v3179_v13, %v2327_v48  ;;  %v2334_v49 = vmul.f32 %v3181_v45, %v2333_v46 }
0x1152   :  { %v2343_v0 = vmul.f32 %v2331_v11, %v4250_v61 }
0x1153   :  { %v4296_v55 = vadd.f32 %v2398_v54, %v3887_v20  ;;  %v2335_v58 = vmul.f32 0.5, %v2334_v49 }
0x1154   :  { %v2349_v52 = vmul.f32 %v3049_v35, %v2343_v0 }
0x1155   :  { %v2336_v2 = vsub.f32 1.5, %v2335_v58  ;;  %2939 = vmatmul.msk.f32.vlgmr.msrb.gmra.mxu3 %vm196_vm9, %v4296_v55  ;;  %v2654_v58 = vld [vmem:[%s4466_s23 + $0x8] sm:$0xff] }
0x1156   :  { %v2355_v40 = vadd.f32 %v3050_v37, %v2349_v52  ;;  %v2675_v52 = vld [vmem:[%s4467_s24 + $0x8] sm:$0xff] }
0x1157   :  { %v2337_v17 = vmul.f32 %v3181_v45, %v2336_v2  ;;  %v2676_v2 = vld [vmem:[%s4467_s24 + $0x10] sm:$0xff] }
0x1158   :  { %v2377_v63 = vmul.f32 %v2369_v27, %v2355_v40  ;;  %v185_v27 = vld [vmem:[%s4552_s27] sm:$0xff]  ;;  %s2797_s27 = sshll.u32 %s4554_s2, 4  ;;  %s2798_s27 = int_to_ptr.hbm [resolvable:$true] %s2797_s27 }
0x1159   :  { %v2341_v60 = vsel %vm2340_vm15, %v3181_v45, %v2337_v17  ;;  %v2674_v40 = vld [vmem:[%s4467_s24] sm:$0xff] }
0x115a   :  { %v2399_v57 = vadd.f32 %v2391_v29, %v2377_v63  ;;  %v2344_v61 = vmul.f32 %v2341_v60, %v4256_v4 }
0x115b   :  { %v2396_v3 = vpop.permute.xlu1 %2395 }
0x115c   :  { %v4302_v20 = vadd.f32 %v2399_v57, %v3893_v50  ;;  %v2350_v51 = vmul.f32 %v3049_v35, %v2344_v61  ;;  %v3051_v50 = vld [vmem:[%s4463_s20] ss:$0 sm:$0xff] }
0x115d   :  { %v2653_v35 = vld [vmem:[%s4466_s23] sm:$0xff] }
0x115e   :  { %v2356_v6 = vadd.f32 %v3050_v37, %v2350_v51  ;;  %2940 = vmatmul.msk.f32.gmra.mxu3 %vm196_vm9, %v4302_v20  ;;  %v2613_v51 = vld [vmem:[%s4464_s21 + $0x18] sm:$0xff] }
0x115f   :  { %2639 = vmatpush.msrb.mxu0 %v2613_v51 }
0x1160   :  { %v2378_v19 = vmul.f32 %v2374_v41, %v2356_v6  ;;  %v2612_v6 = vld [vmem:[%s4464_s21 + $0x10] sm:$0xff] }
0x1161   :  { %2640 = vmatpush.msrb.mxu0 %v2612_v6 }
0x1162   :  { %v2400_v9 = vadd.f32 %v2396_v3, %v2378_v19  ;;  %v2611_v3 = vld [vmem:[%s4464_s21 + $0x8] sm:$0xff] }
0x1163   :  { %2641 = vmatpush.msrb.mxu0 %v2611_v3 }
0x1164   :  { %v4307_v7 = vadd.f32 %v2400_v9, %v3898_v42 }
0x1166   :  { %2941 = vmatmul.msk.f32.gmra.mxu3 %vm196_vm9, %v4307_v7 }
0x11d8   :  { %v2438_v4 = vpop.f32.mrf.mxu3 }
0x11d9   :  { %v4314_v12 = vadd.f32 %v3051_v50, %v2438_v4 }
0x11db   :  { %2450 = vrot.lane.b32.xlu1 %v4314_v12, %s4538_s8 }
0x11e1   :  { %v2441_v15 = vpop.f32.mrf.mxu3 }
0x11e2   :  { %v2442_v44 = vadd.f32 %v3051_v50, %v2441_v15 }
0x11e4   :  { %2452 = vrot.lane.b32.xlu2 %v2442_v44, %s4538_s8 }
0x11e9   :  { %v2444_v16 = vpop.f32.mrf.mxu3 }
0x11ea   :  { %v2445_v42 = vadd.f32 %v3051_v50, %v2444_v16 }
0x11ec   :  { %2454 = vrot.lane.b32.xlu0 %v2445_v42, %s4538_s8  ;;  %v3030_v62 = vpack.i.bf16 %v2442_v44, %v2445_v42 }
0x123e   :  { %v2453_v22 = vpop.permute.xlu2 %2452 }
0x124d   :  { %v2451_v5 = vpop.permute.xlu1 %2450 }
0x125e   :  { %v2455_v14 = vpop.permute.xlu0 %2454 }
0x125f   :  { %2942 = vmatpush.xpose.msk.msra.mxu1 %vm196_vm9, %v2455_v14 }
0x1263   :  { %2943 = vmatpush.xpose.msk.msra.mxu1 %vm196_vm9, %v2453_v22 }
0x1267   :  { %2944 = vmatpush.xpose.msk.msra.mxu1 %vm196_vm9, %v2451_v5 }
0x126a   :  { %2945 = vmatmul.msk.f32.vlgmr.msra.gmra.mxu1 %vm196_vm9, %v4314_v12 }
0x1272   :  { %2946 = vmatmul.msk.f32.gmra.mxu1 %vm196_vm9, %v2442_v44 }
0x127a   :  { %2947 = vmatmul.msk.f32.gmra.mxu1 %vm196_vm9, %v2445_v42 }
0x12e7   :  { %v2485_v8 = vpop.f32.mrf.mxu1 }
0x12e8   :  { %v2486_v31 = vadd.f32 %v2485_v8, %v185_v27 }
0x12ea   :  { %v2494_v53 = vsel %vm279_vm10, %v2486_v31, -inf }
0x12eb   :  { %2495 = vmax.xlane.f32.xlu0 %v2494_v53 }
0x12ef   :  { %v2488_v56 = vpop.f32.mrf.mxu1 }
0x12f0   :  { %v2489_v33 = vadd.f32 %v2488_v56, %v186_v18 }
0x12f2   :  { %v2497_v10 = vsel %vm279_vm10, %v2489_v33, -inf }
0x12f3   :  { %2498 = vmax.xlane.f32.xlu2 %v2497_v10 }
0x12f7   :  { %v2491_v23 = vpop.f32.mrf.mxu1 }
0x12f8   :  { %v2492_v30 = vadd.f32 %v2491_v23, %v187_v26 }
0x12fa   :  { %v2500_v13 = vsel %vm279_vm10, %v2492_v30, -inf }
0x12fb   :  { %2501 = vmax.xlane.f32.xlu1 %v2500_v13 }
0x1314   :  { %3031 = vrot.lane.b32.xlu1 %v3030_v62, %s4546_s3 }
0x131c   :  { %2668 = vperm.xlu1 %3007, %v2655_v21  }
0x1324   :  { %2658 = vperm.xlu1 %3007, %v2653_v35  }
0x135e   :  { %v2496_v34 = vpop.xlane.xlu0 %2495 }
0x135f   :  { %v2503_v36 = vsub.f32 %v2486_v31, %v2496_v34 }
0x1361   :  { %v2506_v24 = vmul.f32 1.442695, %v2503_v36 }
0x1363   :  { %3182 = vpow2.f32 %v2506_v24 }
0x1366   :  { %v2499_v37 = vpop.xlane.xlu2 %2498 }
0x1367   :  { %v2504_v38 = vsub.f32 %v2489_v33, %v2499_v37  ;;  %v2610_v37 = vld [vmem:[%s4464_s21] sm:$0xff] }
0x1368   :  { %2642 = vmatpush.msrb.mxu0 %v2610_v37 }
0x1369   :  { %v3183_v59 = vpop.eup %3182  ;;  %v2508_v1 = vmul.f32 1.442695, %v2504_v38 }
0x136a   :  { %v2512_v39 = vsel %vm279_vm10, %v3183_v59, 0.0 }
0x136b   :  { %3184 = vpow2.f32 %v2508_v1  ;;  %2513 = vadd.xlane.f32.xlu0 %v2512_v39  ;;  %v2701_v39 = vld [vmem:[%s4468_s25 + $0x18] sm:$0xff] }
0x136c   :  { %2745 = vmatpush.msrb.mxu1 %v2701_v39 }
0x136e   :  { %v2502_v43 = vpop.xlane.xlu1 %2501 }
0x136f   :  { %v2505_v45 = vsub.f32 %v2492_v30, %v2502_v43  ;;  %v2700_v43 = vld [vmem:[%s4468_s25 + $0x10] sm:$0xff] }
0x1370   :  { %2746 = vmatpush.msrb.mxu1 %v2700_v43 }
0x1371   :  { %v4347_v25 = vpop.eup %3184  ;;  %v2510_v47 = vmul.f32 1.442695, %v2505_v45  ;;  %v2699_v45 = vld [vmem:[%s4468_s25 + $0x8] sm:$0xff] }
0x1372   :  { %v2515_v48 = vsel %vm279_vm10, %v4347_v25, 0.0  ;;  %2747 = vmatpush.msrb.mxu1 %v2699_v45 }
0x1373   :  { %3186 = vpow2.f32 %v2510_v47  ;;  %2516 = vadd.xlane.f32.xlu2 %v2515_v48  ;;  %v2957_v47 = vld [vmem:[%s4468_s25 + $0x38] sm:$0xff]  ;;  %v2956_v48 = vld [vmem:[%s4468_s25 + $0x30] sm:$0xff] }
0x1374   :  { %2722 = vmatpush.msra.mxu3 %v2957_v47 }
0x1376   :  { %2723 = vmatpush.msra.mxu3 %v2956_v48 }
0x1379   :  { %v4351_v46 = vpop.eup %3186 }
0x137a   :  { %v2518_v54 = vsel %vm279_vm10, %v4351_v46, 0.0 }
0x137b   :  { %2519 = vadd.xlane.f32.xlu0 %v2518_v54  ;;  %v2963_v54 = vld [vmem:[%s4468_s25 + $0x58] sm:$0xff] }
0x1386   :  { %v3032_v11 = vpop.permute.xlu1 %3031 }
0x1387   :  { %v3033_v49 = vunpack.i.l.bf16 %v3032_v11  ;;  %v3034_v0 = vunpack.i.h.bf16 %v3032_v11  ;;  %v2954_v11 = vld [vmem:[%s4468_s25 + $0x20] sm:$0xff] }
0x1389   :  { %2597 = vmatpush.msra.mxu2 %v3033_v49  ;;  %v2962_v49 = vld [vmem:[%s4468_s25 + $0x50] sm:$0xff] }
0x138b   :  { %2598 = vmatpush.msra.mxu2 %v3034_v0  ;;  %2566 = vrot.lane.b32.xlu2 %v4314_v12, %s4546_s3  ;;  %v2961_v0 = vld [vmem:[%s4468_s25 + $0x48] sm:$0xff] }
0x138f   :  { %2663 = vperm.xlu0 %3008, %v2654_v58   ;;  %v2669_v58 = vpop.permute.xlu1 %2668 }
0x1393   :  { %2684 = vperm.xlu2 %3009, %v2675_v52   ;;  %v2960_v52 = vld [vmem:[%s4468_s25 + $0x40] sm:$0xff] }
0x1397   :  { %2689 = vperm.xlu0 %3008, %v2676_v2  }
0x139b   :  { %2679 = vperm.xlu2 %3009, %v2674_v40   ;;  %v3052_v40 = vld [vmem:[%s4465_s22] ss:$0 sm:$0xff] }
0x13de   :  { %v2514_v17 = vpop.xlane.xlu0 %2513 }
0x13df   :  { %3188 = vrcp.f32 %v2514_v17  ;;  %v2532_v61 = vand.u32 2147483648, %v2514_v17  ;;  %v2530_v19 = vand.u32 2147483647, %v2514_v17  ;;  %vm2526_vm2 = vweird.f32 %v2514_v17 }
0x13e1   :  { %v2533_v4 = vor.u32 1.1754944e-38, %v2532_v61  ;;  %vm2531_vm4 = vcmp.eq.f32.partialorder %v2530_v19, 8.507059e+37 }
0x13e5   :  { %v3189_v63 = vpop.eup %3188 }
0x13e6   :  { %v2522_v60 = vmul.f32 %v3189_v63, %v2514_v17  ;;  %v2517_v29 = vpop.xlane.xlu2 %2516  ;;  %vm2527_vm1 = vweird.f32 %v3189_v63 }
0x13e7   :  { %3190 = vrcp.f32 %v2517_v29  ;;  %vm2528_vm3 = vmor %vm2526_vm2, %vm2527_vm1  ;;  %v2547_v5 = vand.u32 2147483648, %v2517_v29  ;;  %v2545_v8 = vand.u32 2147483647, %v2517_v29  ;;  %vm2541_vm5 = vweird.f32 %v2517_v29 }
0x13e8   :  { %v2523_v57 = vsub.f32 1.0, %v2522_v60  ;;  %v2659_v60 = vpop.permute.xlu1 %2658 }
0x13e9   :  { %v2548_v18 = vor.u32 1.1754944e-38, %v2547_v5  ;;  %vm2546_vm11 = vcmp.eq.f32.partialorder %v2545_v8, 8.507059e+37  ;;  %v3053_v5 = vld [vmem:[%s4553_s16] ss:$0 sm:$0xff] }
0x13ea   :  { %v2524_v41 = vmul.f32 %v3189_v63, %v2523_v57 }
0x13ec   :  { %v2525_v9 = vadd.f32 %v3189_v63, %v2524_v41 }
0x13ed   :  { %v3191_v50 = vpop.eup %3190 }
0x13ee   :  { %v2529_v12 = vsel %vm2528_vm3, %v3189_v63, %v2525_v9  ;;  %v2537_v15 = vmul.f32 %v3191_v50, %v2517_v29  ;;  %v2567_v44 = vpop.permute.xlu2 %2566  ;;  %v2520_v16 = vpop.xlane.xlu0 %2519  ;;  %vm2542_vm6 = vweird.f32 %v3191_v50 }
0x13ef   :  { %v2534_v42 = vsel %vm2531_vm4, %v2533_v4, %v2529_v12  ;;  %3192 = vrcp.f32 %v2520_v16  ;;  %2599 = vmatpush.msra.mxu2 %v2567_v44  ;;  %vm2543_vm7 = vmor %vm2541_vm5, %vm2542_vm6  ;;  %v2562_v30 = vand.u32 2147483648, %v2520_v16  ;;  %v2560_v62 = vand.u32 2147483647, %v2520_v16 }
0x13f0   :  { %v2538_v14 = vsub.f32 1.0, %v2537_v15  ;;  %v2535_v22 = vmul.f32 %v3183_v59, %v2534_v42  ;;  %vm2556_vm12 = vweird.f32 %v2520_v16 }
0x13f1   :  { %v2563_v35 = vor.u32 1.1754944e-38, %v2562_v30  ;;  %vm2561_vm14 = vcmp.eq.f32.partialorder %v2560_v62, 8.507059e+37  ;;  %2773 = vmatpush.msrb.mxu2 %v2963_v54 }
0x13f2   :  { %v2539_v27 = vmul.f32 %v3191_v50, %v2538_v14  ;;  %2948 = vmatmul.msk.f32.vlgmr.msra.gmra.mxu2 %vm279_vm10, %v2535_v22 }
0x13f3   :  { %2774 = vmatpush.msrb.mxu2 %v2962_v49 }
0x13f4   :  { %v2540_v31 = vadd.f32 %v3191_v50, %v2539_v27 }
0x13f5   :  { %v3193_v53 = vpop.eup %3192  ;;  %2775 = vmatpush.msrb.mxu2 %v2961_v0 }
0x13f6   :  { %v2552_v56 = vmul.f32 %v3193_v53, %v2520_v16  ;;  %v2544_v33 = vsel %vm2543_vm7, %v3191_v50, %v2540_v31  ;;  %vm2557_vm0 = vweird.f32 %v3193_v53  ;;  %v2685_v2 = vpop.permute.xlu2 %2684 }
0x13f7   :  { %v2549_v10 = vsel %vm2546_vm11, %v2548_v18, %v2544_v33  ;;  %vm2558_vm13 = vmor %vm2556_vm12, %vm2557_vm0  ;;  %2776 = vmatpush.msrb.mxu2 %v2960_v52 }
0x13f8   :  { %v2553_v26 = vsub.f32 1.0, %v2552_v56  ;;  %v2550_v23 = vmul.f32 %v4347_v25, %v2549_v10  ;;  %v2698_v25 = vld [vmem:[%s4468_s25] sm:$0xff] }
0x13f9   :  { %2748 = vmatpush.msrb.mxu1 %v2698_v25 }
0x13fa   :  { %v2554_v13 = vmul.f32 %v3193_v53, %v2553_v26  ;;  %2949 = vmatmul.msk.f32.gmra.mxu2 %vm279_vm10, %v2550_v23 }
0x13fc   :  { %v2555_v21 = vadd.f32 %v3193_v53, %v2554_v13 }
0x13fe   :  { %v2559_v34 = vsel %vm2558_vm13, %v3193_v53, %v2555_v21  ;;  %v2680_v57 = vpop.permute.xlu2 %2679 }
0x13ff   :  { %v2564_v36 = vsel %vm2561_vm14, %v2563_v35, %v2559_v34 }
0x1400   :  { %v2565_v24 = vmul.f32 %v4351_v46, %v2564_v36  ;;  %v2955_v46 = vld [vmem:[%s4468_s25 + $0x28] sm:$0xff] }
0x1401   :  { %2724 = vmatpush.msra.mxu3 %v2955_v46  ;;  %v2664_v19 = vpop.permute.xlu0 %2663 }
0x1402   :  { %2950 = vmatmul.msk.f32.gmra.mxu2 %vm279_vm10, %v2565_v24 }
0x1403   :  { %2725 = vmatpush.msra.mxu3 %v2954_v11 }
0x1409   :  { %v2690_v44 = vpop.permute.xlu0 %2689 }
0x1475   :  { %v2601_v38 = vpop.f32.mrf.mxu2 }
0x1476   :  { %2951 = vmatmul.msk.f32.vlgmr.msrb.gmra.mxu0 %vm196_vm9, %v2601_v38 }
0x147d   :  { %v2604_v59 = vpop.f32.mrf.mxu2 }
0x147e   :  { %2952 = vmatmul.msk.f32.gmra.mxu0 %vm196_vm9, %v2604_v59 }
0x1485   :  { %v2607_v1 = vpop.f32.mrf.mxu2 }
0x1486   :  { %2953 = vmatmul.msk.f32.gmra.mxu0 %vm196_vm9, %v2607_v1 }
0x14f3   :  { %v2644_v17 = vpop.f32.mrf.mxu0 }
0x14f4   :  { %v2645_v63 = vadd.f32 %v3052_v40, %v2644_v17 }
0x14f6   :  { %v2671_v29 = vmul.f32 %v2659_v60, %v2645_v63 }
0x14f8   :  { %v2692_v61 = vadd.f32 %v2680_v57, %v2671_v29 }
0x14fa   :  { %v2695_v51 = vadd.f32 %v2692_v61, %v4296_v55 }
0x14fb   :  { %v2647_v6 = vpop.f32.mrf.mxu0 }
0x14fc   :  { %v2648_v41 = vadd.f32 %v3052_v40, %v2647_v6  ;;  %2959 = vmatmul.msk.f32.vlgmr.msrb.gmra.mxu1 %vm196_vm9, %v2695_v51 }
0x14fe   :  { %v2672_v3 = vmul.f32 %v2664_v19, %v2648_v41 }
0x1500   :  { %v2693_v9 = vadd.f32 %v2685_v2, %v2672_v3 }
0x1502   :  { %v2696_v50 = vadd.f32 %v2693_v9, %v4302_v20 }
0x1503   :  { %v2650_v4 = vpop.f32.mrf.mxu0 }
0x1504   :  { %v2651_v12 = vadd.f32 %v3052_v40, %v2650_v4  ;;  %2958 = vmatmul.msk.f32.vlgmr.msra.gmra.mxu3 %vm196_vm9, %v2696_v50 }
0x1506   :  { %v2673_v15 = vmul.f32 %v2669_v58, %v2651_v12 }
0x1508   :  { %v2694_v16 = vadd.f32 %v2690_v44, %v2673_v15 }
0x150a   :  { %v2697_v42 = vadd.f32 %v2694_v16, %v4307_v7 }
0x150c   :  { %2964 = vmatmul.msk.f32.vlgmr.msrb.gmra.mxu2 %vm196_vm9, %v2697_v42 }
0x1579   :  { %v2750_v14 = vpop.f32.mrf.mxu1 }
0x1587   :  { %v2727_v55 = vpop.f32.mrf.mxu3 }
0x1588   :  { %v2751_v22 = vadd.f32 %v2750_v14, %v2727_v55 }
0x158f   :  { %v2778_v27 = vpop.f32.mrf.mxu2 }
0x1590   :  { %v2781_v20 = vadd.f32 %v2778_v27, %v2751_v22 }
0x1592   :  { %v2786_v8 = vadd.f32 %v3053_v5, %v2781_v20 }
0x1594   :  { %v2787_v7 = vmul.f32 %v2786_v8, %v3391_v28 }
0x1596   :  { %v2788_v31 = vadd.f32 %v2787_v7, %v3395_v32 }
0x1598   :  { %2789 = vst.msk [vmem:[#allocation2] sm:$0xff] %vm149_vm8, %v2788_v31 }
0x1599   :  { %2800 = dma.vmem_to_hbm [thread:$0]  %s2796_s12, 128, %s2798_s27, [#allocation3]  }
0x159a   :  { %3221 = dma.done.wait [#allocation3], 128  }
0x159b   :  { %3222 = vsyncadd [#allocation3], 4294967168 }
0x159c   :  { %2805 = vsyncpa [#allocation3], 1 }

</bundles_post_ra>
